<compile_context>
chip_gen: v7x
topology: tpu7x:2x2x1
jax: 0.10.0
libtpu: 0.0.40
codegen_flags: <defaults>
</compile_context>

<pallas_src>
import jax
import jax.numpy as jnp
from jax.experimental import pallas as pl
from jax.experimental.pallas import tpu as pltpu


def _masked_mlp_kernel(xT_ref,
                       w1_ref, b1_ref, m1_ref,
                       w2_ref, b2_ref, m2_ref,
                       w3_ref, b3_ref, m3_ref,
                       o_ref):
    ep = m1_ref.dtype        # epilogue/select dtype: bf16 on v6e/v7x, f32 on v5e
    mxu = w1_ref.dtype       # MXU input dtype (bf16)

    # Activations are [F, TB]: features on sublanes, batch on the 128 lanes.
    x = xT_ref[...]                                               # [IN, TB]

    # --- Linear 0 (f32 accumulate, bias folded in f32) + masked ReLU in `ep` --
    h1 = (jnp.dot(w1_ref[...], x, preferred_element_type=jnp.float32)
          + b1_ref[...]).astype(ep)                               # [H, TB]
    m1 = m1_ref[...]                                              # [H, 1]
    a1 = jnp.maximum(h1, 0)
    a1 = jnp.where(m1 == 1, h1, a1)        # mask==1: pass pre-activation through
    a1 = jnp.where(m1 == -1, 0, a1)        # mask==-1: force zero

    # --- Linear 2 + masked Tanh (tanh in f32 on the EUP, selects in `ep`) ----
    h2 = (jnp.dot(w2_ref[...], a1.astype(mxu), preferred_element_type=jnp.float32)
          + b2_ref[...])                                          # [H, TB] f32
    a2 = jnp.tanh(h2).astype(ep)
    m2 = m2_ref[...]
    a2 = jnp.where(m2 == 1, 1, a2)
    a2 = jnp.where(m2 == -1, -1, a2)

    # --- Linear 4 + masked Sigmoid ([OUT, TB] is tiny -> keep f32, exact divide)
    h3 = (jnp.dot(w3_ref[...], a2.astype(mxu), preferred_element_type=jnp.float32)
          + b3_ref[...])                                          # [OUT, TB] f32
    m3 = m3_ref[...]
    a3 = 1.0 / (1.0 + jnp.exp(-h3))
    a3 = jnp.where(m3 == 1.0, 1.0, a3)
    a3 = jnp.where(m3 == -1.0, 0.0, a3)

    o_ref[...] = a3.astype(o_ref.dtype)    # lane-dense [OUT, TB] store


def _round_up(x, m):
    return ((x + m - 1) // m) * m


def _default_epilogue_dtype():
    # bf16 VPU/EUP exists on v6e / v7x; keep f32 elementwise math elsewhere
    # (v5e and older have no bf16 VALU/EUP and are HBM-bound anyway).
    try:
        kind = jax.devices()[0].device_kind.lower()
    except Exception:
        return jnp.float32
    if ("v6" in kind) or ("v7" in kind) or ("7x" in kind):
        return jnp.bfloat16
    return jnp.float32


def masked_network_forward_T(xT, params, masks, *, tb=None,
                             mxu_dtype=jnp.bfloat16,
                             epilogue_dtype=None,
                             out_dtype=jnp.bfloat16):
    """Fused MaskedNetwork forward in batch-last layout.

    xT:      [IN, B] activations (batch on the trailing/lane axis). f32 or bf16;
             cast once to `mxu_dtype` here (no-op if the caller already hands bf16).
    params:  {"0": (W1,b1), "2": (W2,b2), "4": (W3,b3)} with W in PyTorch [out,in].
    masks:   {"1": [H], "3": [H], "5": [OUT]} with values in {-1, 0, 1}.
    Returns: [OUT, B] in `out_dtype`.
    """
    in_dim, B = xT.shape
    w1, b1 = params["0"]
    w2, b2 = params["2"]
    w3, b3 = params["4"]
    out_dim = w3.shape[0]

    if epilogue_dtype is None:
        epilogue_dtype = _default_epilogue_dtype()

    if tb is None:
        # Big tiles amortize per-step overhead; aim for >=2 grid steps so both
        # v7x TensorCores get work. Cap at 4096 (a few MiB of VMEM per tile).
        tb = min(4096, max(128, _round_up((B + 1) // 2, 128)))
    nb = pl.cdiv(B, tb)

    xTc = xT.astype(mxu_dtype)
    col32 = lambda v: jnp.asarray(v, jnp.float32).reshape(-1, 1)       # [F]->[F,1]
    colep = lambda v: jnp.asarray(v, epilogue_dtype).reshape(-1, 1)

    # Mask compares stay in-kernel: they operate on [F,1] columns (negligible)
    # and hoisting predicates to the wrapper would just add un-hidden XLA ops.
    operands = (
        xTc,
        w1.astype(mxu_dtype), col32(b1), colep(masks["1"]),
        w2.astype(mxu_dtype), col32(b2), colep(masks["3"]),
        w3.astype(mxu_dtype), col32(b3), col32(masks["5"]),
    )

    def build(resident_mode):
        def res(a):
            if resident_mode is None:
                return pl.BlockSpec(a.shape, lambda i: (0, 0))
            return pl.BlockSpec(a.shape, lambda i: (0, 0),
                                pipeline_mode=resident_mode)
        in_specs = [pl.BlockSpec((in_dim, tb), lambda i: (0, i))] + [
            res(a) for a in operands[1:]
        ]
        return pl.pallas_call(
            _masked_mlp_kernel,
            out_shape=jax.ShapeDtypeStruct((out_dim, B), out_dtype),
            grid=(nb,),
            in_specs=in_specs,
            out_specs=pl.BlockSpec((out_dim, tb), lambda i: (0, i)),
            compiler_params=pltpu.CompilerParams(
                dimension_semantics=("parallel",)),   # megacore-shardable on v7x
        )

    try:
        # Weights/biases/masks use constant index_maps (never refetched), so
        # single-buffer them to skip pointless double-buffer allocation.
        return build(pl.Buffered(1))(*operands)
    except Exception:
        # Fallback for Pallas versions without single-buffered pipeline_mode.
        return build(None)(*operands)


def masked_network_forward(x, params, masks, **kwargs):
    """[B, IN] compatibility wrapper. Prefer masked_network_forward_T with
    batch-last layouts on the hot path (the transposes here are extra HBM passes)."""
    return masked_network_forward_T(x.T, params, masks, **kwargs).T


def _reference_forward(x, params, masks):
    """Pure-JAX f32 reference mirroring MaskedNetwork.forward semantics ([B, IN])."""
    w1, b1 = params["0"]
    w2, b2 = params["2"]
    w3, b3 = params["4"]

    h1 = x @ w1.T + b1
    m1 = masks["1"][None, :]
    a1 = jnp.maximum(h1, 0.0)
    a1 = jnp.where(m1 == 1, h1, a1)
    a1 = jnp.where(m1 == -1, 0.0, a1)

    h2 = a1 @ w2.T + b2
    m2 = masks["3"][None, :]
    a2 = jnp.tanh(h2)
    a2 = jnp.where(m2 == 1, 1.0, a2)
    a2 = jnp.where(m2 == -1, -1.0, a2)

    h3 = a2 @ w3.T + b3
    m3 = masks["5"][None, :]
    a3 = jax.nn.sigmoid(h3)
    a3 = jnp.where(m3 == 1, 1.0, a3)
    a3 = jnp.where(m3 == -1, 0.0, a3)
    return a3


if __name__ == "__main__":
    # Small but multi-tile: B=600 -> auto tile tb=384 -> 2 "parallel" grid steps.
    B, IN, H, OUT = 600, 16, 32, 8
    key = jax.random.PRNGKey(0)
    kx, k1, k2, k3, kb1, kb2, kb3 = jax.random.split(key, 7)

    # Inputs generated directly in batch-last [IN, B] layout (no transpose pass).
    xT = jax.random.normal(kx, (IN, B), dtype=jnp.float32)

    # Weights in PyTorch Linear layout [out, in].
    params = {
        "0": (0.1 * jax.random.normal(k1, (H, IN), dtype=jnp.float32),
              0.01 * jax.random.normal(kb1, (H,), dtype=jnp.float32)),
        "2": (0.1 * jax.random.normal(k2, (H, H), dtype=jnp.float32),
              0.01 * jax.random.normal(kb2, (H,), dtype=jnp.float32)),
        "4": (0.1 * jax.random.normal(k3, (OUT, H), dtype=jnp.float32),
              0.01 * jax.random.normal(kb3, (OUT,), dtype=jnp.float32)),
    }

    # Deterministic masks with values in {-1, 0, 1}.
    masks = {
        "1": (jnp.arange(H) % 3 - 1).astype(jnp.float32),
        "3": ((jnp.arange(H) + 1) % 3 - 1).astype(jnp.float32),
        "5": ((jnp.arange(OUT) + 2) % 3 - 1).astype(jnp.float32),
    }

    outT = masked_network_forward_T(xT, params, masks)
    outT = jax.block_until_ready(outT)
    assert outT.shape == (OUT, B)

    ref = _reference_forward(xT.T, params, masks)               # [B, OUT] f32
    out = outT.astype(jnp.float32).T                            # demo-only transpose
    max_err = float(jnp.max(jnp.abs(out - ref)))
    # bf16 MXU inputs + bf16 output (and bf16 epilogue on v6e/v7x): loose-but-safe tol.
    assert jnp.allclose(out, ref, atol=2e-2, rtol=2e-2), \
        f"mismatch vs reference (max_err={max_err})"

    print("KERNEL_OK")
</pallas_src>

<mosaic_0001>
module attributes {stable_mosaic.version = 11 : i64} {
  func.func @_masked_mlp_kernel(%arg0: i32, %arg1: memref<16x384xbf16, #tpu.memory_space<vmem>>, %arg2: memref<32x16xbf16, #tpu.memory_space<vmem>>, %arg3: memref<32x1xf32, #tpu.memory_space<vmem>>, %arg4: memref<32x1xf32, #tpu.memory_space<vmem>>, %arg5: memref<32x32xbf16, #tpu.memory_space<vmem>>, %arg6: memref<32x1xf32, #tpu.memory_space<vmem>>, %arg7: memref<32x1xf32, #tpu.memory_space<vmem>>, %arg8: memref<8x32xbf16, #tpu.memory_space<vmem>>, %arg9: memref<8x1xf32, #tpu.memory_space<vmem>>, %arg10: memref<8x1xf32, #tpu.memory_space<vmem>>, %arg11: memref<8x384xbf16, #tpu.memory_space<vmem>>) attributes {dimension_semantics = [#tpu.dimension_semantics<parallel>], iteration_bounds = array<i64: 2>, scalar_prefetch = 0 : i64, scratch_operands = 0 : i64, tpu.core_type = #tpu.core_type<tc>, window_params = [{transform_indices = @transform_0, window_bounds = array<i64: 16, 384>}, {pipeline_mode = #tpu.pipeline_mode<synchronous>, transform_indices = @transform_1, window_bounds = array<i64: 32, 16>}, {pipeline_mode = #tpu.pipeline_mode<synchronous>, transform_indices = @transform_2, window_bounds = array<i64: 32, 1>}, {pipeline_mode = #tpu.pipeline_mode<synchronous>, transform_indices = @transform_3, window_bounds = array<i64: 32, 1>}, {pipeline_mode = #tpu.pipeline_mode<synchronous>, transform_indices = @transform_4, window_bounds = array<i64: 32, 32>}, {pipeline_mode = #tpu.pipeline_mode<synchronous>, transform_indices = @transform_5, window_bounds = array<i64: 32, 1>}, {pipeline_mode = #tpu.pipeline_mode<synchronous>, transform_indices = @transform_6, window_bounds = array<i64: 32, 1>}, {pipeline_mode = #tpu.pipeline_mode<synchronous>, transform_indices = @transform_7, window_bounds = array<i64: 8, 32>}, {pipeline_mode = #tpu.pipeline_mode<synchronous>, transform_indices = @transform_8, window_bounds = array<i64: 8, 1>}, {pipeline_mode = #tpu.pipeline_mode<synchronous>, transform_indices = @transform_9, window_bounds = array<i64: 8, 1>}, {transform_indices = @transform_10, window_bounds = array<i64: 8, 384>}]} {
    %c0 = arith.constant 0 : index
    %c0_0 = arith.constant 0 : index
    %0 = vector.load %arg1[%c0, %c0_0] : memref<16x384xbf16, #tpu.memory_space<vmem>>, vector<16x384xbf16>
    %c0_1 = arith.constant 0 : index
    %c0_2 = arith.constant 0 : index
    %1 = vector.load %arg2[%c0_1, %c0_2] : memref<32x16xbf16, #tpu.memory_space<vmem>>, vector<32x16xbf16>
    %cst = arith.constant dense<0.000000e+00> : vector<32x384xf32>
    %2 = tpu.matmul %1, %0, %cst {dimension_numbers = #tpu.dot_dimension_numbers<[1], [0], [0], [1], [0, 0, 1, 1], [], []>} : vector<32x16xbf16>, vector<16x384xbf16>, vector<32x384xf32> -> vector<32x384xf32>
    %c0_3 = arith.constant 0 : index
    %c0_4 = arith.constant 0 : index
    %3 = vector.load %arg3[%c0_3, %c0_4] : memref<32x1xf32, #tpu.memory_space<vmem>>, vector<32x1xf32>
    %4 = vector.broadcast %3 : vector<32x1xf32> to vector<32x384xf32>
    %5 = arith.addf %2, %4 : vector<32x384xf32>
    %c0_5 = arith.constant 0 : index
    %c0_6 = arith.constant 0 : index
    %6 = vector.load %arg4[%c0_5, %c0_6] : memref<32x1xf32, #tpu.memory_space<vmem>>, vector<32x1xf32>
    %cst_7 = arith.constant 0.000000e+00 : f32
    %7 = vector.broadcast %cst_7 : f32 to vector<32x384xf32>
    %8 = arith.maximumf %5, %7 : vector<32x384xf32>
    %cst_8 = arith.constant 1.000000e+00 : f32
    %9 = vector.broadcast %cst_8 : f32 to vector<32x1xf32>
    %10 = arith.cmpf oeq, %6, %9 : vector<32x1xf32>
    %11 = vector.shape_cast %10 : vector<32x1xi1> to vector<32x1xi1>
    %12 = vector.broadcast %11 : vector<32x1xi1> to vector<32x384xi1>
    %13 = arith.select %12, %5, %8 : vector<32x384xi1>, vector<32x384xf32>
    %cst_9 = arith.constant -1.000000e+00 : f32
    %14 = vector.broadcast %cst_9 : f32 to vector<32x1xf32>
    %15 = arith.cmpf oeq, %6, %14 : vector<32x1xf32>
    %c0_i32 = arith.constant 0 : i32
    %16 = arith.sitofp %c0_i32 : i32 to f32
    %17 = vector.shape_cast %15 : vector<32x1xi1> to vector<32x1xi1>
    %18 = vector.broadcast %17 : vector<32x1xi1> to vector<32x384xi1>
    %19 = vector.broadcast %16 : f32 to vector<32x384xf32>
    %20 = arith.select %18, %19, %13 : vector<32x384xi1>, vector<32x384xf32>
    %c0_10 = arith.constant 0 : index
    %c0_11 = arith.constant 0 : index
    %21 = vector.load %arg5[%c0_10, %c0_11] : memref<32x32xbf16, #tpu.memory_space<vmem>>, vector<32x32xbf16>
    %22 = arith.truncf %20 : vector<32x384xf32> to vector<32x384xbf16>
    %cst_12 = arith.constant dense<0.000000e+00> : vector<32x384xf32>
    %23 = tpu.matmul %21, %22, %cst_12 {dimension_numbers = #tpu.dot_dimension_numbers<[1], [0], [0], [1], [0, 0, 1, 1], [], []>} : vector<32x32xbf16>, vector<32x384xbf16>, vector<32x384xf32> -> vector<32x384xf32>
    %c0_13 = arith.constant 0 : index
    %c0_14 = arith.constant 0 : index
    %24 = vector.load %arg6[%c0_13, %c0_14] : memref<32x1xf32, #tpu.memory_space<vmem>>, vector<32x1xf32>
    %25 = vector.broadcast %24 : vector<32x1xf32> to vector<32x384xf32>
    %26 = arith.addf %23, %25 : vector<32x384xf32>
    %27 = math.tanh %26 : vector<32x384xf32>
    %c0_15 = arith.constant 0 : index
    %c0_16 = arith.constant 0 : index
    %28 = vector.load %arg7[%c0_15, %c0_16] : memref<32x1xf32, #tpu.memory_space<vmem>>, vector<32x1xf32>
    %cst_17 = arith.constant 1.000000e+00 : f32
    %29 = vector.broadcast %cst_17 : f32 to vector<32x1xf32>
    %30 = arith.cmpf oeq, %28, %29 : vector<32x1xf32>
    %c1_i32 = arith.constant 1 : i32
    %31 = arith.sitofp %c1_i32 : i32 to f32
    %32 = vector.shape_cast %30 : vector<32x1xi1> to vector<32x1xi1>
    %33 = vector.broadcast %32 : vector<32x1xi1> to vector<32x384xi1>
    %34 = vector.broadcast %31 : f32 to vector<32x384xf32>
    %35 = arith.select %33, %34, %27 : vector<32x384xi1>, vector<32x384xf32>
    %cst_18 = arith.constant -1.000000e+00 : f32
    %36 = vector.broadcast %cst_18 : f32 to vector<32x1xf32>
    %37 = arith.cmpf oeq, %28, %36 : vector<32x1xf32>
    %c-1_i32 = arith.constant -1 : i32
    %38 = arith.sitofp %c-1_i32 : i32 to f32
    %39 = vector.shape_cast %37 : vector<32x1xi1> to vector<32x1xi1>
    %40 = vector.broadcast %39 : vector<32x1xi1> to vector<32x384xi1>
    %41 = vector.broadcast %38 : f32 to vector<32x384xf32>
    %42 = arith.select %40, %41, %35 : vector<32x384xi1>, vector<32x384xf32>
    %c0_19 = arith.constant 0 : index
    %c0_20 = arith.constant 0 : index
    %43 = vector.load %arg8[%c0_19, %c0_20] : memref<8x32xbf16, #tpu.memory_space<vmem>>, vector<8x32xbf16>
    %44 = arith.truncf %42 : vector<32x384xf32> to vector<32x384xbf16>
    %cst_21 = arith.constant dense<0.000000e+00> : vector<8x384xf32>
    %45 = tpu.matmul %43, %44, %cst_21 {dimension_numbers = #tpu.dot_dimension_numbers<[1], [0], [0], [1], [0, 0, 1, 1], [], []>} : vector<8x32xbf16>, vector<32x384xbf16>, vector<8x384xf32> -> vector<8x384xf32>
    %c0_22 = arith.constant 0 : index
    %c0_23 = arith.constant 0 : index
    %46 = vector.load %arg9[%c0_22, %c0_23] : memref<8x1xf32, #tpu.memory_space<vmem>>, vector<8x1xf32>
    %47 = vector.broadcast %46 : vector<8x1xf32> to vector<8x384xf32>
    %48 = arith.addf %45, %47 : vector<8x384xf32>
    %c0_24 = arith.constant 0 : index
    %c0_25 = arith.constant 0 : index
    %49 = vector.load %arg10[%c0_24, %c0_25] : memref<8x1xf32, #tpu.memory_space<vmem>>, vector<8x1xf32>
    %cst_26 = arith.constant 0.000000e+00 : f32
    %50 = vector.broadcast %cst_26 : f32 to vector<8x384xf32>
    %51 = arith.subf %50, %48 : vector<8x384xf32>
    %52 = math.exp %51 : vector<8x384xf32>
    %cst_27 = arith.constant 1.000000e+00 : f32
    %53 = vector.broadcast %cst_27 : f32 to vector<8x384xf32>
    %54 = arith.addf %53, %52 : vector<8x384xf32>
    %cst_28 = arith.constant 1.000000e+00 : f32
    %55 = vector.broadcast %cst_28 : f32 to vector<8x384xf32>
    %56 = arith.divf %55, %54 : vector<8x384xf32>
    %cst_29 = arith.constant 1.000000e+00 : f32
    %57 = vector.broadcast %cst_29 : f32 to vector<8x1xf32>
    %58 = arith.cmpf oeq, %49, %57 : vector<8x1xf32>
    %cst_30 = arith.constant 1.000000e+00 : f32
    %59 = vector.shape_cast %58 : vector<8x1xi1> to vector<8x1xi1>
    %60 = vector.broadcast %59 : vector<8x1xi1> to vector<8x384xi1>
    %61 = vector.broadcast %cst_30 : f32 to vector<8x384xf32>
    %62 = arith.select %60, %61, %56 : vector<8x384xi1>, vector<8x384xf32>
    %cst_31 = arith.constant -1.000000e+00 : f32
    %63 = vector.broadcast %cst_31 : f32 to vector<8x1xf32>
    %64 = arith.cmpf oeq, %49, %63 : vector<8x1xf32>
    %cst_32 = arith.constant 0.000000e+00 : f32
    %65 = vector.shape_cast %64 : vector<8x1xi1> to vector<8x1xi1>
    %66 = vector.broadcast %65 : vector<8x1xi1> to vector<8x384xi1>
    %67 = vector.broadcast %cst_32 : f32 to vector<8x384xf32>
    %68 = arith.select %66, %67, %62 : vector<8x384xi1>, vector<8x384xf32>
    %69 = arith.truncf %68 : vector<8x384xf32> to vector<8x384xbf16>
    %c0_33 = arith.constant 0 : index
    %c0_34 = arith.constant 0 : index
    %70 = vector.load %arg11[%c0_33, %c0_34] : memref<8x384xbf16, #tpu.memory_space<vmem>>, vector<8x384xbf16>
    tpu.vector_store %arg11[%c0_33, %c0_34], %69 {strides = array<i32>} : memref<8x384xbf16, #tpu.memory_space<vmem>>, vector<8x384xbf16>,
    return
  }
  func.func @transform_0(%arg0: i32) -> (i32, i32) {
    %c0_i32 = arith.constant 0 : i32
    %c0_i32_0 = arith.constant 0 : i32
    return %c0_i32, %arg0 : i32, i32
  }
  func.func @transform_1(%arg0: i32) -> (i32, i32) {
    %c0_i32 = arith.constant 0 : i32
    %c0_i32_0 = arith.constant 0 : i32
    %c0_i32_1 = arith.constant 0 : i32
    return %c0_i32, %c0_i32_0 : i32, i32
  }
  func.func @transform_2(%arg0: i32) -> (i32, i32) {
    %c0_i32 = arith.constant 0 : i32
    %c0_i32_0 = arith.constant 0 : i32
    %c0_i32_1 = arith.constant 0 : i32
    return %c0_i32, %c0_i32_0 : i32, i32
  }
  func.func @transform_3(%arg0: i32) -> (i32, i32) {
    %c0_i32 = arith.constant 0 : i32
    %c0_i32_0 = arith.constant 0 : i32
    %c0_i32_1 = arith.constant 0 : i32
    return %c0_i32, %c0_i32_0 : i32, i32
  }
  func.func @transform_4(%arg0: i32) -> (i32, i32) {
    %c0_i32 = arith.constant 0 : i32
    %c0_i32_0 = arith.constant 0 : i32
    %c0_i32_1 = arith.constant 0 : i32
    return %c0_i32, %c0_i32_0 : i32, i32
  }
  func.func @transform_5(%arg0: i32) -> (i32, i32) {
    %c0_i32 = arith.constant 0 : i32
    %c0_i32_0 = arith.constant 0 : i32
    %c0_i32_1 = arith.constant 0 : i32
    return %c0_i32, %c0_i32_0 : i32, i32
  }
  func.func @transform_6(%arg0: i32) -> (i32, i32) {
    %c0_i32 = arith.constant 0 : i32
    %c0_i32_0 = arith.constant 0 : i32
    %c0_i32_1 = arith.constant 0 : i32
    return %c0_i32, %c0_i32_0 : i32, i32
  }
  func.func @transform_7(%arg0: i32) -> (i32, i32) {
    %c0_i32 = arith.constant 0 : i32
    %c0_i32_0 = arith.constant 0 : i32
    %c0_i32_1 = arith.constant 0 : i32
    return %c0_i32, %c0_i32_0 : i32, i32
  }
  func.func @transform_8(%arg0: i32) -> (i32, i32) {
    %c0_i32 = arith.constant 0 : i32
    %c0_i32_0 = arith.constant 0 : i32
    %c0_i32_1 = arith.constant 0 : i32
    return %c0_i32, %c0_i32_0 : i32, i32
  }
  func.func @transform_9(%arg0: i32) -> (i32, i32) {
    %c0_i32 = arith.constant 0 : i32
    %c0_i32_0 = arith.constant 0 : i32
    %c0_i32_1 = arith.constant 0 : i32
    return %c0_i32, %c0_i32_0 : i32, i32
  }
  func.func @transform_10(%arg0: i32) -> (i32, i32) {
    %c0_i32 = arith.constant 0 : i32
    %c0_i32_0 = arith.constant 0 : i32
    return %c0_i32, %arg0 : i32, i32
  }
}

module attributes {stable_mosaic.version = 11 : i64} {
  func.func @_masked_mlp_kernel(%arg0: i32, %arg1: memref<16x384xbf16, #tpu.memory_space<vmem>>, %arg2: memref<32x16xbf16, #tpu.memory_space<vmem>>, %arg3: memref<32x1xf32, #tpu.memory_space<vmem>>, %arg4: memref<32x1xf32, #tpu.memory_space<vmem>>, %arg5: memref<32x32xbf16, #tpu.memory_space<vmem>>, %arg6: memref<32x1xf32, #tpu.memory_space<vmem>>, %arg7: memref<32x1xf32, #tpu.memory_space<vmem>>, %arg8: memref<8x32xbf16, #tpu.memory_space<vmem>>, %arg9: memref<8x1xf32, #tpu.memory_space<vmem>>, %arg10: memref<8x1xf32, #tpu.memory_space<vmem>>, %arg11: memref<8x384xbf16, #tpu.memory_space<vmem>>) attributes {dimension_semantics = [#tpu.dimension_semantics<parallel>], iteration_bounds = array<i64: 2>, scalar_prefetch = 0 : i64, scratch_operands = 0 : i64, tpu.core_type = #tpu.core_type<tc>, window_params = [{transform_indices = @transform_0, window_bounds = array<i64: 16, 384>}, {pipeline_mode = #tpu.pipeline_mode<synchronous>, transform_indices = @transform_1, window_bounds = array<i64: 32, 16>}, {pipeline_mode = #tpu.pipeline_mode<synchronous>, transform_indices = @transform_2, window_bounds = array<i64: 32, 1>}, {pipeline_mode = #tpu.pipeline_mode<synchronous>, transform_indices = @transform_3, window_bounds = array<i64: 32, 1>}, {pipeline_mode = #tpu.pipeline_mode<synchronous>, transform_indices = @transform_4, window_bounds = array<i64: 32, 32>}, {pipeline_mode = #tpu.pipeline_mode<synchronous>, transform_indices = @transform_5, window_bounds = array<i64: 32, 1>}, {pipeline_mode = #tpu.pipeline_mode<synchronous>, transform_indices = @transform_6, window_bounds = array<i64: 32, 1>}, {pipeline_mode = #tpu.pipeline_mode<synchronous>, transform_indices = @transform_7, window_bounds = array<i64: 8, 32>}, {pipeline_mode = #tpu.pipeline_mode<synchronous>, transform_indices = @transform_8, window_bounds = array<i64: 8, 1>}, {pipeline_mode = #tpu.pipeline_mode<synchronous>, transform_indices = @transform_9, window_bounds = array<i64: 8, 1>}, {transform_indices = @transform_10, window_bounds = array<i64: 8, 384>}]} {
    %c0 = arith.constant 0 : index
    %c0_0 = arith.constant 0 : index
    %0 = vector.load %arg1[%c0, %c0_0] : memref<16x384xbf16, #tpu.memory_space<vmem>>, vector<16x384xbf16>
    %c0_1 = arith.constant 0 : index
    %c0_2 = arith.constant 0 : index
    %1 = vector.load %arg2[%c0_1, %c0_2] : memref<32x16xbf16, #tpu.memory_space<vmem>>, vector<32x16xbf16>
    %cst = arith.constant dense<0.000000e+00> : vector<32x384xf32>
    %2 = tpu.matmul %1, %0, %cst {dimension_numbers = #tpu.dot_dimension_numbers<[1], [0], [0], [1], [0, 0, 1, 1], [], []>} : vector<32x16xbf16>, vector<16x384xbf16>, vector<32x384xf32> -> vector<32x384xf32>
    %c0_3 = arith.constant 0 : index
    %c0_4 = arith.constant 0 : index
    %3 = vector.load %arg3[%c0_3, %c0_4] : memref<32x1xf32, #tpu.memory_space<vmem>>, vector<32x1xf32>
    %4 = vector.broadcast %3 : vector<32x1xf32> to vector<32x384xf32>
    %5 = arith.addf %2, %4 : vector<32x384xf32>
    %c0_5 = arith.constant 0 : index
    %c0_6 = arith.constant 0 : index
    %6 = vector.load %arg4[%c0_5, %c0_6] : memref<32x1xf32, #tpu.memory_space<vmem>>, vector<32x1xf32>
    %cst_7 = arith.constant 0.000000e+00 : f32
    %7 = vector.broadcast %cst_7 : f32 to vector<32x384xf32>
    %8 = arith.maximumf %5, %7 : vector<32x384xf32>
    %cst_8 = arith.constant 1.000000e+00 : f32
    %9 = vector.broadcast %cst_8 : f32 to vector<32x1xf32>
    %10 = arith.cmpf oeq, %6, %9 : vector<32x1xf32>
    %11 = vector.shape_cast %10 : vector<32x1xi1> to vector<32x1xi1>
    %12 = vector.broadcast %11 : vector<32x1xi1> to vector<32x384xi1>
    %13 = arith.select %12, %5, %8 : vector<32x384xi1>, vector<32x384xf32>
    %cst_9 = arith.constant -1.000000e+00 : f32
    %14 = vector.broadcast %cst_9 : f32 to vector<32x1xf32>
    %15 = arith.cmpf oeq, %6, %14 : vector<32x1xf32>
    %c0_i32 = arith.constant 0 : i32
    %16 = arith.sitofp %c0_i32 : i32 to f32
    %17 = vector.shape_cast %15 : vector<32x1xi1> to vector<32x1xi1>
    %18 = vector.broadcast %17 : vector<32x1xi1> to vector<32x384xi1>
    %19 = vector.broadcast %16 : f32 to vector<32x384xf32>
    %20 = arith.select %18, %19, %13 : vector<32x384xi1>, vector<32x384xf32>
    %c0_10 = arith.constant 0 : index
    %c0_11 = arith.constant 0 : index
    %21 = vector.load %arg5[%c0_10, %c0_11] : memref<32x32xbf16, #tpu.memory_space<vmem>>, vector<32x32xbf16>
    %22 = arith.truncf %20 : vector<32x384xf32> to vector<32x384xbf16>
    %cst_12 = arith.constant dense<0.000000e+00> : vector<32x384xf32>
    %23 = tpu.matmul %21, %22, %cst_12 {dimension_numbers = #tpu.dot_dimension_numbers<[1], [0], [0], [1], [0, 0, 1, 1], [], []>} : vector<32x32xbf16>, vector<32x384xbf16>, vector<32x384xf32> -> vector<32x384xf32>
    %c0_13 = arith.constant 0 : index
    %c0_14 = arith.constant 0 : index
    %24 = vector.load %arg6[%c0_13, %c0_14] : memref<32x1xf32, #tpu.memory_space<vmem>>, vector<32x1xf32>
    %25 = vector.broadcast %24 : vector<32x1xf32> to vector<32x384xf32>
    %26 = arith.addf %23, %25 : vector<32x384xf32>
    %27 = math.tanh %26 : vector<32x384xf32>
    %c0_15 = arith.constant 0 : index
    %c0_16 = arith.constant 0 : index
    %28 = vector.load %arg7[%c0_15, %c0_16] : memref<32x1xf32, #tpu.memory_space<vmem>>, vector<32x1xf32>
    %cst_17 = arith.constant 1.000000e+00 : f32
    %29 = vector.broadcast %cst_17 : f32 to vector<32x1xf32>
    %30 = arith.cmpf oeq, %28, %29 : vector<32x1xf32>
    %c1_i32 = arith.constant 1 : i32
    %31 = arith.sitofp %c1_i32 : i32 to f32
    %32 = vector.shape_cast %30 : vector<32x1xi1> to vector<32x1xi1>
    %33 = vector.broadcast %32 : vector<32x1xi1> to vector<32x384xi1>
    %34 = vector.broadcast %31 : f32 to vector<32x384xf32>
    %35 = arith.select %33, %34, %27 : vector<32x384xi1>, vector<32x384xf32>
    %cst_18 = arith.constant -1.000000e+00 : f32
    %36 = vector.broadcast %cst_18 : f32 to vector<32x1xf32>
    %37 = arith.cmpf oeq, %28, %36 : vector<32x1xf32>
    %c-1_i32 = arith.constant -1 : i32
    %38 = arith.sitofp %c-1_i32 : i32 to f32
    %39 = vector.shape_cast %37 : vector<32x1xi1> to vector<32x1xi1>
    %40 = vector.broadcast %39 : vector<32x1xi1> to vector<32x384xi1>
    %41 = vector.broadcast %38 : f32 to vector<32x384xf32>
    %42 = arith.select %40, %41, %35 : vector<32x384xi1>, vector<32x384xf32>
    %c0_19 = arith.constant 0 : index
    %c0_20 = arith.constant 0 : index
    %43 = vector.load %arg8[%c0_19, %c0_20] : memref<8x32xbf16, #tpu.memory_space<vmem>>, vector<8x32xbf16>
    %44 = arith.truncf %42 : vector<32x384xf32> to vector<32x384xbf16>
    %cst_21 = arith.constant dense<0.000000e+00> : vector<8x384xf32>
    %45 = tpu.matmul %43, %44, %cst_21 {dimension_numbers = #tpu.dot_dimension_numbers<[1], [0], [0], [1], [0, 0, 1, 1], [], []>} : vector<8x32xbf16>, vector<32x384xbf16>, vector<8x384xf32> -> vector<8x384xf32>
    %c0_22 = arith.constant 0 : index
    %c0_23 = arith.constant 0 : index
    %46 = vector.load %arg9[%c0_22, %c0_23] : memref<8x1xf32, #tpu.memory_space<vmem>>, vector<8x1xf32>
    %47 = vector.broadcast %46 : vector<8x1xf32> to vector<8x384xf32>
    %48 = arith.addf %45, %47 : vector<8x384xf32>
    %c0_24 = arith.constant 0 : index
    %c0_25 = arith.constant 0 : index
    %49 = vector.load %arg10[%c0_24, %c0_25] : memref<8x1xf32, #tpu.memory_space<vmem>>, vector<8x1xf32>
    %cst_26 = arith.constant 0.000000e+00 : f32
    %50 = vector.broadcast %cst_26 : f32 to vector<8x384xf32>
    %51 = arith.subf %50, %48 : vector<8x384xf32>
    %52 = math.exp %51 : vector<8x384xf32>
    %cst_27 = arith.constant 1.000000e+00 : f32
    %53 = vector.broadcast %cst_27 : f32 to vector<8x384xf32>
    %54 = arith.addf %53, %52 : vector<8x384xf32>
    %cst_28 = arith.constant 1.000000e+00 : f32
    %55 = vector.broadcast %cst_28 : f32 to vector<8x384xf32>
    %56 = arith.divf %55, %54 : vector<8x384xf32>
    %cst_29 = arith.constant 1.000000e+00 : f32
    %57 = vector.broadcast %cst_29 : f32 to vector<8x1xf32>
    %58 = arith.cmpf oeq, %49, %57 : vector<8x1xf32>
    %cst_30 = arith.constant 1.000000e+00 : f32
    %59 = vector.shape_cast %58 : vector<8x1xi1> to vector<8x1xi1>
    %60 = vector.broadcast %59 : vector<8x1xi1> to vector<8x384xi1>
    %61 = vector.broadcast %cst_30 : f32 to vector<8x384xf32>
    %62 = arith.select %60, %61, %56 : vector<8x384xi1>, vector<8x384xf32>
    %cst_31 = arith.constant -1.000000e+00 : f32
    %63 = vector.broadcast %cst_31 : f32 to vector<8x1xf32>
    %64 = arith.cmpf oeq, %49, %63 : vector<8x1xf32>
    %cst_32 = arith.constant 0.000000e+00 : f32
    %65 = vector.shape_cast %64 : vector<8x1xi1> to vector<8x1xi1>
    %66 = vector.broadcast %65 : vector<8x1xi1> to vector<8x384xi1>
    %67 = vector.broadcast %cst_32 : f32 to vector<8x384xf32>
    %68 = arith.select %66, %67, %62 : vector<8x384xi1>, vector<8x384xf32>
    %69 = arith.truncf %68 : vector<8x384xf32> to vector<8x384xbf16>
    %c0_33 = arith.constant 0 : index
    %c0_34 = arith.constant 0 : index
    %70 = vector.load %arg11[%c0_33, %c0_34] : memref<8x384xbf16, #tpu.memory_space<vmem>>, vector<8x384xbf16>
    tpu.vector_store %arg11[%c0_33, %c0_34], %69 {strides = array<i32>} : memref<8x384xbf16, #tpu.memory_space<vmem>>, vector<8x384xbf16>,
    return
  }
  func.func @transform_0(%arg0: i32) -> (i32, i32) {
    %c0_i32 = arith.constant 0 : i32
    %c0_i32_0 = arith.constant 0 : i32
    return %c0_i32, %arg0 : i32, i32
  }
  func.func @transform_1(%arg0: i32) -> (i32, i32) {
    %c0_i32 = arith.constant 0 : i32
    %c0_i32_0 = arith.constant 0 : i32
    %c0_i32_1 = arith.constant 0 : i32
    return %c0_i32, %c0_i32_0 : i32, i32
  }
  func.func @transform_2(%arg0: i32) -> (i32, i32) {
    %c0_i32 = arith.constant 0 : i32
    %c0_i32_0 = arith.constant 0 : i32
    %c0_i32_1 = arith.constant 0 : i32
    return %c0_i32, %c0_i32_0 : i32, i32
  }
  func.func @transform_3(%arg0: i32) -> (i32, i32) {
    %c0_i32 = arith.constant 0 : i32
    %c0_i32_0 = arith.constant 0 : i32
    %c0_i32_1 = arith.constant 0 : i32
    return %c0_i32, %c0_i32_0 : i32, i32
  }
  func.func @transform_4(%arg0: i32) -> (i32, i32) {
    %c0_i32 = arith.constant 0 : i32
    %c0_i32_0 = arith.constant 0 : i32
    %c0_i32_1 = arith.constant 0 : i32
    return %c0_i32, %c0_i32_0 : i32, i32
  }
  func.func @transform_5(%arg0: i32) -> (i32, i32) {
    %c0_i32 = arith.constant 0 : i32
    %c0_i32_0 = arith.constant 0 : i32
    %c0_i32_1 = arith.constant 0 : i32
    return %c0_i32, %c0_i32_0 : i32, i32
  }
  func.func @transform_6(%arg0: i32) -> (i32, i32) {
    %c0_i32 = arith.constant 0 : i32
    %c0_i32_0 = arith.constant 0 : i32
    %c0_i32_1 = arith.constant 0 : i32
    return %c0_i32, %c0_i32_0 : i32, i32
  }
  func.func @transform_7(%arg0: i32) -> (i32, i32) {
    %c0_i32 = arith.constant 0 : i32
    %c0_i32_0 = arith.constant 0 : i32
    %c0_i32_1 = arith.constant 0 : i32
    return %c0_i32, %c0_i32_0 : i32, i32
  }
  func.func @transform_8(%arg0: i32) -> (i32, i32) {
    %c0_i32 = arith.constant 0 : i32
    %c0_i32_0 = arith.constant 0 : i32
    %c0_i32_1 = arith.constant 0 : i32
    return %c0_i32, %c0_i32_0 : i32, i32
  }
  func.func @transform_9(%arg0: i32) -> (i32, i32) {
    %c0_i32 = arith.constant 0 : i32
    %c0_i32_0 = arith.constant 0 : i32
    %c0_i32_1 = arith.constant 0 : i32
    return %c0_i32, %c0_i32_0 : i32, i32
  }
  func.func @transform_10(%arg0: i32) -> (i32, i32) {
    %c0_i32 = arith.constant 0 : i32
    %c0_i32_0 = arith.constant 0 : i32
    return %c0_i32, %arg0 : i32, i32
  }
}

</mosaic_0001>

<bundles_post_ra>
// kernel: tpu_custom_call.1
= control target key start
LH: loop header
LB: loop body
LE: loop exit
PB: predicated region body
PF: predicated region fallthrough
CT: control target
= control target key end

     0   :  { %s2956_s0 = inlined_call_operand.vmem [shape: bf16[16,600], index: 0, kind: input, shape index: {}]   ;;  %s2957_s1 = inlined_call_operand.vmem [shape: bf16[32,16], index: 1, kind: input, shape index: {}]   ;;  %s2958_s2 = inlined_call_operand.vmem [shape: f32[32,1], index: 2, kind: input, shape index: {}]   ;;  %s2959_s3 = inlined_call_operand.vmem [shape: f32[32,1], index: 3, kind: input, shape index: {}]   ;;  %s2960_s4 = inlined_call_operand.vmem [shape: bf16[32,32], index: 4, kind: input, shape index: {}]   ;;  %s2961_s5 = inlined_call_operand.vmem [shape: f32[32,1], index: 5, kind: input, shape index: {}]   ;;  %s2962_s6 = inlined_call_operand.vmem [shape: f32[32,1], index: 6, kind: input, shape index: {}]   ;;  %s2963_s7 = inlined_call_operand.vmem [shape: bf16[8,32], index: 7, kind: input, shape index: {}]   ;;  %s2964_s8 = inlined_call_operand.vmem [shape: f32[8,1], index: 8, kind: input, shape index: {}]   ;;  %s2965_s9 = inlined_call_operand.vmem [shape: f32[8,1], index: 9, kind: input, shape index: {}]   ;;  %s2966_s10 = inlined_call_operand.hbm [shape: bf16[8,600], index: 10, kind: output, shape index: {}]  }
   0x1   :  { %2976 = sst [smem:[#allocation12_spill]] %s2956_s0 }
   0x2   :  { %2977 = sst [smem:[#allocation13_spill]] %s2966_s10 }
   0x3   :  { %15 = vsyncpa [#allocation4], 0 }
   0x4   :  { %17 = vsyncpa [#allocation4 + $0x1], 0  ;;  %s2201_s13 = smov 0   ;;  %s2203_s14 = smov 0  }
   0x5   :  { %s2205_s15 = smov 0   ;;  %s2207_s16 = smov 0  }
   0x6 LB: > { %2978 = sst [smem:[#allocation6_spill]] %s2062_s13  ;;  %s2222_s17 = sadd.s32 4294967295, %s2074_s16   ;;  %s2074_s16 = sphi %s2207_s16, %s3004_s16   ;;  %s2070_s15 = sphi %s2205_s15, %s3006_s15   ;;  %s2066_s14 = sphi %s2203_s14, %s3008_s14   ;;  %s2062_s13 = sphi %s2201_s13, %s3007_s13  }
   0x7   : > { %2979 = sst [smem:[#allocation7_spill]] %s2070_s15  ;;  %s1599_s18 = sadd.s32 4294967294, %s2074_s16  }
   0x8   : > { %2980 = sst [smem:[#allocation8_spill]] %s2222_s17  ;;  %s2226_s19 = sadd.s32 1, %s2074_s16  }
   0x9   : > { %2981 = sst [smem:[#allocation9_spill]] %s2226_s19  ;;  %s30_s20 = sadd.s32 1, %s2070_s15 }
   0xa   : > { %s27_s21 = ssub.s32 %s2074_s16, %s2226_s19  ;;  %p37_p0 = scmp.ne.s32.totalorder %s2070_s15, %s2066_s14 }
   0xb   : > { %p28_p1 = scmp.eq.s32.totalorder %s27_s21, 0  ;;  %p38_p2 = scmp.eq.s32.totalorder %s2074_s16, 0 }
   0xc   : > { %p256_p3 = scmp.eq.s32.totalorder %s2222_s17, 1  ;;  %p261_p4 = scmp.ne.s32.totalorder %s2066_s14, %s2062_s13 }
   0xd   : > { %s2238_s22 = scalar_select %p28_p1, %s2070_s15, %s30_s20  }
   0xe   : > { %p39_p5 = por %p38_p2, %p37_p0  ;;  %p2240_p6 = por %p256_p3, %p37_p0 }
   0xf   : > { %2982 = sst [smem:[#allocation10_spill]] %s2238_s22  ;;  %p262_p7 = scmp.eq.s32.totalorder %s1599_s18, 1 }
  0x10   : > { %p1601_p9 = scmp.ge.s32.totalorder %s2074_s16, 2 }
  0x11   : > { %p2244_p8 = por %p262_p7, %p261_p4 }
  0x12   : > { %305 = sbr.rel (%p1601_p9) target bundleno = 199 (0xc7), region = 52 }
  0x13   : > { %s2984_s24 = scalar_select %p2244_p8, 1, 0 }
  0x15   : > { %2985 = sst [smem:[#allocation11_spill]] %s2984_s24 }
  0x19   : > { %308 = sbr.rel (!%p39_p5) target bundleno = 199 (0xc7), region = 56  ;;  %s310_s25 = sand.u32 (%p39_p5), 1, %s2070_s15  }
  0x1a   : > { %s313_s26 = smul.u32 (%p39_p5), 3, %s2074_s16  ;;  %s2986_s0 = sld [smem:[#allocation12_spill]] (%p39_p5) }
  0x1b   : > { %s1728_s27 = smul.u32 (%p39_p5), 24, %s310_s25 }
  0x1c   : > { %s314_s28 = ssub.s32 (%p39_p5), 5, %s313_s26  ;;  %s1684_s29 = smul.u32 (%p39_p5), 12, %s2074_s16 }
  0x1d   : > { %p315_p10 = scmp.lt.s32.totalorder (%p39_p5), %s314_s28, 3  ;;  %s2261_s21 = scalar_lea.vmem (%p39_p5), [#allocation2], %s1728_s27  }
  0x20   : > { %s2257_s12 = scalar_lea.vmem %s2986_s0, %s1684_s29   ;;  %s3010_s28 = smov (!%p315_p10, %s314_s28), 3 }
  0x21   : > { %s1602_s18 = sshll.u32 %s3010_s28, 7  ;;  %s2259_s20 = sshll.u32 %s3010_s28, 2 }
  0x22   : > { %p1606_p11 = scmp.eq.s32.totalorder %s1602_s18, 0 }
  0x23   : > { %p325_p12 = scmp.lt.u32.totalorder (!%p1606_p11), %s2259_s20, 8 }
  0x24   : > { %324 = sbr.rel (%p1606_p11) target bundleno = 199 (0xc7), region = 60 }
  0x2b   : > { %328 = sbr.rel (%p325_p12) target bundleno = 190 (0xbe), region = 64  ;;  %s2265_s25 = sand.u32 (!%p325_p12), 7, %s2259_s20  }
  0x2c   : > { %p346_p13 = scmp.eq.s32.totalorder (!%p325_p12), %s2265_s25, 0  ;;  %p1607_p0 = scmp.ne.s32.totalorder (!%p325_p12), %s2265_s25, 0 }
  0x32   : > { %349 = sbr.rel (%p1607_p0) target bundleno = 119 (0x77), region = 79  ;;  %s2967_s26 = sshrl.u32 (!%p1607_p0), %s2259_s20, 3 }
  0x33   : > { %s2272_s28 = sshrl.u32 (!%p1607_p0), %s2967_s26, 5 }
  0x34   : > { %p1608_p1 = scmp.le.s32.totalorder (!%p1607_p0), %s2272_s28, 0 }
  0x39   : > { %1527 = sbr.rel (%p1608_p1) target bundleno = 97 (0x61), region = 178  ;;  %s2987_s27 = smov (!%p1608_p1), %s2261_s21 }
  0x3a   : > { %s2988_s29 = smov (!%p1608_p1), %s2257_s12  ;;  %s2281_s30 = smov (!%p1608_p1), 0  }
  0x3b   : > { %s2283_s11 = smov (!%p1608_p1), 0  }
  0x40 LB: >> { %v365_v0 = vld [vmem:[%s2082_s29 + $0x8] sm:$0xff]  ;;  %v367_v1 = vld [vmem:[%s2082_s29 + $0x10] sm:$0xff]  ;;  %v369_v2 = vld [vmem:[%s2082_s29 + $0x18] sm:$0xff]  ;;  %s491_s18 = sadd.s32 1, %s2086_s30  ;;  %s357_s11 = sadd.s32 1, %s2090_s11   ;;  %s2090_s11 = sphi %s2283_s11, %s357_s11   ;;  %s2086_s30 = sphi %s2281_s30, %s2991_s30   ;;  %s2082_s29 = sphi %s2988_s29, %s2990_s29   ;;  %s2078_s27 = sphi %s2987_s27, %s2989_s27  }
  0x41   : >> { %366 = vst [vmem:[%s2078_s27 + $0x8] sm:$0xff] %v365_v0  ;;  %368 = vst [vmem:[%s2078_s27 + $0x10] sm:$0xff] %v367_v1  ;;  %v371_v3 = vld [vmem:[%s2082_s29 + $0x20] sm:$0xff]  ;;  %v373_v4 = vld [vmem:[%s2082_s29 + $0x28] sm:$0xff]  ;;  %p492_p2 = scmp.ge.s32.totalorder %s491_s18, %s2272_s28  ;;  %p356_p3 = scmp.ge.s32.totalorder %s357_s11, %s2272_s28 }
  0x42   : >> { %370 = vst [vmem:[%s2078_s27 + $0x18] sm:$0xff] %v369_v2  ;;  %v375_v5 = vld [vmem:[%s2082_s29 + $0x30] sm:$0xff]  ;;  %372 = vst [vmem:[%s2078_s27 + $0x20] sm:$0xff] %v371_v3  ;;  %v377_v6 = vld [vmem:[%s2082_s29 + $0x38] sm:$0xff] }
  0x43   : >> { %374 = vst [vmem:[%s2078_s27 + $0x28] sm:$0xff] %v373_v4  ;;  %376 = vst [vmem:[%s2078_s27 + $0x30] sm:$0xff] %v375_v5  ;;  %v379_v7 = vld [vmem:[%s2082_s29 + $0x40] sm:$0xff]  ;;  %v381_v8 = vld [vmem:[%s2082_s29 + $0x48] sm:$0xff]  ;;  %s3012_s18 = smov (%p492_p2, %s491_s18), 0 }
  0x44   : >> { %378 = vst [vmem:[%s2078_s27 + $0x38] sm:$0xff] %v377_v6  ;;  %380 = vst [vmem:[%s2078_s27 + $0x40] sm:$0xff] %v379_v7  ;;  %v383_v9 = vld [vmem:[%s2082_s29 + $0x50] sm:$0xff]  ;;  %v385_v10 = vld [vmem:[%s2082_s29 + $0x58] sm:$0xff]  ;;  %s1609_s30 = sshll.u32 %s3012_s18, 8 }
  0x45   : >> { %382 = vst [vmem:[%s2078_s27 + $0x48] sm:$0xff] %v381_v8  ;;  %v387_v11 = vld [vmem:[%s2082_s29 + $0x60] sm:$0xff]  ;;  %384 = vst [vmem:[%s2078_s27 + $0x50] sm:$0xff] %v383_v9  ;;  %v389_v12 = vld [vmem:[%s2082_s29 + $0x68] sm:$0xff]  ;;  %s2354_s26 = scalar_lea.vmem %s2257_s12, %s1609_s30   ;;  %s2357_s0 = scalar_lea.vmem %s2261_s21, %s1609_s30 [#allocation2]  }
  0x46   : >> { %386 = vst [vmem:[%s2078_s27 + $0x58] sm:$0xff] %v385_v10  ;;  %388 = vst [vmem:[%s2078_s27 + $0x60] sm:$0xff] %v387_v11  ;;  %v391_v13 = vld [vmem:[%s2082_s29 + $0x70] sm:$0xff]  ;;  %v393_v14 = vld [vmem:[%s2082_s29 + $0x78] sm:$0xff]  ;;  %s2991_s30 = smov %s3012_s18 }
  0x47   : >> { %390 = vst [vmem:[%s2078_s27 + $0x68] sm:$0xff] %v389_v12  ;;  %392 = vst [vmem:[%s2078_s27 + $0x70] sm:$0xff] %v391_v13  ;;  %v395_v15 = vld [vmem:[%s2082_s29 + $0x80] sm:$0xff]  ;;  %v397_v16 = vld [vmem:[%s2082_s29 + $0x88] sm:$0xff] }
  0x48   : >> { %394 = vst [vmem:[%s2078_s27 + $0x78] sm:$0xff] %v393_v14  ;;  %v399_v17 = vld [vmem:[%s2082_s29 + $0x90] sm:$0xff]  ;;  %396 = vst [vmem:[%s2078_s27 + $0x80] sm:$0xff] %v395_v15  ;;  %v401_v18 = vld [vmem:[%s2082_s29 + $0x98] sm:$0xff] }
  0x49   : >> { %398 = vst [vmem:[%s2078_s27 + $0x88] sm:$0xff] %v397_v16  ;;  %400 = vst [vmem:[%s2078_s27 + $0x90] sm:$0xff] %v399_v17  ;;  %v403_v19 = vld [vmem:[%s2082_s29 + $0xa0] sm:$0xff]  ;;  %v405_v20 = vld [vmem:[%s2082_s29 + $0xa8] sm:$0xff] }
  0x4a   : >> { %402 = vst [vmem:[%s2078_s27 + $0x98] sm:$0xff] %v401_v18  ;;  %404 = vst [vmem:[%s2078_s27 + $0xa0] sm:$0xff] %v403_v19  ;;  %v407_v21 = vld [vmem:[%s2082_s29 + $0xb0] sm:$0xff]  ;;  %v409_v22 = vld [vmem:[%s2082_s29 + $0xb8] sm:$0xff] }
  0x4b   : >> { %406 = vst [vmem:[%s2078_s27 + $0xa8] sm:$0xff] %v405_v20  ;;  %v411_v23 = vld [vmem:[%s2082_s29 + $0xc0] sm:$0xff]  ;;  %408 = vst [vmem:[%s2078_s27 + $0xb0] sm:$0xff] %v407_v21  ;;  %v413_v24 = vld [vmem:[%s2082_s29 + $0xc8] sm:$0xff] }
  0x4c   : >> { %410 = vst [vmem:[%s2078_s27 + $0xb8] sm:$0xff] %v409_v22  ;;  %412 = vst [vmem:[%s2078_s27 + $0xc0] sm:$0xff] %v411_v23  ;;  %v415_v25 = vld [vmem:[%s2082_s29 + $0xd0] sm:$0xff]  ;;  %v417_v26 = vld [vmem:[%s2082_s29 + $0xd8] sm:$0xff] }
  0x4d   : >> { %414 = vst [vmem:[%s2078_s27 + $0xc8] sm:$0xff] %v413_v24  ;;  %416 = vst [vmem:[%s2078_s27 + $0xd0] sm:$0xff] %v415_v25  ;;  %v419_v27 = vld [vmem:[%s2082_s29 + $0xe0] sm:$0xff]  ;;  %v421_v28 = vld [vmem:[%s2082_s29 + $0xe8] sm:$0xff] }
  0x4e   : >> { %418 = vst [vmem:[%s2078_s27 + $0xd8] sm:$0xff] %v417_v26  ;;  %v423_v29 = vld [vmem:[%s2082_s29 + $0xf0] sm:$0xff]  ;;  %420 = vst [vmem:[%s2078_s27 + $0xe0] sm:$0xff] %v419_v27  ;;  %v425_v30 = vld [vmem:[%s2082_s29 + $0xf8] sm:$0xff] }
  0x4f   : >> { %422 = vst [vmem:[%s2078_s27 + $0xe8] sm:$0xff] %v421_v28  ;;  %424 = vst [vmem:[%s2078_s27 + $0xf0] sm:$0xff] %v423_v29  ;;  %v363_v31 = vld [vmem:[%s2082_s29] sm:$0xff]  ;;  %v427_v32 = vld [vmem:[%s2082_s29 + $0x14] sm:$0xff] }
  0x50   : >> { %426 = vst [vmem:[%s2078_s27 + $0xf8] sm:$0xff] %v425_v30  ;;  %364 = vst [vmem:[%s2078_s27] sm:$0xff] %v363_v31  ;;  %v429_v33 = vld [vmem:[%s2082_s29 + $0x1c] sm:$0xff]  ;;  %v431_v34 = vld [vmem:[%s2082_s29 + $0x24] sm:$0xff] }
  0x51   : >> { %428 = vst [vmem:[%s2078_s27 + $0xc] sm:$0xff] %v427_v32  ;;  %v433_v35 = vld [vmem:[%s2082_s29 + $0x2c] sm:$0xff]  ;;  %430 = vst [vmem:[%s2078_s27 + $0x14] sm:$0xff] %v429_v33  ;;  %v435_v36 = vld [vmem:[%s2082_s29 + $0x34] sm:$0xff] }
  0x52   : >> { %432 = vst [vmem:[%s2078_s27 + $0x1c] sm:$0xff] %v431_v34  ;;  %434 = vst [vmem:[%s2078_s27 + $0x24] sm:$0xff] %v433_v35  ;;  %v437_v37 = vld [vmem:[%s2082_s29 + $0x3c] sm:$0xff]  ;;  %v439_v38 = vld [vmem:[%s2082_s29 + $0x44] sm:$0xff] }
  0x53   : >> { %436 = vst [vmem:[%s2078_s27 + $0x2c] sm:$0xff] %v435_v36  ;;  %438 = vst [vmem:[%s2078_s27 + $0x34] sm:$0xff] %v437_v37  ;;  %v441_v39 = vld [vmem:[%s2082_s29 + $0x4c] sm:$0xff]  ;;  %v443_v40 = vld [vmem:[%s2082_s29 + $0x54] sm:$0xff] }
  0x54   : >> { %440 = vst [vmem:[%s2078_s27 + $0x3c] sm:$0xff] %v439_v38  ;;  %v445_v41 = vld [vmem:[%s2082_s29 + $0x5c] sm:$0xff]  ;;  %442 = vst [vmem:[%s2078_s27 + $0x44] sm:$0xff] %v441_v39  ;;  %v447_v42 = vld [vmem:[%s2082_s29 + $0x64] sm:$0xff] }
  0x55   : >> { %444 = vst [vmem:[%s2078_s27 + $0x4c] sm:$0xff] %v443_v40  ;;  %446 = vst [vmem:[%s2078_s27 + $0x54] sm:$0xff] %v445_v41  ;;  %v449_v43 = vld [vmem:[%s2082_s29 + $0x6c] sm:$0xff]  ;;  %v451_v44 = vld [vmem:[%s2082_s29 + $0x74] sm:$0xff] }
  0x56   : >> { %448 = vst [vmem:[%s2078_s27 + $0x5c] sm:$0xff] %v447_v42  ;;  %450 = vst [vmem:[%s2078_s27 + $0x64] sm:$0xff] %v449_v43  ;;  %v453_v45 = vld [vmem:[%s2082_s29 + $0x7c] sm:$0xff]  ;;  %v455_v46 = vld [vmem:[%s2082_s29 + $0x84] sm:$0xff] }
  0x57   : >> { %452 = vst [vmem:[%s2078_s27 + $0x6c] sm:$0xff] %v451_v44  ;;  %v457_v47 = vld [vmem:[%s2082_s29 + $0x8c] sm:$0xff]  ;;  %454 = vst [vmem:[%s2078_s27 + $0x74] sm:$0xff] %v453_v45  ;;  %v459_v48 = vld [vmem:[%s2082_s29 + $0x94] sm:$0xff] }
  0x58   : >> { %456 = vst [vmem:[%s2078_s27 + $0x7c] sm:$0xff] %v455_v46  ;;  %458 = vst [vmem:[%s2078_s27 + $0x84] sm:$0xff] %v457_v47  ;;  %v461_v49 = vld [vmem:[%s2082_s29 + $0x9c] sm:$0xff]  ;;  %v463_v50 = vld [vmem:[%s2082_s29 + $0xa4] sm:$0xff] }
  0x59   : >> { %460 = vst [vmem:[%s2078_s27 + $0x8c] sm:$0xff] %v459_v48  ;;  %462 = vst [vmem:[%s2078_s27 + $0x94] sm:$0xff] %v461_v49  ;;  %v465_v51 = vld [vmem:[%s2082_s29 + $0xac] sm:$0xff]  ;;  %v467_v52 = vld [vmem:[%s2082_s29 + $0xb4] sm:$0xff] }
  0x5a   : >> { %464 = vst [vmem:[%s2078_s27 + $0x9c] sm:$0xff] %v463_v50  ;;  %v469_v53 = vld [vmem:[%s2082_s29 + $0xbc] sm:$0xff]  ;;  %466 = vst [vmem:[%s2078_s27 + $0xa4] sm:$0xff] %v465_v51  ;;  %v471_v54 = vld [vmem:[%s2082_s29 + $0xc4] sm:$0xff]  ;;  %359 = sbr.rel (!%p356_p3) target bundleno = 64 (0x40), region = 184 }
  0x5b   : >> { %468 = vst [vmem:[%s2078_s27 + $0xac] sm:$0xff] %v467_v52  ;;  %470 = vst [vmem:[%s2078_s27 + $0xb4] sm:$0xff] %v469_v53  ;;  %v473_v55 = vld [vmem:[%s2082_s29 + $0xcc] sm:$0xff]  ;;  %v475_v56 = vld [vmem:[%s2082_s29 + $0xd4] sm:$0xff] }
  0x5c   : >> { %472 = vst [vmem:[%s2078_s27 + $0xbc] sm:$0xff] %v471_v54  ;;  %474 = vst [vmem:[%s2078_s27 + $0xc4] sm:$0xff] %v473_v55  ;;  %v477_v57 = vld [vmem:[%s2082_s29 + $0xdc] sm:$0xff]  ;;  %v479_v58 = vld [vmem:[%s2082_s29 + $0xe4] sm:$0xff] }
  0x5d   : >> { %476 = vst [vmem:[%s2078_s27 + $0xcc] sm:$0xff] %v475_v56  ;;  %v481_v59 = vld [vmem:[%s2082_s29 + $0xec] sm:$0xff]  ;;  %478 = vst [vmem:[%s2078_s27 + $0xd4] sm:$0xff] %v477_v57  ;;  %v483_v60 = vld [vmem:[%s2082_s29 + $0xf4] sm:$0xff] }
  0x5e   : >> { %480 = vst [vmem:[%s2078_s27 + $0xdc] sm:$0xff] %v479_v58  ;;  %482 = vst [vmem:[%s2078_s27 + $0xe4] sm:$0xff] %v481_v59  ;;  %v485_v61 = vld [vmem:[%s2082_s29 + $0xfc] sm:$0xff]  ;;  %v487_v62 = vld [vmem:[%s2082_s29 + $0x104] sm:$0xff] }
  0x5f   : >> { %484 = vst [vmem:[%s2078_s27 + $0xec] sm:$0xff] %v483_v60  ;;  %486 = vst [vmem:[%s2078_s27 + $0xf4] sm:$0xff] %v485_v61  ;;  %v489_v63 = vld [vmem:[%s2082_s29 + $0x10c] sm:$0xff]  ;;  %s2990_s29 = smov %s2354_s26 }
  0x60   : >> { %488 = vst [vmem:[%s2078_s27 + $0xfc] sm:$0xff] %v487_v62  ;;  %490 = vst [vmem:[%s2078_s27 + $0x104] sm:$0xff] %v489_v63  ;;  %s2989_s27 = smov %s2357_s0 }
  0x61 PF: > { %s2992_s22 = sshrl.u32 %s2259_s20, 3  ;;  %s1685_s19 = sshll.u32 %s2272_s28, 12 }
  0x62   : > { %s2451_s15 = sand.u32 31, %s2992_s22   ;;  %s502_s24 = sshra.s32 %s1685_s19, 4 }
  0x63   : > { %s2455_s13 = scalar_lea.vmem %s2257_s12, %s502_s24   ;;  %s506_s0 = scalar_lea.vmem %s2261_s21, %s502_s24 [#allocation2]  }
  0x64   : > { %p1614_p4 = scmp.le.s32.totalorder %s2451_s15, 0 }
  0x65   : > { %s2092_s26 = smov (!%p1614_p4), %s506_s0   ;;  %s2096_s11 = smov (!%p1614_p4), %s2455_s13  }
  0x66   : > { %1541 = sbr.rel (%p1614_p4) target bundleno = 119 (0x77), region = 189  ;;  %s2100_s18 = smov (!%p1614_p4), 0  }
  0x67   : > { %s2104_s27 = smov (!%p1614_p4), 0  }
  0x6d LB: >> { %v518_v0 = vld [vmem:[%s2098_s11] sm:$0xff]  ;;  %v520_v1 = vld [vmem:[%s2098_s11 + $0x14] sm:$0xff]  ;;  %s522_s19 = sadd.s32 1, %s2102_s18  ;;  %s512_s27 = sadd.s32 1, %s2106_s27   ;;  %s2106_s27 = sphi %s2104_s27, %s512_s27   ;;  %s2102_s18 = sphi %s2100_s18, %s2101_s18   ;;  %s2098_s11 = sphi %s2096_s11, %s527_s11   ;;  %s2094_s26 = sphi %s2092_s26, %s528_s26  }
  0x6e   : >> { %519 = vst [vmem:[%s2094_s26] sm:$0xff] %v518_v0  ;;  %521 = vst [vmem:[%s2094_s26 + $0xc] sm:$0xff] %v520_v1  ;;  %p523_p5 = scmp.ge.s32.totalorder %s522_s19, %s2451_s15  ;;  %p511_p7 = scmp.ge.s32.totalorder %s512_s27, %s2451_s15 }
  0x70   : >> { %s3014_s19 = smov (%p523_p5, %s522_s19), 0  ;;  %514 = sbr.rel (!%p511_p7) target bundleno = 109 (0x6d), region = 195 }
  0x71   : >> { %s1615_s22 = sshll.u32 %s3014_s19, 3  ;;  %s2101_s18 = smov %s3014_s19  }
  0x72   : >> { %s527_s11 = scalar_lea.vmem %s2455_s13, %s1615_s22   ;;  %s528_s26 = scalar_lea.vmem %s506_s0, %s1615_s22 [#allocation2]  }
  0x77 PF: > { %531 = sbr.rel (%p346_p13) target bundleno = 190 (0xbe), region = 97  ;;  %s533_s24 = ssub.s32 (!%p346_p13), %s2259_s20, %s2265_s25 }
  0x78   : > { %s537_s28 = sshrl.u32 (!%p346_p13), %s2259_s20, 3  ;;  %s2469_s29 = scalar_lea.vmem (!%p346_p13), %s2257_s12, %s533_s24 }
  0x79   : > { %s2472_s30 = scalar_lea.vmem (!%p346_p13), %s2261_s21, %s533_s24 [#allocation2]  ;;  %s2476_s26 = sshrl.u32 (!%p346_p13), %s537_s28, 5 }
  0x7a   : > { %p1617_p10 = scmp.le.s32.totalorder (!%p346_p13), %s2476_s26, 0 }
  0x7e   : > { %1555 = sbr.rel (%p1617_p10) target bundleno = 166 (0xa6), region = 200  ;;  %s2993_s13 = smov (!%p1617_p10), %s2261_s21 }
  0x7f   : > { %s2994_s15 = smov (!%p1617_p10), %s2257_s12  ;;  %s2485_s0 = smov (!%p1617_p10), 0  }
  0x80   : > { %s2487_s11 = smov (!%p1617_p10), 0  }
  0x85 LB: >> { %v552_v2 = vld [vmem:[%s2114_s15 + $0x8] sm:$0xff]  ;;  %v554_v3 = vld [vmem:[%s2114_s15 + $0x10] sm:$0xff]  ;;  %v556_v4 = vld [vmem:[%s2114_s15 + $0x18] sm:$0xff]  ;;  %s678_s18 = sadd.s32 1, %s2118_s0  ;;  %s544_s11 = sadd.s32 1, %s2122_s11   ;;  %s2122_s11 = sphi %s2487_s11, %s544_s11   ;;  %s2118_s0 = sphi %s2485_s0, %s2997_s0   ;;  %s2114_s15 = sphi %s2994_s15, %s2996_s15   ;;  %s2110_s13 = sphi %s2993_s13, %s2995_s13  }
  0x86   : >> { %553 = vst [vmem:[%s2110_s13 + $0x8] sm:$0xff] %v552_v2  ;;  %555 = vst [vmem:[%s2110_s13 + $0x10] sm:$0xff] %v554_v3  ;;  %v558_v5 = vld [vmem:[%s2114_s15 + $0x20] sm:$0xff]  ;;  %v560_v6 = vld [vmem:[%s2114_s15 + $0x28] sm:$0xff]  ;;  %p679_p11 = scmp.ge.s32.totalorder %s678_s18, %s2476_s26  ;;  %p543_p12 = scmp.ge.s32.totalorder %s544_s11, %s2476_s26 }
  0x87   : >> { %557 = vst [vmem:[%s2110_s13 + $0x18] sm:$0xff] %v556_v4  ;;  %v562_v7 = vld [vmem:[%s2114_s15 + $0x30] sm:$0xff]  ;;  %559 = vst [vmem:[%s2110_s13 + $0x20] sm:$0xff] %v558_v5  ;;  %v564_v8 = vld [vmem:[%s2114_s15 + $0x38] sm:$0xff] }
  0x88   : >> { %561 = vst [vmem:[%s2110_s13 + $0x28] sm:$0xff] %v560_v6  ;;  %563 = vst [vmem:[%s2110_s13 + $0x30] sm:$0xff] %v562_v7  ;;  %v566_v9 = vld [vmem:[%s2114_s15 + $0x40] sm:$0xff]  ;;  %v568_v10 = vld [vmem:[%s2114_s15 + $0x48] sm:$0xff]  ;;  %s3016_s18 = smov (%p679_p11, %s678_s18), 0 }
  0x89   : >> { %565 = vst [vmem:[%s2110_s13 + $0x38] sm:$0xff] %v564_v8  ;;  %567 = vst [vmem:[%s2110_s13 + $0x40] sm:$0xff] %v566_v9  ;;  %v570_v11 = vld [vmem:[%s2114_s15 + $0x50] sm:$0xff]  ;;  %v572_v12 = vld [vmem:[%s2114_s15 + $0x58] sm:$0xff]  ;;  %s1618_s27 = sshll.u32 %s3016_s18, 8  ;;  %s2997_s0 = smov %s3016_s18 }
  0x8a   : >> { %569 = vst [vmem:[%s2110_s13 + $0x48] sm:$0xff] %v568_v10  ;;  %v574_v13 = vld [vmem:[%s2114_s15 + $0x60] sm:$0xff]  ;;  %571 = vst [vmem:[%s2110_s13 + $0x50] sm:$0xff] %v570_v11  ;;  %v576_v14 = vld [vmem:[%s2114_s15 + $0x68] sm:$0xff]  ;;  %s2558_s19 = scalar_lea.vmem %s2257_s12, %s1618_s27   ;;  %s2561_s22 = scalar_lea.vmem %s2261_s21, %s1618_s27 [#allocation2]  }
  0x8b   : >> { %573 = vst [vmem:[%s2110_s13 + $0x58] sm:$0xff] %v572_v12  ;;  %575 = vst [vmem:[%s2110_s13 + $0x60] sm:$0xff] %v574_v13  ;;  %v578_v15 = vld [vmem:[%s2114_s15 + $0x70] sm:$0xff]  ;;  %v580_v16 = vld [vmem:[%s2114_s15 + $0x78] sm:$0xff] }
  0x8c   : >> { %577 = vst [vmem:[%s2110_s13 + $0x68] sm:$0xff] %v576_v14  ;;  %579 = vst [vmem:[%s2110_s13 + $0x70] sm:$0xff] %v578_v15  ;;  %v582_v17 = vld [vmem:[%s2114_s15 + $0x80] sm:$0xff]  ;;  %v584_v18 = vld [vmem:[%s2114_s15 + $0x88] sm:$0xff] }
  0x8d   : >> { %581 = vst [vmem:[%s2110_s13 + $0x78] sm:$0xff] %v580_v16  ;;  %v586_v19 = vld [vmem:[%s2114_s15 + $0x90] sm:$0xff]  ;;  %583 = vst [vmem:[%s2110_s13 + $0x80] sm:$0xff] %v582_v17  ;;  %v588_v20 = vld [vmem:[%s2114_s15 + $0x98] sm:$0xff] }
  0x8e   : >> { %585 = vst [vmem:[%s2110_s13 + $0x88] sm:$0xff] %v584_v18  ;;  %587 = vst [vmem:[%s2110_s13 + $0x90] sm:$0xff] %v586_v19  ;;  %v590_v21 = vld [vmem:[%s2114_s15 + $0xa0] sm:$0xff]  ;;  %v592_v22 = vld [vmem:[%s2114_s15 + $0xa8] sm:$0xff] }
  0x8f   : >> { %589 = vst [vmem:[%s2110_s13 + $0x98] sm:$0xff] %v588_v20  ;;  %591 = vst [vmem:[%s2110_s13 + $0xa0] sm:$0xff] %v590_v21  ;;  %v594_v23 = vld [vmem:[%s2114_s15 + $0xb0] sm:$0xff]  ;;  %v596_v24 = vld [vmem:[%s2114_s15 + $0xb8] sm:$0xff] }
  0x90   : >> { %593 = vst [vmem:[%s2110_s13 + $0xa8] sm:$0xff] %v592_v22  ;;  %v598_v25 = vld [vmem:[%s2114_s15 + $0xc0] sm:$0xff]  ;;  %595 = vst [vmem:[%s2110_s13 + $0xb0] sm:$0xff] %v594_v23  ;;  %v600_v26 = vld [vmem:[%s2114_s15 + $0xc8] sm:$0xff] }
  0x91   : >> { %597 = vst [vmem:[%s2110_s13 + $0xb8] sm:$0xff] %v596_v24  ;;  %599 = vst [vmem:[%s2110_s13 + $0xc0] sm:$0xff] %v598_v25  ;;  %v602_v27 = vld [vmem:[%s2114_s15 + $0xd0] sm:$0xff]  ;;  %v604_v28 = vld [vmem:[%s2114_s15 + $0xd8] sm:$0xff] }
  0x92   : >> { %601 = vst [vmem:[%s2110_s13 + $0xc8] sm:$0xff] %v600_v26  ;;  %603 = vst [vmem:[%s2110_s13 + $0xd0] sm:$0xff] %v602_v27  ;;  %v606_v29 = vld [vmem:[%s2114_s15 + $0xe0] sm:$0xff]  ;;  %v608_v30 = vld [vmem:[%s2114_s15 + $0xe8] sm:$0xff] }
  0x93   : >> { %605 = vst [vmem:[%s2110_s13 + $0xd8] sm:$0xff] %v604_v28  ;;  %v610_v31 = vld [vmem:[%s2114_s15 + $0xf0] sm:$0xff]  ;;  %607 = vst [vmem:[%s2110_s13 + $0xe0] sm:$0xff] %v606_v29  ;;  %v612_v32 = vld [vmem:[%s2114_s15 + $0xf8] sm:$0xff] }
  0x94   : >> { %609 = vst [vmem:[%s2110_s13 + $0xe8] sm:$0xff] %v608_v30  ;;  %611 = vst [vmem:[%s2110_s13 + $0xf0] sm:$0xff] %v610_v31  ;;  %v550_v33 = vld [vmem:[%s2114_s15] sm:$0xff]  ;;  %v614_v34 = vld [vmem:[%s2114_s15 + $0x14] sm:$0xff] }
  0x95   : >> { %613 = vst [vmem:[%s2110_s13 + $0xf8] sm:$0xff] %v612_v32  ;;  %551 = vst [vmem:[%s2110_s13] sm:$0xff] %v550_v33  ;;  %v616_v35 = vld [vmem:[%s2114_s15 + $0x1c] sm:$0xff]  ;;  %v618_v36 = vld [vmem:[%s2114_s15 + $0x24] sm:$0xff] }
  0x96   : >> { %615 = vst [vmem:[%s2110_s13 + $0xc] sm:$0xff] %v614_v34  ;;  %v620_v37 = vld [vmem:[%s2114_s15 + $0x2c] sm:$0xff]  ;;  %617 = vst [vmem:[%s2110_s13 + $0x14] sm:$0xff] %v616_v35  ;;  %v622_v38 = vld [vmem:[%s2114_s15 + $0x34] sm:$0xff] }
  0x97   : >> { %619 = vst [vmem:[%s2110_s13 + $0x1c] sm:$0xff] %v618_v36  ;;  %621 = vst [vmem:[%s2110_s13 + $0x24] sm:$0xff] %v620_v37  ;;  %v624_v39 = vld [vmem:[%s2114_s15 + $0x3c] sm:$0xff]  ;;  %v626_v40 = vld [vmem:[%s2114_s15 + $0x44] sm:$0xff] }
  0x98   : >> { %623 = vst [vmem:[%s2110_s13 + $0x2c] sm:$0xff] %v622_v38  ;;  %625 = vst [vmem:[%s2110_s13 + $0x34] sm:$0xff] %v624_v39  ;;  %v628_v41 = vld [vmem:[%s2114_s15 + $0x4c] sm:$0xff]  ;;  %v630_v42 = vld [vmem:[%s2114_s15 + $0x54] sm:$0xff] }
  0x99   : >> { %627 = vst [vmem:[%s2110_s13 + $0x3c] sm:$0xff] %v626_v40  ;;  %v632_v43 = vld [vmem:[%s2114_s15 + $0x5c] sm:$0xff]  ;;  %629 = vst [vmem:[%s2110_s13 + $0x44] sm:$0xff] %v628_v41  ;;  %v634_v44 = vld [vmem:[%s2114_s15 + $0x64] sm:$0xff] }
  0x9a   : >> { %631 = vst [vmem:[%s2110_s13 + $0x4c] sm:$0xff] %v630_v42  ;;  %633 = vst [vmem:[%s2110_s13 + $0x54] sm:$0xff] %v632_v43  ;;  %v636_v45 = vld [vmem:[%s2114_s15 + $0x6c] sm:$0xff]  ;;  %v638_v46 = vld [vmem:[%s2114_s15 + $0x74] sm:$0xff] }
  0x9b   : >> { %635 = vst [vmem:[%s2110_s13 + $0x5c] sm:$0xff] %v634_v44  ;;  %637 = vst [vmem:[%s2110_s13 + $0x64] sm:$0xff] %v636_v45  ;;  %v640_v47 = vld [vmem:[%s2114_s15 + $0x7c] sm:$0xff]  ;;  %v642_v48 = vld [vmem:[%s2114_s15 + $0x84] sm:$0xff] }
  0x9c   : >> { %639 = vst [vmem:[%s2110_s13 + $0x6c] sm:$0xff] %v638_v46  ;;  %v644_v49 = vld [vmem:[%s2114_s15 + $0x8c] sm:$0xff]  ;;  %641 = vst [vmem:[%s2110_s13 + $0x74] sm:$0xff] %v640_v47  ;;  %v646_v50 = vld [vmem:[%s2114_s15 + $0x94] sm:$0xff] }
  0x9d   : >> { %643 = vst [vmem:[%s2110_s13 + $0x7c] sm:$0xff] %v642_v48  ;;  %645 = vst [vmem:[%s2110_s13 + $0x84] sm:$0xff] %v644_v49  ;;  %v648_v51 = vld [vmem:[%s2114_s15 + $0x9c] sm:$0xff]  ;;  %v650_v52 = vld [vmem:[%s2114_s15 + $0xa4] sm:$0xff] }
  0x9e   : >> { %647 = vst [vmem:[%s2110_s13 + $0x8c] sm:$0xff] %v646_v50  ;;  %649 = vst [vmem:[%s2110_s13 + $0x94] sm:$0xff] %v648_v51  ;;  %v652_v53 = vld [vmem:[%s2114_s15 + $0xac] sm:$0xff]  ;;  %v654_v54 = vld [vmem:[%s2114_s15 + $0xb4] sm:$0xff] }
  0x9f   : >> { %651 = vst [vmem:[%s2110_s13 + $0x9c] sm:$0xff] %v650_v52  ;;  %v656_v55 = vld [vmem:[%s2114_s15 + $0xbc] sm:$0xff]  ;;  %653 = vst [vmem:[%s2110_s13 + $0xa4] sm:$0xff] %v652_v53  ;;  %v658_v56 = vld [vmem:[%s2114_s15 + $0xc4] sm:$0xff]  ;;  %546 = sbr.rel (!%p543_p12) target bundleno = 133 (0x85), region = 206 }
  0xa0   : >> { %655 = vst [vmem:[%s2110_s13 + $0xac] sm:$0xff] %v654_v54  ;;  %657 = vst [vmem:[%s2110_s13 + $0xb4] sm:$0xff] %v656_v55  ;;  %v660_v57 = vld [vmem:[%s2114_s15 + $0xcc] sm:$0xff]  ;;  %v662_v58 = vld [vmem:[%s2114_s15 + $0xd4] sm:$0xff] }
  0xa1   : >> { %659 = vst [vmem:[%s2110_s13 + $0xbc] sm:$0xff] %v658_v56  ;;  %661 = vst [vmem:[%s2110_s13 + $0xc4] sm:$0xff] %v660_v57  ;;  %v664_v59 = vld [vmem:[%s2114_s15 + $0xdc] sm:$0xff]  ;;  %v666_v60 = vld [vmem:[%s2114_s15 + $0xe4] sm:$0xff] }
  0xa2   : >> { %663 = vst [vmem:[%s2110_s13 + $0xcc] sm:$0xff] %v662_v58  ;;  %v668_v61 = vld [vmem:[%s2114_s15 + $0xec] sm:$0xff]  ;;  %665 = vst [vmem:[%s2110_s13 + $0xd4] sm:$0xff] %v664_v59  ;;  %v670_v62 = vld [vmem:[%s2114_s15 + $0xf4] sm:$0xff] }
  0xa3   : >> { %667 = vst [vmem:[%s2110_s13 + $0xdc] sm:$0xff] %v666_v60  ;;  %669 = vst [vmem:[%s2110_s13 + $0xe4] sm:$0xff] %v668_v61  ;;  %v672_v63 = vld [vmem:[%s2114_s15 + $0xfc] sm:$0xff]  ;;  %v674_v0 = vld [vmem:[%s2114_s15 + $0x104] sm:$0xff] }
  0xa4   : >> { %671 = vst [vmem:[%s2110_s13 + $0xec] sm:$0xff] %v670_v62  ;;  %673 = vst [vmem:[%s2110_s13 + $0xf4] sm:$0xff] %v672_v63  ;;  %v676_v1 = vld [vmem:[%s2114_s15 + $0x10c] sm:$0xff]  ;;  %s2996_s15 = smov %s2558_s19 }
  0xa5   : >> { %675 = vst [vmem:[%s2110_s13 + $0xfc] sm:$0xff] %v674_v0  ;;  %677 = vst [vmem:[%s2110_s13 + $0x104] sm:$0xff] %v676_v1  ;;  %s2995_s13 = smov %s2561_s22 }
  0xa6 PF: > { %s2655_s24 = sand.u32 31, %s537_s28   ;;  %s1687_s27 = sshll.u32 %s2476_s26, 12 }
  0xa7   : > { %s689_s10 = sshra.s32 %s1687_s27, 4  ;;  %p1623_p13 = scmp.le.s32.totalorder %s2655_s24, 0 }
  0xa8   : > { %s2659_s17 = scalar_lea.vmem %s2257_s12, %s689_s10   ;;  %s693_s22 = scalar_lea.vmem %s2261_s21, %s689_s10 [#allocation2]  }
  0xa9   : > { %1569 = sbr.rel (%p1623_p13) target bundleno = 186 (0xba), region = 211  ;;  %s2124_s18 = smov (!%p1623_p13), %s693_s22  }
  0xaa   : > { %s2128_s11 = smov (!%p1623_p13), %s2659_s17   ;;  %s2132_s19 = smov (!%p1623_p13), 0  }
  0xab   : > { %s2136_s13 = smov (!%p1623_p13), 0  }
  0xb0 LB: >> { %v705_v2 = vld [vmem:[%s2130_s11] sm:$0xff]  ;;  %v707_v3 = vld [vmem:[%s2130_s11 + $0x14] sm:$0xff]  ;;  %s709_s28 = sadd.s32 1, %s2134_s19  ;;  %s699_s13 = sadd.s32 1, %s2138_s13   ;;  %s2138_s13 = sphi %s2136_s13, %s699_s13   ;;  %s2134_s19 = sphi %s2132_s19, %s2133_s19   ;;  %s2130_s11 = sphi %s2128_s11, %s714_s11   ;;  %s2126_s18 = sphi %s2124_s18, %s715_s18  }
  0xb1   : >> { %706 = vst [vmem:[%s2126_s18] sm:$0xff] %v705_v2  ;;  %708 = vst [vmem:[%s2126_s18 + $0xc] sm:$0xff] %v707_v3  ;;  %p710_p0 = scmp.ge.s32.totalorder %s709_s28, %s2655_s24  ;;  %p698_p1 = scmp.ge.s32.totalorder %s699_s13, %s2655_s24 }
  0xb3   : >> { %s3018_s28 = smov (%p710_p0, %s709_s28), 0  ;;  %701 = sbr.rel (!%p698_p1) target bundleno = 176 (0xb0), region = 217 }
  0xb4   : >> { %s1624_s10 = sshll.u32 %s3018_s28, 3  ;;  %s2133_s19 = smov %s3018_s28  }
  0xb5   : >> { %s714_s11 = scalar_lea.vmem %s2659_s17, %s1624_s10   ;;  %s715_s18 = scalar_lea.vmem %s693_s22, %s1624_s10 [#allocation2]  }
  0xba PF: > { %s2140_s26 = smov 0  }
  0xbb   : > { %s716_s15 = sshllo.u32 %s2140_s26, %s2265_s25 }
  0xbc   : > { %v725_v4 = vld [vmem:[%s2469_s29] sm:%s716_s15]  ;;  %v727_v5 = vld [vmem:[%s2469_s29 + $0x14] sm:%s716_s15] }
  0xbd   : > { %726 = vst [vmem:[%s2472_s30] sm:%s716_s15] %v725_v4  ;;  %728 = vst [vmem:[%s2472_s30 + $0xc] sm:%s716_s15] %v727_v5 }
  0xbe PF: > { %p1626_p2 = scmp.ge.u32.totalorder %s2259_s20, 8 }
  0xbf   : > { %s2141_s0 = smov (!%p1626_p2), 0  }
  0xc0   : > { %331 = sbr.rel (%p1626_p2) target bundleno = 199 (0xc7), region = 68  ;;  %s332_s17 = sshllo.u32 (!%p1626_p2), %s2141_s0, %s2259_s20 }
  0xc1   : > { %v341_v6 = vld [vmem:[%s2257_s12] sm:%s332_s17] (!%p1626_p2)  ;;  %v343_v7 = vld [vmem:[%s2257_s12 + $0x14] sm:%s332_s17] (!%p1626_p2) }
  0xc2   : > { %342 = vst [vmem:[%s2261_s21] sm:%s332_s17] (!%p1626_p2), %v341_v6  ;;  %344 = vst [vmem:[%s2261_s21 + $0xc] sm:%s332_s17] (!%p1626_p2), %v343_v7 }
  0xc7 PF: > { %p1627_p3 = scmp.ge.s32.totalorder %s2074_s16, 1  ;;  %p731_p4 = scmp.lt.s32.totalorder %s2074_s16, 3 }
  0xc9   : > { %p732_p5 = pnand %p1627_p3, %p731_p4 }
  0xca   : > { %s2681_s25 = sand.u32 (!%p732_p5), 1, %s2066_s14   ;;  %v2142_v8 = vmov (!%p732_p5), 0   ;;  %v1908_v9 = vld [vmem:[%s2957_s1] sm:$0xff] (!%p732_p5)   ;;  %vm844_vm0 = vcmask (!%p732_p5), 130048   ;;  %v954_v12 = vld [vmem:[%s2959_s3 + $0x8] sm:$0xff] (!%p732_p5)  ;;  %v796_v20 = vld [vmem:[%s2958_s2 + $0x10] sm:$0xff] (!%p732_p5) }
  0xcb   : > { %735 = sbr.rel (%p732_p5) target bundleno = 966 (0x3c6), region = 122  ;;  %883 = vmatprep.mubr.bf16.mxu0 (!%p732_p5), %v2142_v8  ;;  %1902 = vset.pattern.permute.xlu0 (!%p732_p5), %v2142_v8  ;;  %v794_v10 = vld [vmem:[%s2958_s2] sm:$0xff] (!%p732_p5)  ;;  %v795_v17 = vld [vmem:[%s2958_s2 + $0x8] sm:$0xff] (!%p732_p5)  ;;  %vm970_vm2 = vcmp.eq.f32.partialorder (!%p732_p5), %v954_v12, 1.0  ;;  %v955_v21 = vld [vmem:[%s2959_s3 + $0x10] sm:$0xff] (!%p732_p5)  ;;  %vm1006_vm4 = vcmp.eq.f32.partialorder (!%p732_p5), %v954_v12, -1.0 }
  0xcc   : > { %s1729_s29 = smul.u32 (!%p732_p5), 24, %s2681_s25  ;;  %1903 = vset.pattern.permute.xlu1 (!%p732_p5), %v2142_v8  ;;  %1708 = vmatprep.mubr.msk.bf16.mxu1 (!%p732_p5), %vm844_vm0, %v1908_v9  ;;  %v953_v11 = vld [vmem:[%s2959_s3] sm:$0xff] (!%p732_p5)  ;;  %v1909_v18 = vld [vmem:[%s2957_s1 + $0x8] sm:$0xff] (!%p732_p5)   ;;  %v974_v19 = vsel (!%p732_p5), %vm970_vm2, 1, %v2142_v8  ;;  %v797_v22 = vld [vmem:[%s2958_s2 + $0x18] sm:$0xff] (!%p732_p5)  ;;  %vm971_vm5 = vcmp.eq.f32.partialorder (!%p732_p5), %v955_v21, 1.0 }
  0xcd   : > { %800 = vperm.xlu0 (!%p732_p5), %1902, %v794_v10   ;;  %vm969_vm1 = vcmp.eq.f32.partialorder (!%p732_p5), %v953_v11, 1.0  ;;  %vm1005_vm3 = vcmp.eq.f32.partialorder (!%p732_p5), %v953_v11, -1.0  ;;  %v956_v24 = vld [vmem:[%s2959_s3 + $0x18] sm:$0xff] (!%p732_p5)  ;;  %v1010_v25 = vsel (!%p732_p5), %vm1006_vm4, 1, %v2142_v8  ;;  %v975_v26 = vsel (!%p732_p5), %vm971_vm5, 1, %v2142_v8  ;;  %v1051_v30 = vld [vmem:[%s2961_s5] sm:$0xff] (!%p732_p5) }
  0xce   : > { %s740_s11 = scalar_lea.vmem (!%p732_p5), [#allocation2], %s1729_s29  ;;  %v973_v16 = vsel (!%p732_p5), %vm969_vm1, 1, %v2142_v8  ;;  %v1009_v23 = vsel (!%p732_p5), %vm1005_vm3, 1, %v2142_v8  ;;  %vm972_vm6 = vcmp.eq.f32.partialorder (!%p732_p5), %v956_v24, 1.0  ;;  %vm1007_vm7 = vcmp.eq.f32.partialorder (!%p732_p5), %v955_v21, -1.0  ;;  %v1206_v31 = vld [vmem:[%s2962_s6] sm:$0xff] (!%p732_p5) }
  0xcf   : > { %v1904_v13 = vld [vmem:[%s740_s11 + $0x4] ss:$12 sps:$4 sm:$0xff] (!%p732_p5)   ;;  %v1906_v14 = vld [vmem:[%s740_s11 + $0x8] ss:$12 sps:$4 sm:$0xff] (!%p732_p5)   ;;  %v1907_v15 = vld [vmem:[%s740_s11] ss:$12 sps:$4 sm:$0xff] (!%p732_p5)   ;;  %978 = vperm.xlu1 (!%p732_p5), %1903, %v973_v16  }
  0xd0   : > { %851 = vmatprep.subr.bf16.mxu0 (!%p732_p5), %v1904_v13  ;;  %1706 = vmatprep.subr.bf16.mxu1 (!%p732_p5), %v1906_v14  ;;  %v976_v27 = vsel (!%p732_p5), %vm972_vm6, 1, %v2142_v8  ;;  %v1011_v28 = vsel (!%p732_p5), %vm1007_vm7, 1, %v2142_v8  ;;  %vm1008_vm8 = vcmp.eq.f32.partialorder (!%p732_p5), %v956_v24, -1.0  ;;  %v1052_v32 = vld [vmem:[%s2961_s5 + $0x8] sm:$0xff] (!%p732_p5)  ;;  %v1053_v33 = vld [vmem:[%s2961_s5 + $0x10] sm:$0xff] (!%p732_p5)  ;;  %vm1210_vm9 = vcmp.eq.f32.partialorder (!%p732_p5), %v1206_v31, 1.0 }
  0xd1   : > { %852 = vmatpush1.bf16.msra.mxu0 (!%p732_p5), %v1907_v15  ;;  %1707 = vmatpush3.bf16.msra.mxu1 (!%p732_p5), %v1906_v14  ;;  %v1012_v29 = vsel (!%p732_p5), %vm1008_vm8, 1, %v2142_v8  ;;  %v1207_v34 = vld [vmem:[%s2962_s6 + $0x8] sm:$0xff] (!%p732_p5)  ;;  %v1054_v35 = vld [vmem:[%s2961_s5 + $0x18] sm:$0xff] (!%p732_p5)  ;;  %v1214_v36 = vsel (!%p732_p5), %vm1210_vm9, 1, %v2142_v8  ;;  %vm1246_vm11 = vcmp.eq.f32.partialorder (!%p732_p5), %v1206_v31, -1.0  ;;  %v1208_v37 = vld [vmem:[%s2962_s6 + $0x10] sm:$0xff] (!%p732_p5) }
  0xd2   : > { %805 = vperm.xlu0 %1902, %v795_v17   ;;  %vm1211_vm10 = vcmp.eq.f32.partialorder %v1207_v34, 1.0  ;;  %v1250_v39 = vsel %vm1246_vm11, 1, %v2142_v8  ;;  %vm1247_vm12 = vcmp.eq.f32.partialorder %v1207_v34, -1.0  ;;  %vm1212_vm13 = vcmp.eq.f32.partialorder %v1208_v37, 1.0  ;;  %v1209_v40 = vld [vmem:[%s2962_s6 + $0x18] sm:$0xff]  ;;  %v1379_v45 = vld [vmem:[%s2965_s9] sm:$0xff] }
  0xd3   : > { %981 = vperm.xlu1 %1903, %v974_v19   ;;  %v1215_v38 = vsel %vm1211_vm10, 1, %v2142_v8  ;;  %v1251_v41 = vsel %vm1247_vm12, 1, %v2142_v8  ;;  %v1216_v42 = vsel %vm1212_vm13, 1, %v2142_v8  ;;  %vm1213_vm14 = vcmp.eq.f32.partialorder %v1209_v40, 1.0  ;;  %v1289_v47 = vld [vmem:[%s2964_s8] sm:$0xff]  ;;  %s1730_s28 = smul.u32 12, %s2681_s25 }
  0xd4   : > { %1633 = vmatmul.mubr.msk.bf16.vlgmr.msra.gmra.mrb[0].mxu0 %vm844_vm0, %v1908_v9  ;;  %1709 = vmatmul.mubr.msk.bf16.vlgmr.msra.gmra.mrb[0].mxu1 %vm844_vm0, %v1909_v18  ;;  %vm1248_vm15 = vcmp.eq.f32.partialorder %v1208_v37, -1.0  ;;  %v1217_v43 = vsel %vm1213_vm14, 1, %v2142_v8  ;;  %vm1398_vm1 = vcmp.eq.f32.partialorder %v1379_v45, 1.0  ;;  %vm1407_vm2 = vcmp.eq.f32.partialorder %v1379_v45, -1.0  ;;  %v2774_v50 = vld [vmem:[%s2960_s4] sm:$0xff]   ;;  %s1432_s26 = scalar_lea.sflag [#allocation4], %s2681_s25 }
  0xd5   : > { %893 = vmatprep.mubr.bf16.mxu0 %v2142_v8  ;;  %1124 = vmatprep.mubr.bf16.mxu1 %v2142_v8  ;;  %v1252_v44 = vsel %vm1248_vm15, 1, %v2142_v8  ;;  %v1399_v48 = vsel %vm1398_vm1, 1, %v2142_v8  ;;  %v1408_v49 = vsel %vm1407_vm2, 1, %v2142_v8  ;;  %vm1085_vm3 = vcmask 261120   ;;  %s774_s10 = scalar_lea.vmem [#allocation3], %s1730_s28  ;;  %s3000_s15 = sld [smem:[#allocation8_spill]] (%p2240_p6) }
  0xd6   : > { %810 = vperm.xlu0 %1902, %v796_v20   ;;  %vm2144_vm14 = vmmov 0  }
  0xd7   : > { %815 = vperm.xlu1 %1903, %v797_v22  }
  0xda   : > { %1014 = vperm.xlu0 %1902, %v1009_v23  }
  0xdb   : > { %1017 = vperm.xlu1 %1903, %v1010_v25   ;;  %s1439_s0 = smul.u32 (%p2240_p6), 3, %s3000_s15 }
  0xdc   : > { %1634 = vmatmul.mubr.msk.bf16.gmra.mrb[4].mxu0 %vm844_vm0, %v1909_v18  ;;  %vm1249_vm0 = vcmp.eq.f32.partialorder %v1209_v40, -1.0 }
  0xdd   : > { %v1253_v46 = vsel %vm1249_vm0, 1, %v2142_v8  ;;  %1716 = vmatprep.mubr.msk.bf16.mxu0 %vm1085_vm3, %v2774_v50  ;;  %s1440_s17 = ssub.s32 (%p2240_p6), 5, %s1439_s0 }
  0xde   : > { %984 = vperm.xlu0 %1902, %v975_v26   ;;  %p1441_p7 = scmp.lt.s32.totalorder (%p2240_p6), %s1440_s17, 3 }
  0xdf   : > { %987 = vperm.xlu1 %1903, %v976_v27  }
  0xe2   : > { %1020 = vperm.xlu0 %1902, %v1011_v28  }
  0xe3   : > { %1023 = vperm.xlu1 %1903, %v1012_v29  }
  0xe6   : > { %1057 = vperm.xlu0 %1902, %v1051_v30  }
  0xe7   : > { %1062 = vperm.xlu1 %1903, %v1052_v32  }
  0xea   : > { %1067 = vperm.xlu0 %1902, %v1053_v33  }
  0xeb   : > { %1072 = vperm.xlu1 %1903, %v1054_v35  }
  0xee   : > { %1219 = vperm.xlu0 %1902, %v1214_v36  }
  0xef   : > { %1222 = vperm.xlu1 %1903, %v1215_v38  }
  0xf2   : > { %1255 = vperm.xlu0 %1902, %v1250_v39  }
  0xf3   : > { %1258 = vperm.xlu1 %1903, %v1251_v41  }
  0xf6   : > { %1225 = vperm.xlu0 %1902, %v1216_v42  }
  0xf7   : > { %1228 = vperm.xlu1 %1903, %v1217_v43  }
  0xfa   : > { %1261 = vperm.xlu0 %1902, %v1252_v44  }
  0xfb   : > { %1264 = vperm.xlu1 %1903, %v1253_v46  }
  0xfe   : > { %1292 = vperm.xlu0 %1902, %v1289_v47  }
  0xff   : > { %1401 = vperm.xlu1 %1903, %v1399_v48  }
 0x102   : > { %1410 = vperm.xlu0 %1902, %v1408_v49  }
 0x14c   : > { %v801_v51 = vpop.permute.xlu0 %800 }
 0x14e   : > { %v979_v52 = vpop.permute.xlu1 %978 }
 0x14f   : > { %vm989_vm4 = vcmp.eq.s32.totalorder %v979_v52, 1  ;;  %v1911_v52 = vld [vmem:[%s2960_s4 + $0x8] sm:$0xff]  }
 0x151   : > { %v806_v53 = vpop.permute.xlu0 %805 }
 0x152   : > { %v982_v54 = vpop.permute.xlu1 %981 }
 0x153   : > { %vm990_vm5 = vcmp.eq.s32.totalorder %v982_v54, 1 }
 0x155   : > { %v811_v55 = vpop.permute.xlu0 %810 }
 0x156   : > { %v2778_v56 = vpop.permute.xlu1 %815 }
 0x159   : > { %v1015_v57 = vpop.permute.xlu0 %1014 }
 0x15a   : > { %v1018_v58 = vpop.permute.xlu1 %1017  ;;  %vm1693_vm6 = vcmp.ne.s32.totalorder %v1015_v57, 1  ;;  %v2143_v57 = vmov 0.0  }
 0x15b   : > { %vm1692_vm7 = vcmp.ne.s32.totalorder %v1018_v58, 1 }
 0x15c   : > { %vm1641_vm12 = vmpackc.low %vm1692_vm7, %vm1693_vm6 }
 0x15d   : > { %v2780_v59 = vpop.permute.xlu0 %984 }
 0x15e   : > { %v2782_v60 = vpop.permute.xlu1 %987  ;;  %vm991_vm8 = vcmp.eq.s32.totalorder %v2780_v59, 1 }
 0x15f   : > { %vm992_vm9 = vcmp.eq.s32.totalorder %v2782_v60, 1 }
 0x161   : > { %v1021_v14 = vpop.permute.xlu0 %1020 }
 0x162   : > { %vm1695_vm10 = vcmp.ne.s32.totalorder %v1021_v14, 1  ;;  %v1024_v29 = vpop.permute.xlu1 %1023 }
 0x163   : > { %vm1694_vm11 = vcmp.ne.s32.totalorder %v1024_v29, 1 }
 0x164   : > { %vm2801_vm13 = vmpackc.low %vm1694_vm11, %vm1695_vm10 }
 0x165   : > { %v1058_v58 = vpop.permute.xlu0 %1057 }
 0x166   : > { %v1063_v59 = vpop.permute.xlu1 %1062 }
 0x169   : > { %v1068_v60 = vpop.permute.xlu0 %1067 }
 0x1a7   : > { %v885_v61 = vpop.f32.mrb[0].mxu0  ;;  %v1710_v62 = vpop.f32.mrb[0].mxu1 }
 0x1a8   : > { %v886_v63 = vadd.f32 %v885_v61, %v801_v51  ;;  %v947_v0 = vadd.f32 %v1710_v62, %v811_v55  ;;  %v887_v1 = vpop.f32.mrb[1].mxu0  ;;  %v938_v2 = vpop.f32.mrb[1].mxu1 }
 0x1a9   : > { %v888_v3 = vadd.f32 %v887_v1, %v801_v51  ;;  %v939_v4 = vadd.f32 %v938_v2, %v801_v51  ;;  %v889_v5 = vpop.f32.mrb[2].mxu0  ;;  %v1711_v6 = vpop.f32.mrb[2].mxu1 }
 0x1aa   : > { %v957_v7 = vmax.f32 %v886_v63, 0.0  ;;  %v965_v9 = vmax.f32 %v947_v0, 0.0  ;;  %v890_v10 = vadd.f32 %v889_v5, %v806_v53  ;;  %v950_v11 = vadd.f32 %v1711_v6, %v2778_v56  ;;  %v891_v12 = vpop.f32.mrb[3].mxu0  ;;  %v941_v13 = vpop.f32.mrb[3].mxu1 }
 0x1ab   : > { %v958_v15 = vmax.f32 %v888_v3, 0.0  ;;  %v959_v16 = vmax.f32 %v939_v4, 0.0  ;;  %v892_v17 = vadd.f32 %v891_v12, %v806_v53  ;;  %v942_v18 = vadd.f32 %v941_v13, %v806_v53  ;;  %v1073_v61 = vpop.permute.xlu1 %1072  ;;  %v2833_v62 = vpop.permute.xlu0 %1219 }
 0x1ac   : > { %v960_v19 = vmax.f32 %v890_v10, 0.0  ;;  %v968_v20 = vmax.f32 %v950_v11, 0.0  ;;  %v993_v21 = vsel %vm989_vm4, %v886_v63, %v957_v7  ;;  %v1001_v22 = vsel %vm991_vm8, %v947_v0, %v965_v9 }
 0x1ad   : > { %v961_v23 = vmax.f32 %v892_v17, 0.0  ;;  %v962_v24 = vmax.f32 %v942_v18, 0.0  ;;  %v994_v25 = vsel %vm989_vm4, %v888_v3, %v958_v15  ;;  %v995_v26 = vsel %vm989_vm4, %v939_v4, %v959_v16 }
 0x1ae   : > { %v996_v27 = vsel %vm990_vm5, %v890_v10, %v960_v19  ;;  %v1004_v28 = vsel %vm992_vm9, %v950_v11, %v968_v20  ;;  %vm1230_vm15 = vcmp.eq.s32.totalorder %v2833_v62, 1 }
 0x1af   : > { %v1647_v30 = vpack.c.bf16 %v996_v27, %v993_v21  ;;  %v1669_v31 = vpack.c.bf16 %v1004_v28, %v1001_v22  ;;  %v997_v32 = vsel %vm990_vm5, %v892_v17, %v961_v23  ;;  %v998_v33 = vsel %vm990_vm5, %v942_v18, %v962_v24  ;;  %v895_v34 = vpop.f32.mrb[4].mxu0  ;;  %v2835_v63 = vpop.permute.xlu1 %1222 }
 0x1b0   : > { %v1642_v35 = vpack.c.bf16 %v997_v32, %v994_v25  ;;  %v1664_v36 = vpack.c.bf16 %v998_v33, %v995_v26  ;;  %v896_v37 = vadd.f32 %v895_v34, %v811_v55  ;;  %v897_v38 = vpop.f32.mrb[5].mxu0  ;;  %vm1231_vm0 = vcmp.eq.s32.totalorder %v2835_v63, 1 }
 0x1b1   : > { %v898_v39 = vadd.f32 %v897_v38, %v811_v55  ;;  %v899_v40 = vpop.f32.mrb[6].mxu0 }
 0x1b2   : > { %v963_v41 = vmax.f32 %v896_v37, 0.0  ;;  %v900_v42 = vadd.f32 %v899_v40, %v2778_v56  ;;  %v901_v43 = vpop.f32.mrb[7].mxu0  ;;  %1643 = vmatprep.subr.msk.bf16.mxu1 %vm1641_vm12, %v1642_v35  ;;  %1712 = vmatprep.subr.msk.bf16.mxu0 %vm1641_vm12, %v1664_v36 }
 0x1b3   : > { %v964_v45 = vmax.f32 %v898_v39, 0.0  ;;  %v902_v46 = vadd.f32 %v901_v43, %v2778_v56  ;;  %1648 = vmatpush1.bf16.msk.msra.mxu1 %vm1641_vm12, %v1647_v30  ;;  %1713 = vmatpush3.bf16.msk.msra.mxu0 %vm1641_vm12, %v1664_v36  ;;  %v2839_v2 = vpop.permute.xlu1 %1258 }
 0x1b4   : > { %v966_v47 = vmax.f32 %v900_v42, 0.0  ;;  %1714 = vmatprep.subr.msk.bf16.mxu0 %vm2801_vm13, %v1669_v31  ;;  %v999_v49 = vsel %vm991_vm8, %v896_v37, %v963_v41  ;;  %vm1267_vm2 = vcmp.eq.s32.totalorder %v2839_v2, 1 }
 0x1b5   : > { %v967_v48 = vmax.f32 %v902_v46, 0.0  ;;  %v1000_v53 = vsel %vm991_vm8, %v898_v39, %v964_v45 }
 0x1b6   : > { %v1002_v51 = vsel %vm992_vm9, %v900_v42, %v966_v47 }
 0x1b7   : > { %v1657_v54 = vpack.c.bf16 %v1002_v51, %v999_v49  ;;  %v1003_v55 = vsel %vm992_vm9, %v902_v46, %v967_v48  ;;  %1715 = vmatpush3.bf16.msk.msra.mxu0 %vm2801_vm13, %v1669_v31  ;;  %v2843_v17 = vpop.permute.xlu1 %1228 }
 0x1b8   : > { %v1652_v56 = vpack.c.bf16 %v1003_v55, %v1000_v53  ;;  %vm1233_vm5 = vcmp.eq.s32.totalorder %v2843_v17, 1 }
 0x1ba   : > { %1653 = vmatprep.subr.msk.bf16.mxu1 %vm2801_vm13, %v1652_v56  ;;  %1717 = vmatmul.mubr.msk.bf16.vlgmr.msra.gmra.mrb[8].mxu0 %vm1085_vm3, %v1911_v52 }
 0x1bb   : > { %1658 = vmatpush1.bf16.msk.msra.mxu1 %vm2801_vm13, %v1657_v54  ;;  %1330 = vmatprep.mubr.bf16.mxu0 %v2142_v8  ;;  %v1265_v25 = vpop.permute.xlu1 %1264 }
 0x1bc   : > { %1720 = vmatprep.subr.bf16.mxu1 %v2143_v57  ;;  %vm1269_vm7 = vcmp.eq.s32.totalorder %v1265_v25, 1 }
 0x1be   : > { %1659 = vmatmul.mubr.msk.bf16.vlgmr.msra.gmra.mrb[4].mxu1 %vm1085_vm3, %v2774_v50  ;;  %v2837_v50 = vpop.permute.xlu0 %1255 }
 0x1bf   : > { %1134 = vmatprep.mubr.bf16.mxu1 %v2142_v8  ;;  %vm1266_vm1 = vcmp.eq.s32.totalorder %v2837_v50, 1 }
 0x1c2   : > { %v2841_v14 = vpop.permute.xlu0 %1225 }
 0x1c3   : > { %vm1232_vm4 = vcmp.eq.s32.totalorder %v2841_v14, 1 }
 0x1c6   : > { %1660 = vmatmul.mubr.msk.bf16.gmra.mrb[8].mxu1 %vm1085_vm3, %v1911_v52  ;;  %v1262_v21 = vpop.permute.xlu0 %1261 }
 0x1c7   : > { %1724 = vmatprep.mubr.msk.bf16.mxu1 %vm2144_vm14, %v2143_v57  ;;  %vm1268_vm6 = vcmp.eq.s32.totalorder %v1262_v21, 1 }
 0x28d   : > { %v1718_v0 = vpop.f32.mrb[8].mxu0 }
 0x28e   : > { %v1188_v8 = vadd.f32 %v1718_v0, %v1068_v60  ;;  %v1179_v1 = vpop.f32.mrb[9].mxu0 }
 0x28f   : > { %v1180_v3 = vadd.f32 %v1179_v1, %v1058_v58  ;;  %v1719_v4 = vpop.f32.mrb[10].mxu0 }
 0x290   : > { %1912 = vtanh.f32 %v1188_v8  ;;  %v1191_v5 = vadd.f32 %v1719_v4, %v1073_v61  ;;  %v1182_v6 = vpop.f32.mrb[11].mxu0 }
 0x291   : > { %1914 = vtanh.f32 %v1180_v3  ;;  %v1183_v7 = vadd.f32 %v1182_v6, %v1063_v59  ;;  %v1126_v9 = vpop.f32.mrb[4].mxu1 }
 0x292   : > { %1916 = vtanh.f32 %v1191_v5  ;;  %v1127_v10 = vadd.f32 %v1126_v9, %v1058_v58  ;;  %v1128_v11 = vpop.f32.mrb[5].mxu1 }
 0x293   : > { %1918 = vtanh.f32 %v1183_v7  ;;  %v1129_v12 = vadd.f32 %v1128_v11, %v1058_v58  ;;  %v1130_v13 = vpop.f32.mrb[6].mxu1  ;;  %v1293_v7 = vpop.permute.xlu0 %1292 }
 0x294   : > { %1920 = vtanh.f32 %v1127_v10  ;;  %v1131_v15 = vadd.f32 %v1130_v13, %v1063_v59  ;;  %v1132_v16 = vpop.f32.mrb[7].mxu1 }
 0x295   : > { %1922 = vtanh.f32 %v1129_v12  ;;  %v1133_v18 = vadd.f32 %v1132_v16, %v1063_v59 }
 0x296   : > { %1924 = vtanh.f32 %v1131_v15 }
 0x297   : > { %1926 = vtanh.f32 %v1133_v18 }
 0x299   : > { %v1136_v19 = vpop.f32.mrb[8].mxu1 }
 0x29a   : > { %v1913_v20 = vpop.eup %1912  ;;  %v1137_v22 = vadd.f32 %v1136_v19, %v1068_v60  ;;  %v1138_v23 = vpop.f32.mrb[9].mxu1 }
 0x29b   : > { %v1915_v24 = vpop.eup %1914  ;;  %v1139_v26 = vadd.f32 %v1138_v23, %v1068_v60  ;;  %v1140_v27 = vpop.f32.mrb[10].mxu1  ;;  %v1242_v28 = vsel %vm1232_vm4, 1.0, %v1913_v20  ;;  %v1282_v60 = vld [vmem:[%s2963_s7] sm:$0xf] }
 0x29c   : > { %v1917_v29 = vpop.eup %1916  ;;  %1928 = vtanh.f32 %v1137_v22  ;;  %v1141_v30 = vadd.f32 %v1140_v27, %v1073_v61  ;;  %v1142_v31 = vpop.f32.mrb[11].mxu1  ;;  %v1236_v32 = vsel %vm1230_vm15, 1.0, %v1915_v24  ;;  %v1278_v36 = vsel %vm1268_vm6, -1.0, %v1242_v28 }
 0x29d   : > { %v1919_v33 = vpop.eup %1918  ;;  %1930 = vtanh.f32 %v1139_v26  ;;  %v1143_v34 = vadd.f32 %v1142_v31, %v1073_v61  ;;  %v1245_v35 = vsel %vm1233_vm5, 1.0, %v1917_v29  ;;  %v1272_v39 = vsel %vm1266_vm1, -1.0, %v1236_v32  ;;  %v1411_v32 = vpop.permute.xlu0 %1410 }
 0x29e   : > { %v1921_v37 = vpop.eup %1920  ;;  %1932 = vtanh.f32 %v1141_v30  ;;  %v1239_v38 = vsel %vm1231_vm0, 1.0, %v1919_v33  ;;  %v1281_v40 = vsel %vm1269_vm7, -1.0, %v1245_v35  ;;  %v1402_v30 = vpop.permute.xlu1 %1401  ;;  %vm1412_vm8 = vcmp.eq.s32.totalorder %v1411_v32, 1 }
 0x29f   : > { %v1923_v41 = vpop.eup %1922  ;;  %1934 = vtanh.f32 %v1143_v34  ;;  %v1275_v42 = vsel %vm1267_vm2, -1.0, %v1239_v38  ;;  %v1288_v43 = vpack.c.bf16 %v1281_v40, %v1278_v36  ;;  %v1234_v44 = vsel %vm1230_vm15, 1.0, %v1921_v37 }
 0x2a0   : > { %v1925_v45 = vpop.eup %1924  ;;  %v1285_v46 = vpack.c.bf16 %v1275_v42, %v1272_v39  ;;  %v1235_v47 = vsel %vm1230_vm15, 1.0, %v1923_v41  ;;  %v1270_v52 = vsel %vm1266_vm1, -1.0, %v1234_v44 }
 0x2a1   : > { %v1927_v48 = vpop.eup %1926  ;;  %v1237_v49 = vsel %vm1231_vm0, 1.0, %v1925_v45  ;;  %v1271_v54 = vsel %vm1266_vm1, -1.0, %v1235_v47 }
 0x2a2   : > { %1721 = vmatpush3.bf16.msra.mxu1 %v1285_v46  ;;  %v1238_v51 = vsel %vm1231_vm0, 1.0, %v1927_v48  ;;  %v1273_v53 = vsel %vm1267_vm2, -1.0, %v1237_v49 }
 0x2a3   : > { %1722 = vmatprep.subr.bf16.mxu1 %v2143_v57  ;;  %v1274_v55 = vsel %vm1267_vm2, -1.0, %v1238_v51  ;;  %v1283_v56 = vpack.c.bf16 %v1273_v53, %v1270_v52 }
 0x2a4   : > { %v1284_v58 = vpack.c.bf16 %v1274_v55, %v1271_v54 }
 0x2a6   : > { %v1929_v59 = vpop.eup %1928  ;;  %1298 = vmatprep.subr.bf16.mxu0 %v1284_v58  ;;  %1723 = vmatpush3.bf16.msra.mxu1 %v1288_v43 }
 0x2a7   : > { %v1931_v61 = vpop.eup %1930  ;;  %1299 = vmatpush1.bf16.msra.mxu0 %v1283_v56  ;;  %v1240_v57 = vsel %vm1232_vm4, 1.0, %v1929_v59 }
 0x2a8   : > { %v1933_v62 = vpop.eup %1932  ;;  %v1241_v63 = vsel %vm1232_vm4, 1.0, %v1931_v61  ;;  %v1276_v1 = vsel %vm1268_vm6, -1.0, %v1240_v57 }
 0x2a9   : > { %v1935_v0 = vpop.eup %1934  ;;  %1725 = vmatmul.mubr.msk.bf16.vlgmr.msra.gmra.mrb[12].mxu1 %vm1085_vm3, %v1282_v60  ;;  %v1243_v50 = vsel %vm1233_vm5, 1.0, %v1933_v62  ;;  %v1277_v3 = vsel %vm1268_vm6, -1.0, %v1241_v63 }
 0x2aa   : > { %v1244_v8 = vsel %vm1233_vm5, 1.0, %v1935_v0  ;;  %v1279_v2 = vsel %vm1269_vm7, -1.0, %v1243_v50 }
 0x2ab   : > { %v1280_v4 = vsel %vm1269_vm7, -1.0, %v1244_v8  ;;  %v1286_v5 = vpack.c.bf16 %v1279_v2, %v1276_v1 }
 0x2ac   : > { %v1287_v6 = vpack.c.bf16 %v1280_v4, %v1277_v3 }
 0x2ae   : > { %1300 = vmatprep.subr.bf16.mxu0 %v1287_v6 }
 0x2af   : > { %1301 = vmatpush1.bf16.msra.mxu0 %v1286_v5 }
 0x2b2   : > { %1673 = vmatmul.mubr.msk.bf16.vlgmr.msra.gmra.mrb[12].mxu0 %vm1085_vm3, %v1282_v60  ;;  %vm1403_vm3 = vcmp.eq.s32.totalorder %v1402_v30, 1 }
 0x37c   : > { %v1373_v9 = vpop.f32.mrb[12].mxu1 }
 0x37d   : > { %v1374_v10 = vadd.f32 %v1373_v9, %v1293_v7  ;;  %v1726_v11 = vpop.f32.mrb[13].mxu1 }
 0x37e   : > { %v1376_v12 = vpop.f32.mrb[14].mxu1 }
 0x37f   : > { %v1382_v13 = vsub.f32 0.0, %v1374_v10  ;;  %v1727_v14 = vpop.f32.mrb[15].mxu1 }
 0x381   : > { %v1387_v15 = vmul.f32 1.442695, %v1382_v13 }
 0x383   : > { %1936 = vpow2.f32 %v1387_v15 }
 0x385   : > { %v1332_v16 = vpop.f32.mrb[12].mxu0 }
 0x386   : > { %v1333_v17 = vadd.f32 %v1332_v16, %v1293_v7  ;;  %v1334_v18 = vpop.f32.mrb[13].mxu0 }
 0x387   : > { %v1335_v19 = vadd.f32 %v1334_v18, %v1293_v7  ;;  %v1336_v20 = vpop.f32.mrb[14].mxu0 }
 0x388   : > { %v1380_v21 = vsub.f32 0.0, %v1333_v17  ;;  %v1337_v22 = vpop.f32.mrb[15].mxu0 }
 0x389   : > { %v1381_v23 = vsub.f32 0.0, %v1335_v19 }
 0x38a   : > { %v1383_v24 = vmul.f32 1.442695, %v1380_v21 }
 0x38b   : > { %v1385_v25 = vmul.f32 1.442695, %v1381_v23 }
 0x38c   : > { %1938 = vpow2.f32 %v1383_v24 }
 0x38d   : > { %v1937_v26 = vpop.eup %1936  ;;  %1940 = vpow2.f32 %v1385_v25 }
 0x38e   : > { %v1391_v27 = vadd.f32 1.0, %v1937_v26 }
 0x390   : > { %1942 = vrcp.f32 %v1391_v27 }
 0x396   : > { %v1939_v28 = vpop.eup %1938 }
 0x397   : > { %v1941_v29 = vpop.eup %1940  ;;  %v1389_v31 = vadd.f32 1.0, %v1939_v28 }
 0x398   : > { %v1390_v33 = vadd.f32 1.0, %v1941_v29 }
 0x399   : > { %1944 = vrcp.f32 %v1389_v31 }
 0x39a   : > { %v1943_v34 = vpop.eup %1942  ;;  %1946 = vrcp.f32 %v1390_v33 }
 0x39b   : > { %v1406_v35 = vsel %vm1403_vm3, 1.0, %v1943_v34 }
 0x39c   : > { %v1415_v36 = vsel %vm1412_vm8, 0.0, %v1406_v35 }
 0x39d   : > { %v1690_v37 = vpack.c.bf16 %v1415_v36, %v1415_v36 }
 0x39f   : > { %1430 = vst [vmem:[%s774_s10 + $0x8] sm:$0xf] %v1690_v37 }
 0x3a3   : > { %v1945_v38 = vpop.eup %1944  ;;  %1438 = sbr.rel (!%p2240_p6) target bundleno = 966 (0x3c6), region = 130 }
 0x3a4   : > { %v1947_v39 = vpop.eup %1946  ;;  %v1404_v40 = vsel %vm1403_vm3, 1.0, %v1945_v38 }
 0x3a5   : > { %v1413_v41 = vsel %vm1412_vm8, 0.0, %v1404_v40  ;;  %v1405_v42 = vsel %vm1403_vm3, 1.0, %v1947_v39 }
 0x3a6   : > { %v1414_v43 = vsel %vm1412_vm8, 0.0, %v1405_v42 }
 0x3a7   : > { %v1689_v44 = vpack.c.bf16 %v1414_v43, %v1413_v41 }
 0x3a9   : > { %1429 = vst [vmem:[%s774_s10] sm:$0xff] %v1689_v44 }
 0x3aa   : > { %s3020_s17 = smov (!%p1441_p7, %s1440_s17), 3 }
 0x3ab   : > { %s2904_s29 = sshll.u32 %s3020_s17, 6 }
 0x3ac   : > { %s1445_s12 = ssub.s32 192, %s2904_s29 }
 0x3ad   : > { %1446 = vsyncadd %s1432_s26, %s1445_s12  ;;  %p1678_p10 = scmp.ne.s32.totalorder %s2904_s29, 0  ;;  %s1691_s20 = smul.u32 192, %s3000_s15 }
 0x3ae   : > { %s1452_s23 = sshll.u32 %s774_s10, 4  ;;  %s3001_s24 = sld [smem:[#allocation13_spill]]  ;;  %s1453_s23 = int_to_ptr.vmem [resolvable:$true] %s1452_s23 }
 0x3af   : > { %s1948_s22 = scalar_lea.vmem %s1453_s23, %s2904_s29  ;;  %s2145_s18 = smov [#allocation3]  }
 0x3b0   : > { %p1949_p6 = scmp.ne.s32.totalorder %s1453_s23, %s1948_s22  ;;  %s1952_s11 = sshll.u32 %s2145_s18, 4  ;;  %s1953_s11 = int_to_ptr.vmem [resolvable:$false] %s1952_s11 }
 0x3b1   : > { %s1954_s19 = scalar_lea.vmem %s1953_s11, 384  ;;  %p1955_p13 = scmp.lt.s32.totalorder %s1453_s23, %s1953_s11 }
 0x3b2   : > { %p1950_p11 = pnand %p1949_p6, %p1678_p10  ;;  %p1956_p0 = scmp.lt.s32.totalorder %s1954_s19, %s1948_s22 }
 0x3b4   : > { %s2914_s27 = scalar_lea.hbm %s3001_s24, %s1691_s20  ;;  %p1951_p12 = pneg %p1950_p11 }
 0x3b5   : > { %p1957_p1 = por %p1956_p0, %p1955_p13 }
 0x3b7   : > { %p1958_p2 = pnand %p1957_p1, %p1951_p12 }
 0x3b9   : > { %1961 = shalt.err (!%p1958_p2)
}
 0x3ba   : > { %s1962_s13 = scalar_lea.hbm %s2914_s27, %s2904_s29  ;;  %s1966_s15 = scalar_lea.hbm %s3001_s24, 320 }
 0x3bb   : > { %p1963_p3 = scmp.ne.s32.totalorder %s2914_s27, %s1962_s13  ;;  %p1967_p7 = scmp.lt.u32.totalorder %s2914_s27, %s3001_s24 }
 0x3bc   : > { %p1968_p6 = scmp.lt.u32.totalorder %s1966_s15, %s1962_s13  ;;  %p1970_p12 = scmp.lt.u32.totalorder %s1962_s13, %s2914_s27 }
 0x3bd   : > { %p1964_p4 = pnand %p1963_p3, %p1678_p10 }
 0x3be   : > { %p1969_p11 = por %p1968_p6, %p1967_p7 }
 0x3bf   : > { %p1965_p5 = pneg %p1964_p4 }
 0x3c0   : > { %p1971_p13 = por %p1970_p12, %p1969_p11 }
 0x3c2   : > { %p1972_p0 = pnand %p1971_p13, %p1965_p5 }
 0x3c4   : > { %1975 = shalt.err (!%p1972_p0)
}
 0x3c5   : > { %1455 = dma.vmem_to_hbm [thread:$0]  (%p1678_p10), %s1453_s23, %s2904_s29, %s2914_s27, %s1432_s26  }
 0x3c6 PF: > { %s3002_s12 = sld [smem:[#allocation6_spill]]  ;;  %p1733_p1 = pnand %p1601_p9, %p2244_p8 }
 0x3cc   : > { %s1464_s21 = sand.u32 1, %s3002_s12  }
 0x3cd   : > { %s1465_s30 = scalar_lea.sflag [#allocation4], %s1464_s21 }
 0x3ce   : > { %2057 = dma.done.wait (!%p1733_p1), %s1465_s30, 192  }
 0x3cf   : > { %2059 = vsyncadd (!%p1733_p1), %s1465_s30, 4294967104  ;;  %s3004_s16 = sld [smem:[#allocation9_spill]]  ;;  %s3005_s22 = sld [smem:[#allocation7_spill]] }
 0x3d0   : > { %s3006_s15 = sld [smem:[#allocation10_spill]]  ;;  %s3007_s13 = smov %s2066_s14 }
 0x3d5   : > { %p20_p2 = scmp.ge.s32.totalorder %s3004_s16, 4   ;;  %s3008_s14 = smov %s3005_s22 }
 0x3d7   :  { %22 = sbr.rel (!%p20_p2) target bundleno = 6 (0x6), region = 228 }
 0x3de   :  { %1470 = vsyncpa [#allocation4], 1 }
 0x3df   :  { %1472 = vsyncpa [#allocation4 + $0x1], 1 }

// kernel: tpu_custom_call.1
= control target key start
LH: loop header
LB: loop body
LE: loop exit
PB: predicated region body
PF: predicated region fallthrough
CT: control target
= control target key end

     0   :  { %s2956_s0 = inlined_call_operand.vmem [shape: bf16[16,600], index: 0, kind: input, shape index: {}]   ;;  %s2957_s1 = inlined_call_operand.vmem [shape: bf16[32,16], index: 1, kind: input, shape index: {}]   ;;  %s2958_s2 = inlined_call_operand.vmem [shape: f32[32,1], index: 2, kind: input, shape index: {}]   ;;  %s2959_s3 = inlined_call_operand.vmem [shape: f32[32,1], index: 3, kind: input, shape index: {}]   ;;  %s2960_s4 = inlined_call_operand.vmem [shape: bf16[32,32], index: 4, kind: input, shape index: {}]   ;;  %s2961_s5 = inlined_call_operand.vmem [shape: f32[32,1], index: 5, kind: input, shape index: {}]   ;;  %s2962_s6 = inlined_call_operand.vmem [shape: f32[32,1], index: 6, kind: input, shape index: {}]   ;;  %s2963_s7 = inlined_call_operand.vmem [shape: bf16[8,32], index: 7, kind: input, shape index: {}]   ;;  %s2964_s8 = inlined_call_operand.vmem [shape: f32[8,1], index: 8, kind: input, shape index: {}]   ;;  %s2965_s9 = inlined_call_operand.vmem [shape: f32[8,1], index: 9, kind: input, shape index: {}]   ;;  %s2966_s10 = inlined_call_operand.hbm [shape: bf16[8,600], index: 10, kind: output, shape index: {}]  }
   0x1   :  { %2976 = sst [smem:[#allocation12_spill]] %s2956_s0 }
   0x2   :  { %2977 = sst [smem:[#allocation13_spill]] %s2966_s10 }
   0x3   :  { %15 = vsyncpa [#allocation4], 0 }
   0x4   :  { %17 = vsyncpa [#allocation4 + $0x1], 0  ;;  %s2201_s13 = smov 0   ;;  %s2203_s14 = smov 0  }
   0x5   :  { %s2205_s15 = smov 0   ;;  %s2207_s16 = smov 0  }
   0x6 LB: > { %2978 = sst [smem:[#allocation6_spill]] %s2062_s13  ;;  %s2222_s17 = sadd.s32 4294967295, %s2074_s16   ;;  %s2074_s16 = sphi %s2207_s16, %s3004_s16   ;;  %s2070_s15 = sphi %s2205_s15, %s3006_s15   ;;  %s2066_s14 = sphi %s2203_s14, %s3008_s14   ;;  %s2062_s13 = sphi %s2201_s13, %s3007_s13  }
   0x7   : > { %2979 = sst [smem:[#allocation7_spill]] %s2070_s15  ;;  %s1599_s18 = sadd.s32 4294967294, %s2074_s16  }
   0x8   : > { %2980 = sst [smem:[#allocation8_spill]] %s2222_s17  ;;  %s2226_s19 = sadd.s32 1, %s2074_s16  }
   0x9   : > { %2981 = sst [smem:[#allocation9_spill]] %s2226_s19  ;;  %s30_s20 = sadd.s32 1, %s2070_s15 }
   0xa   : > { %s27_s21 = ssub.s32 %s2074_s16, %s2226_s19  ;;  %p37_p0 = scmp.ne.s32.totalorder %s2070_s15, %s2066_s14 }
   0xb   : > { %p28_p1 = scmp.eq.s32.totalorder %s27_s21, 0  ;;  %p38_p2 = scmp.eq.s32.totalorder %s2074_s16, 0 }
   0xc   : > { %p256_p3 = scmp.eq.s32.totalorder %s2222_s17, 1  ;;  %p261_p4 = scmp.ne.s32.totalorder %s2066_s14, %s2062_s13 }
   0xd   : > { %s2238_s22 = scalar_select %p28_p1, %s2070_s15, %s30_s20  }
   0xe   : > { %p39_p5 = por %p38_p2, %p37_p0  ;;  %p2240_p6 = por %p256_p3, %p37_p0 }
   0xf   : > { %2982 = sst [smem:[#allocation10_spill]] %s2238_s22  ;;  %p262_p7 = scmp.eq.s32.totalorder %s1599_s18, 1 }
  0x10   : > { %p1601_p9 = scmp.ge.s32.totalorder %s2074_s16, 2 }
  0x11   : > { %p2244_p8 = por %p262_p7, %p261_p4 }
  0x12   : > { %305 = sbr.rel (%p1601_p9) target bundleno = 199 (0xc7), region = 52 }
  0x13   : > { %s2984_s24 = scalar_select %p2244_p8, 1, 0 }
  0x15   : > { %2985 = sst [smem:[#allocation11_spill]] %s2984_s24 }
  0x19   : > { %308 = sbr.rel (!%p39_p5) target bundleno = 199 (0xc7), region = 56  ;;  %s310_s25 = sand.u32 (%p39_p5), 1, %s2070_s15  }
  0x1a   : > { %s313_s26 = smul.u32 (%p39_p5), 3, %s2074_s16  ;;  %s2986_s0 = sld [smem:[#allocation12_spill]] (%p39_p5) }
  0x1b   : > { %s1728_s27 = smul.u32 (%p39_p5), 24, %s310_s25 }
  0x1c   : > { %s314_s28 = ssub.s32 (%p39_p5), 5, %s313_s26  ;;  %s1684_s29 = smul.u32 (%p39_p5), 12, %s2074_s16 }
  0x1d   : > { %p315_p10 = scmp.lt.s32.totalorder (%p39_p5), %s314_s28, 3  ;;  %s2261_s21 = scalar_lea.vmem (%p39_p5), [#allocation2], %s1728_s27  }
  0x20   : > { %s2257_s12 = scalar_lea.vmem %s2986_s0, %s1684_s29   ;;  %s3010_s28 = smov (!%p315_p10, %s314_s28), 3 }
  0x21   : > { %s1602_s18 = sshll.u32 %s3010_s28, 7  ;;  %s2259_s20 = sshll.u32 %s3010_s28, 2 }
  0x22   : > { %p1606_p11 = scmp.eq.s32.totalorder %s1602_s18, 0 }
  0x23   : > { %p325_p12 = scmp.lt.u32.totalorder (!%p1606_p11), %s2259_s20, 8 }
  0x24   : > { %324 = sbr.rel (%p1606_p11) target bundleno = 199 (0xc7), region = 60 }
  0x2b   : > { %328 = sbr.rel (%p325_p12) target bundleno = 190 (0xbe), region = 64  ;;  %s2265_s25 = sand.u32 (!%p325_p12), 7, %s2259_s20  }
  0x2c   : > { %p346_p13 = scmp.eq.s32.totalorder (!%p325_p12), %s2265_s25, 0  ;;  %p1607_p0 = scmp.ne.s32.totalorder (!%p325_p12), %s2265_s25, 0 }
  0x32   : > { %349 = sbr.rel (%p1607_p0) target bundleno = 119 (0x77), region = 79  ;;  %s2967_s26 = sshrl.u32 (!%p1607_p0), %s2259_s20, 3 }
  0x33   : > { %s2272_s28 = sshrl.u32 (!%p1607_p0), %s2967_s26, 5 }
  0x34   : > { %p1608_p1 = scmp.le.s32.totalorder (!%p1607_p0), %s2272_s28, 0 }
  0x39   : > { %1527 = sbr.rel (%p1608_p1) target bundleno = 97 (0x61), region = 178  ;;  %s2987_s27 = smov (!%p1608_p1), %s2261_s21 }
  0x3a   : > { %s2988_s29 = smov (!%p1608_p1), %s2257_s12  ;;  %s2281_s30 = smov (!%p1608_p1), 0  }
  0x3b   : > { %s2283_s11 = smov (!%p1608_p1), 0  }
  0x40 LB: >> { %v365_v0 = vld [vmem:[%s2082_s29 + $0x8] sm:$0xff]  ;;  %v367_v1 = vld [vmem:[%s2082_s29 + $0x10] sm:$0xff]  ;;  %v369_v2 = vld [vmem:[%s2082_s29 + $0x18] sm:$0xff]  ;;  %s491_s18 = sadd.s32 1, %s2086_s30  ;;  %s357_s11 = sadd.s32 1, %s2090_s11   ;;  %s2090_s11 = sphi %s2283_s11, %s357_s11   ;;  %s2086_s30 = sphi %s2281_s30, %s2991_s30   ;;  %s2082_s29 = sphi %s2988_s29, %s2990_s29   ;;  %s2078_s27 = sphi %s2987_s27, %s2989_s27  }
  0x41   : >> { %366 = vst [vmem:[%s2078_s27 + $0x8] sm:$0xff] %v365_v0  ;;  %368 = vst [vmem:[%s2078_s27 + $0x10] sm:$0xff] %v367_v1  ;;  %v371_v3 = vld [vmem:[%s2082_s29 + $0x20] sm:$0xff]  ;;  %v373_v4 = vld [vmem:[%s2082_s29 + $0x28] sm:$0xff]  ;;  %p492_p2 = scmp.ge.s32.totalorder %s491_s18, %s2272_s28  ;;  %p356_p3 = scmp.ge.s32.totalorder %s357_s11, %s2272_s28 }
  0x42   : >> { %370 = vst [vmem:[%s2078_s27 + $0x18] sm:$0xff] %v369_v2  ;;  %v375_v5 = vld [vmem:[%s2082_s29 + $0x30] sm:$0xff]  ;;  %372 = vst [vmem:[%s2078_s27 + $0x20] sm:$0xff] %v371_v3  ;;  %v377_v6 = vld [vmem:[%s2082_s29 + $0x38] sm:$0xff] }
  0x43   : >> { %374 = vst [vmem:[%s2078_s27 + $0x28] sm:$0xff] %v373_v4  ;;  %376 = vst [vmem:[%s2078_s27 + $0x30] sm:$0xff] %v375_v5  ;;  %v379_v7 = vld [vmem:[%s2082_s29 + $0x40] sm:$0xff]  ;;  %v381_v8 = vld [vmem:[%s2082_s29 + $0x48] sm:$0xff]  ;;  %s3012_s18 = smov (%p492_p2, %s491_s18), 0 }
  0x44   : >> { %378 = vst [vmem:[%s2078_s27 + $0x38] sm:$0xff] %v377_v6  ;;  %380 = vst [vmem:[%s2078_s27 + $0x40] sm:$0xff] %v379_v7  ;;  %v383_v9 = vld [vmem:[%s2082_s29 + $0x50] sm:$0xff]  ;;  %v385_v10 = vld [vmem:[%s2082_s29 + $0x58] sm:$0xff]  ;;  %s1609_s30 = sshll.u32 %s3012_s18, 8 }
  0x45   : >> { %382 = vst [vmem:[%s2078_s27 + $0x48] sm:$0xff] %v381_v8  ;;  %v387_v11 = vld [vmem:[%s2082_s29 + $0x60] sm:$0xff]  ;;  %384 = vst [vmem:[%s2078_s27 + $0x50] sm:$0xff] %v383_v9  ;;  %v389_v12 = vld [vmem:[%s2082_s29 + $0x68] sm:$0xff]  ;;  %s2354_s26 = scalar_lea.vmem %s2257_s12, %s1609_s30   ;;  %s2357_s0 = scalar_lea.vmem %s2261_s21, %s1609_s30 [#allocation2]  }
  0x46   : >> { %386 = vst [vmem:[%s2078_s27 + $0x58] sm:$0xff] %v385_v10  ;;  %388 = vst [vmem:[%s2078_s27 + $0x60] sm:$0xff] %v387_v11  ;;  %v391_v13 = vld [vmem:[%s2082_s29 + $0x70] sm:$0xff]  ;;  %v393_v14 = vld [vmem:[%s2082_s29 + $0x78] sm:$0xff]  ;;  %s2991_s30 = smov %s3012_s18 }
  0x47   : >> { %390 = vst [vmem:[%s2078_s27 + $0x68] sm:$0xff] %v389_v12  ;;  %392 = vst [vmem:[%s2078_s27 + $0x70] sm:$0xff] %v391_v13  ;;  %v395_v15 = vld [vmem:[%s2082_s29 + $0x80] sm:$0xff]  ;;  %v397_v16 = vld [vmem:[%s2082_s29 + $0x88] sm:$0xff] }
  0x48   : >> { %394 = vst [vmem:[%s2078_s27 + $0x78] sm:$0xff] %v393_v14  ;;  %v399_v17 = vld [vmem:[%s2082_s29 + $0x90] sm:$0xff]  ;;  %396 = vst [vmem:[%s2078_s27 + $0x80] sm:$0xff] %v395_v15  ;;  %v401_v18 = vld [vmem:[%s2082_s29 + $0x98] sm:$0xff] }
  0x49   : >> { %398 = vst [vmem:[%s2078_s27 + $0x88] sm:$0xff] %v397_v16  ;;  %400 = vst [vmem:[%s2078_s27 + $0x90] sm:$0xff] %v399_v17  ;;  %v403_v19 = vld [vmem:[%s2082_s29 + $0xa0] sm:$0xff]  ;;  %v405_v20 = vld [vmem:[%s2082_s29 + $0xa8] sm:$0xff] }
  0x4a   : >> { %402 = vst [vmem:[%s2078_s27 + $0x98] sm:$0xff] %v401_v18  ;;  %404 = vst [vmem:[%s2078_s27 + $0xa0] sm:$0xff] %v403_v19  ;;  %v407_v21 = vld [vmem:[%s2082_s29 + $0xb0] sm:$0xff]  ;;  %v409_v22 = vld [vmem:[%s2082_s29 + $0xb8] sm:$0xff] }
  0x4b   : >> { %406 = vst [vmem:[%s2078_s27 + $0xa8] sm:$0xff] %v405_v20  ;;  %v411_v23 = vld [vmem:[%s2082_s29 + $0xc0] sm:$0xff]  ;;  %408 = vst [vmem:[%s2078_s27 + $0xb0] sm:$0xff] %v407_v21  ;;  %v413_v24 = vld [vmem:[%s2082_s29 + $0xc8] sm:$0xff] }
  0x4c   : >> { %410 = vst [vmem:[%s2078_s27 + $0xb8] sm:$0xff] %v409_v22  ;;  %412 = vst [vmem:[%s2078_s27 + $0xc0] sm:$0xff] %v411_v23  ;;  %v415_v25 = vld [vmem:[%s2082_s29 + $0xd0] sm:$0xff]  ;;  %v417_v26 = vld [vmem:[%s2082_s29 + $0xd8] sm:$0xff] }
  0x4d   : >> { %414 = vst [vmem:[%s2078_s27 + $0xc8] sm:$0xff] %v413_v24  ;;  %416 = vst [vmem:[%s2078_s27 + $0xd0] sm:$0xff] %v415_v25  ;;  %v419_v27 = vld [vmem:[%s2082_s29 + $0xe0] sm:$0xff]  ;;  %v421_v28 = vld [vmem:[%s2082_s29 + $0xe8] sm:$0xff] }
  0x4e   : >> { %418 = vst [vmem:[%s2078_s27 + $0xd8] sm:$0xff] %v417_v26  ;;  %v423_v29 = vld [vmem:[%s2082_s29 + $0xf0] sm:$0xff]  ;;  %420 = vst [vmem:[%s2078_s27 + $0xe0] sm:$0xff] %v419_v27  ;;  %v425_v30 = vld [vmem:[%s2082_s29 + $0xf8] sm:$0xff] }
  0x4f   : >> { %422 = vst [vmem:[%s2078_s27 + $0xe8] sm:$0xff] %v421_v28  ;;  %424 = vst [vmem:[%s2078_s27 + $0xf0] sm:$0xff] %v423_v29  ;;  %v363_v31 = vld [vmem:[%s2082_s29] sm:$0xff]  ;;  %v427_v32 = vld [vmem:[%s2082_s29 + $0x14] sm:$0xff] }
  0x50   : >> { %426 = vst [vmem:[%s2078_s27 + $0xf8] sm:$0xff] %v425_v30  ;;  %364 = vst [vmem:[%s2078_s27] sm:$0xff] %v363_v31  ;;  %v429_v33 = vld [vmem:[%s2082_s29 + $0x1c] sm:$0xff]  ;;  %v431_v34 = vld [vmem:[%s2082_s29 + $0x24] sm:$0xff] }
  0x51   : >> { %428 = vst [vmem:[%s2078_s27 + $0xc] sm:$0xff] %v427_v32  ;;  %v433_v35 = vld [vmem:[%s2082_s29 + $0x2c] sm:$0xff]  ;;  %430 = vst [vmem:[%s2078_s27 + $0x14] sm:$0xff] %v429_v33  ;;  %v435_v36 = vld [vmem:[%s2082_s29 + $0x34] sm:$0xff] }
  0x52   : >> { %432 = vst [vmem:[%s2078_s27 + $0x1c] sm:$0xff] %v431_v34  ;;  %434 = vst [vmem:[%s2078_s27 + $0x24] sm:$0xff] %v433_v35  ;;  %v437_v37 = vld [vmem:[%s2082_s29 + $0x3c] sm:$0xff]  ;;  %v439_v38 = vld [vmem:[%s2082_s29 + $0x44] sm:$0xff] }
  0x53   : >> { %436 = vst [vmem:[%s2078_s27 + $0x2c] sm:$0xff] %v435_v36  ;;  %438 = vst [vmem:[%s2078_s27 + $0x34] sm:$0xff] %v437_v37  ;;  %v441_v39 = vld [vmem:[%s2082_s29 + $0x4c] sm:$0xff]  ;;  %v443_v40 = vld [vmem:[%s2082_s29 + $0x54] sm:$0xff] }
  0x54   : >> { %440 = vst [vmem:[%s2078_s27 + $0x3c] sm:$0xff] %v439_v38  ;;  %v445_v41 = vld [vmem:[%s2082_s29 + $0x5c] sm:$0xff]  ;;  %442 = vst [vmem:[%s2078_s27 + $0x44] sm:$0xff] %v441_v39  ;;  %v447_v42 = vld [vmem:[%s2082_s29 + $0x64] sm:$0xff] }
  0x55   : >> { %444 = vst [vmem:[%s2078_s27 + $0x4c] sm:$0xff] %v443_v40  ;;  %446 = vst [vmem:[%s2078_s27 + $0x54] sm:$0xff] %v445_v41  ;;  %v449_v43 = vld [vmem:[%s2082_s29 + $0x6c] sm:$0xff]  ;;  %v451_v44 = vld [vmem:[%s2082_s29 + $0x74] sm:$0xff] }
  0x56   : >> { %448 = vst [vmem:[%s2078_s27 + $0x5c] sm:$0xff] %v447_v42  ;;  %450 = vst [vmem:[%s2078_s27 + $0x64] sm:$0xff] %v449_v43  ;;  %v453_v45 = vld [vmem:[%s2082_s29 + $0x7c] sm:$0xff]  ;;  %v455_v46 = vld [vmem:[%s2082_s29 + $0x84] sm:$0xff] }
  0x57   : >> { %452 = vst [vmem:[%s2078_s27 + $0x6c] sm:$0xff] %v451_v44  ;;  %v457_v47 = vld [vmem:[%s2082_s29 + $0x8c] sm:$0xff]  ;;  %454 = vst [vmem:[%s2078_s27 + $0x74] sm:$0xff] %v453_v45  ;;  %v459_v48 = vld [vmem:[%s2082_s29 + $0x94] sm:$0xff] }
  0x58   : >> { %456 = vst [vmem:[%s2078_s27 + $0x7c] sm:$0xff] %v455_v46  ;;  %458 = vst [vmem:[%s2078_s27 + $0x84] sm:$0xff] %v457_v47  ;;  %v461_v49 = vld [vmem:[%s2082_s29 + $0x9c] sm:$0xff]  ;;  %v463_v50 = vld [vmem:[%s2082_s29 + $0xa4] sm:$0xff] }
  0x59   : >> { %460 = vst [vmem:[%s2078_s27 + $0x8c] sm:$0xff] %v459_v48  ;;  %462 = vst [vmem:[%s2078_s27 + $0x94] sm:$0xff] %v461_v49  ;;  %v465_v51 = vld [vmem:[%s2082_s29 + $0xac] sm:$0xff]  ;;  %v467_v52 = vld [vmem:[%s2082_s29 + $0xb4] sm:$0xff] }
  0x5a   : >> { %464 = vst [vmem:[%s2078_s27 + $0x9c] sm:$0xff] %v463_v50  ;;  %v469_v53 = vld [vmem:[%s2082_s29 + $0xbc] sm:$0xff]  ;;  %466 = vst [vmem:[%s2078_s27 + $0xa4] sm:$0xff] %v465_v51  ;;  %v471_v54 = vld [vmem:[%s2082_s29 + $0xc4] sm:$0xff]  ;;  %359 = sbr.rel (!%p356_p3) target bundleno = 64 (0x40), region = 184 }
  0x5b   : >> { %468 = vst [vmem:[%s2078_s27 + $0xac] sm:$0xff] %v467_v52  ;;  %470 = vst [vmem:[%s2078_s27 + $0xb4] sm:$0xff] %v469_v53  ;;  %v473_v55 = vld [vmem:[%s2082_s29 + $0xcc] sm:$0xff]  ;;  %v475_v56 = vld [vmem:[%s2082_s29 + $0xd4] sm:$0xff] }
  0x5c   : >> { %472 = vst [vmem:[%s2078_s27 + $0xbc] sm:$0xff] %v471_v54  ;;  %474 = vst [vmem:[%s2078_s27 + $0xc4] sm:$0xff] %v473_v55  ;;  %v477_v57 = vld [vmem:[%s2082_s29 + $0xdc] sm:$0xff]  ;;  %v479_v58 = vld [vmem:[%s2082_s29 + $0xe4] sm:$0xff] }
  0x5d   : >> { %476 = vst [vmem:[%s2078_s27 + $0xcc] sm:$0xff] %v475_v56  ;;  %v481_v59 = vld [vmem:[%s2082_s29 + $0xec] sm:$0xff]  ;;  %478 = vst [vmem:[%s2078_s27 + $0xd4] sm:$0xff] %v477_v57  ;;  %v483_v60 = vld [vmem:[%s2082_s29 + $0xf4] sm:$0xff] }
  0x5e   : >> { %480 = vst [vmem:[%s2078_s27 + $0xdc] sm:$0xff] %v479_v58  ;;  %482 = vst [vmem:[%s2078_s27 + $0xe4] sm:$0xff] %v481_v59  ;;  %v485_v61 = vld [vmem:[%s2082_s29 + $0xfc] sm:$0xff]  ;;  %v487_v62 = vld [vmem:[%s2082_s29 + $0x104] sm:$0xff] }
  0x5f   : >> { %484 = vst [vmem:[%s2078_s27 + $0xec] sm:$0xff] %v483_v60  ;;  %486 = vst [vmem:[%s2078_s27 + $0xf4] sm:$0xff] %v485_v61  ;;  %v489_v63 = vld [vmem:[%s2082_s29 + $0x10c] sm:$0xff]  ;;  %s2990_s29 = smov %s2354_s26 }
  0x60   : >> { %488 = vst [vmem:[%s2078_s27 + $0xfc] sm:$0xff] %v487_v62  ;;  %490 = vst [vmem:[%s2078_s27 + $0x104] sm:$0xff] %v489_v63  ;;  %s2989_s27 = smov %s2357_s0 }
  0x61 PF: > { %s2992_s22 = sshrl.u32 %s2259_s20, 3  ;;  %s1685_s19 = sshll.u32 %s2272_s28, 12 }
  0x62   : > { %s2451_s15 = sand.u32 31, %s2992_s22   ;;  %s502_s24 = sshra.s32 %s1685_s19, 4 }
  0x63   : > { %s2455_s13 = scalar_lea.vmem %s2257_s12, %s502_s24   ;;  %s506_s0 = scalar_lea.vmem %s2261_s21, %s502_s24 [#allocation2]  }
  0x64   : > { %p1614_p4 = scmp.le.s32.totalorder %s2451_s15, 0 }
  0x65   : > { %s2092_s26 = smov (!%p1614_p4), %s506_s0   ;;  %s2096_s11 = smov (!%p1614_p4), %s2455_s13  }
  0x66   : > { %1541 = sbr.rel (%p1614_p4) target bundleno = 119 (0x77), region = 189  ;;  %s2100_s18 = smov (!%p1614_p4), 0  }
  0x67   : > { %s2104_s27 = smov (!%p1614_p4), 0  }
  0x6d LB: >> { %v518_v0 = vld [vmem:[%s2098_s11] sm:$0xff]  ;;  %v520_v1 = vld [vmem:[%s2098_s11 + $0x14] sm:$0xff]  ;;  %s522_s19 = sadd.s32 1, %s2102_s18  ;;  %s512_s27 = sadd.s32 1, %s2106_s27   ;;  %s2106_s27 = sphi %s2104_s27, %s512_s27   ;;  %s2102_s18 = sphi %s2100_s18, %s2101_s18   ;;  %s2098_s11 = sphi %s2096_s11, %s527_s11   ;;  %s2094_s26 = sphi %s2092_s26, %s528_s26  }
  0x6e   : >> { %519 = vst [vmem:[%s2094_s26] sm:$0xff] %v518_v0  ;;  %521 = vst [vmem:[%s2094_s26 + $0xc] sm:$0xff] %v520_v1  ;;  %p523_p5 = scmp.ge.s32.totalorder %s522_s19, %s2451_s15  ;;  %p511_p7 = scmp.ge.s32.totalorder %s512_s27, %s2451_s15 }
  0x70   : >> { %s3014_s19 = smov (%p523_p5, %s522_s19), 0  ;;  %514 = sbr.rel (!%p511_p7) target bundleno = 109 (0x6d), region = 195 }
  0x71   : >> { %s1615_s22 = sshll.u32 %s3014_s19, 3  ;;  %s2101_s18 = smov %s3014_s19  }
  0x72   : >> { %s527_s11 = scalar_lea.vmem %s2455_s13, %s1615_s22   ;;  %s528_s26 = scalar_lea.vmem %s506_s0, %s1615_s22 [#allocation2]  }
  0x77 PF: > { %531 = sbr.rel (%p346_p13) target bundleno = 190 (0xbe), region = 97  ;;  %s533_s24 = ssub.s32 (!%p346_p13), %s2259_s20, %s2265_s25 }
  0x78   : > { %s537_s28 = sshrl.u32 (!%p346_p13), %s2259_s20, 3  ;;  %s2469_s29 = scalar_lea.vmem (!%p346_p13), %s2257_s12, %s533_s24 }
  0x79   : > { %s2472_s30 = scalar_lea.vmem (!%p346_p13), %s2261_s21, %s533_s24 [#allocation2]  ;;  %s2476_s26 = sshrl.u32 (!%p346_p13), %s537_s28, 5 }
  0x7a   : > { %p1617_p10 = scmp.le.s32.totalorder (!%p346_p13), %s2476_s26, 0 }
  0x7e   : > { %1555 = sbr.rel (%p1617_p10) target bundleno = 166 (0xa6), region = 200  ;;  %s2993_s13 = smov (!%p1617_p10), %s2261_s21 }
  0x7f   : > { %s2994_s15 = smov (!%p1617_p10), %s2257_s12  ;;  %s2485_s0 = smov (!%p1617_p10), 0  }
  0x80   : > { %s2487_s11 = smov (!%p1617_p10), 0  }
  0x85 LB: >> { %v552_v2 = vld [vmem:[%s2114_s15 + $0x8] sm:$0xff]  ;;  %v554_v3 = vld [vmem:[%s2114_s15 + $0x10] sm:$0xff]  ;;  %v556_v4 = vld [vmem:[%s2114_s15 + $0x18] sm:$0xff]  ;;  %s678_s18 = sadd.s32 1, %s2118_s0  ;;  %s544_s11 = sadd.s32 1, %s2122_s11   ;;  %s2122_s11 = sphi %s2487_s11, %s544_s11   ;;  %s2118_s0 = sphi %s2485_s0, %s2997_s0   ;;  %s2114_s15 = sphi %s2994_s15, %s2996_s15   ;;  %s2110_s13 = sphi %s2993_s13, %s2995_s13  }
  0x86   : >> { %553 = vst [vmem:[%s2110_s13 + $0x8] sm:$0xff] %v552_v2  ;;  %555 = vst [vmem:[%s2110_s13 + $0x10] sm:$0xff] %v554_v3  ;;  %v558_v5 = vld [vmem:[%s2114_s15 + $0x20] sm:$0xff]  ;;  %v560_v6 = vld [vmem:[%s2114_s15 + $0x28] sm:$0xff]  ;;  %p679_p11 = scmp.ge.s32.totalorder %s678_s18, %s2476_s26  ;;  %p543_p12 = scmp.ge.s32.totalorder %s544_s11, %s2476_s26 }
  0x87   : >> { %557 = vst [vmem:[%s2110_s13 + $0x18] sm:$0xff] %v556_v4  ;;  %v562_v7 = vld [vmem:[%s2114_s15 + $0x30] sm:$0xff]  ;;  %559 = vst [vmem:[%s2110_s13 + $0x20] sm:$0xff] %v558_v5  ;;  %v564_v8 = vld [vmem:[%s2114_s15 + $0x38] sm:$0xff] }
  0x88   : >> { %561 = vst [vmem:[%s2110_s13 + $0x28] sm:$0xff] %v560_v6  ;;  %563 = vst [vmem:[%s2110_s13 + $0x30] sm:$0xff] %v562_v7  ;;  %v566_v9 = vld [vmem:[%s2114_s15 + $0x40] sm:$0xff]  ;;  %v568_v10 = vld [vmem:[%s2114_s15 + $0x48] sm:$0xff]  ;;  %s3016_s18 = smov (%p679_p11, %s678_s18), 0 }
  0x89   : >> { %565 = vst [vmem:[%s2110_s13 + $0x38] sm:$0xff] %v564_v8  ;;  %567 = vst [vmem:[%s2110_s13 + $0x40] sm:$0xff] %v566_v9  ;;  %v570_v11 = vld [vmem:[%s2114_s15 + $0x50] sm:$0xff]  ;;  %v572_v12 = vld [vmem:[%s2114_s15 + $0x58] sm:$0xff]  ;;  %s1618_s27 = sshll.u32 %s3016_s18, 8  ;;  %s2997_s0 = smov %s3016_s18 }
  0x8a   : >> { %569 = vst [vmem:[%s2110_s13 + $0x48] sm:$0xff] %v568_v10  ;;  %v574_v13 = vld [vmem:[%s2114_s15 + $0x60] sm:$0xff]  ;;  %571 = vst [vmem:[%s2110_s13 + $0x50] sm:$0xff] %v570_v11  ;;  %v576_v14 = vld [vmem:[%s2114_s15 + $0x68] sm:$0xff]  ;;  %s2558_s19 = scalar_lea.vmem %s2257_s12, %s1618_s27   ;;  %s2561_s22 = scalar_lea.vmem %s2261_s21, %s1618_s27 [#allocation2]  }
  0x8b   : >> { %573 = vst [vmem:[%s2110_s13 + $0x58] sm:$0xff] %v572_v12  ;;  %575 = vst [vmem:[%s2110_s13 + $0x60] sm:$0xff] %v574_v13  ;;  %v578_v15 = vld [vmem:[%s2114_s15 + $0x70] sm:$0xff]  ;;  %v580_v16 = vld [vmem:[%s2114_s15 + $0x78] sm:$0xff] }
  0x8c   : >> { %577 = vst [vmem:[%s2110_s13 + $0x68] sm:$0xff] %v576_v14  ;;  %579 = vst [vmem:[%s2110_s13 + $0x70] sm:$0xff] %v578_v15  ;;  %v582_v17 = vld [vmem:[%s2114_s15 + $0x80] sm:$0xff]  ;;  %v584_v18 = vld [vmem:[%s2114_s15 + $0x88] sm:$0xff] }
  0x8d   : >> { %581 = vst [vmem:[%s2110_s13 + $0x78] sm:$0xff] %v580_v16  ;;  %v586_v19 = vld [vmem:[%s2114_s15 + $0x90] sm:$0xff]  ;;  %583 = vst [vmem:[%s2110_s13 + $0x80] sm:$0xff] %v582_v17  ;;  %v588_v20 = vld [vmem:[%s2114_s15 + $0x98] sm:$0xff] }
  0x8e   : >> { %585 = vst [vmem:[%s2110_s13 + $0x88] sm:$0xff] %v584_v18  ;;  %587 = vst [vmem:[%s2110_s13 + $0x90] sm:$0xff] %v586_v19  ;;  %v590_v21 = vld [vmem:[%s2114_s15 + $0xa0] sm:$0xff]  ;;  %v592_v22 = vld [vmem:[%s2114_s15 + $0xa8] sm:$0xff] }
  0x8f   : >> { %589 = vst [vmem:[%s2110_s13 + $0x98] sm:$0xff] %v588_v20  ;;  %591 = vst [vmem:[%s2110_s13 + $0xa0] sm:$0xff] %v590_v21  ;;  %v594_v23 = vld [vmem:[%s2114_s15 + $0xb0] sm:$0xff]  ;;  %v596_v24 = vld [vmem:[%s2114_s15 + $0xb8] sm:$0xff] }
  0x90   : >> { %593 = vst [vmem:[%s2110_s13 + $0xa8] sm:$0xff] %v592_v22  ;;  %v598_v25 = vld [vmem:[%s2114_s15 + $0xc0] sm:$0xff]  ;;  %595 = vst [vmem:[%s2110_s13 + $0xb0] sm:$0xff] %v594_v23  ;;  %v600_v26 = vld [vmem:[%s2114_s15 + $0xc8] sm:$0xff] }
  0x91   : >> { %597 = vst [vmem:[%s2110_s13 + $0xb8] sm:$0xff] %v596_v24  ;;  %599 = vst [vmem:[%s2110_s13 + $0xc0] sm:$0xff] %v598_v25  ;;  %v602_v27 = vld [vmem:[%s2114_s15 + $0xd0] sm:$0xff]  ;;  %v604_v28 = vld [vmem:[%s2114_s15 + $0xd8] sm:$0xff] }
  0x92   : >> { %601 = vst [vmem:[%s2110_s13 + $0xc8] sm:$0xff] %v600_v26  ;;  %603 = vst [vmem:[%s2110_s13 + $0xd0] sm:$0xff] %v602_v27  ;;  %v606_v29 = vld [vmem:[%s2114_s15 + $0xe0] sm:$0xff]  ;;  %v608_v30 = vld [vmem:[%s2114_s15 + $0xe8] sm:$0xff] }
  0x93   : >> { %605 = vst [vmem:[%s2110_s13 + $0xd8] sm:$0xff] %v604_v28  ;;  %v610_v31 = vld [vmem:[%s2114_s15 + $0xf0] sm:$0xff]  ;;  %607 = vst [vmem:[%s2110_s13 + $0xe0] sm:$0xff] %v606_v29  ;;  %v612_v32 = vld [vmem:[%s2114_s15 + $0xf8] sm:$0xff] }
  0x94   : >> { %609 = vst [vmem:[%s2110_s13 + $0xe8] sm:$0xff] %v608_v30  ;;  %611 = vst [vmem:[%s2110_s13 + $0xf0] sm:$0xff] %v610_v31  ;;  %v550_v33 = vld [vmem:[%s2114_s15] sm:$0xff]  ;;  %v614_v34 = vld [vmem:[%s2114_s15 + $0x14] sm:$0xff] }
  0x95   : >> { %613 = vst [vmem:[%s2110_s13 + $0xf8] sm:$0xff] %v612_v32  ;;  %551 = vst [vmem:[%s2110_s13] sm:$0xff] %v550_v33  ;;  %v616_v35 = vld [vmem:[%s2114_s15 + $0x1c] sm:$0xff]  ;;  %v618_v36 = vld [vmem:[%s2114_s15 + $0x24] sm:$0xff] }
  0x96   : >> { %615 = vst [vmem:[%s2110_s13 + $0xc] sm:$0xff] %v614_v34  ;;  %v620_v37 = vld [vmem:[%s2114_s15 + $0x2c] sm:$0xff]  ;;  %617 = vst [vmem:[%s2110_s13 + $0x14] sm:$0xff] %v616_v35  ;;  %v622_v38 = vld [vmem:[%s2114_s15 + $0x34] sm:$0xff] }
  0x97   : >> { %619 = vst [vmem:[%s2110_s13 + $0x1c] sm:$0xff] %v618_v36  ;;  %621 = vst [vmem:[%s2110_s13 + $0x24] sm:$0xff] %v620_v37  ;;  %v624_v39 = vld [vmem:[%s2114_s15 + $0x3c] sm:$0xff]  ;;  %v626_v40 = vld [vmem:[%s2114_s15 + $0x44] sm:$0xff] }
  0x98   : >> { %623 = vst [vmem:[%s2110_s13 + $0x2c] sm:$0xff] %v622_v38  ;;  %625 = vst [vmem:[%s2110_s13 + $0x34] sm:$0xff] %v624_v39  ;;  %v628_v41 = vld [vmem:[%s2114_s15 + $0x4c] sm:$0xff]  ;;  %v630_v42 = vld [vmem:[%s2114_s15 + $0x54] sm:$0xff] }
  0x99   : >> { %627 = vst [vmem:[%s2110_s13 + $0x3c] sm:$0xff] %v626_v40  ;;  %v632_v43 = vld [vmem:[%s2114_s15 + $0x5c] sm:$0xff]  ;;  %629 = vst [vmem:[%s2110_s13 + $0x44] sm:$0xff] %v628_v41  ;;  %v634_v44 = vld [vmem:[%s2114_s15 + $0x64] sm:$0xff] }
  0x9a   : >> { %631 = vst [vmem:[%s2110_s13 + $0x4c] sm:$0xff] %v630_v42  ;;  %633 = vst [vmem:[%s2110_s13 + $0x54] sm:$0xff] %v632_v43  ;;  %v636_v45 = vld [vmem:[%s2114_s15 + $0x6c] sm:$0xff]  ;;  %v638_v46 = vld [vmem:[%s2114_s15 + $0x74] sm:$0xff] }
  0x9b   : >> { %635 = vst [vmem:[%s2110_s13 + $0x5c] sm:$0xff] %v634_v44  ;;  %637 = vst [vmem:[%s2110_s13 + $0x64] sm:$0xff] %v636_v45  ;;  %v640_v47 = vld [vmem:[%s2114_s15 + $0x7c] sm:$0xff]  ;;  %v642_v48 = vld [vmem:[%s2114_s15 + $0x84] sm:$0xff] }
  0x9c   : >> { %639 = vst [vmem:[%s2110_s13 + $0x6c] sm:$0xff] %v638_v46  ;;  %v644_v49 = vld [vmem:[%s2114_s15 + $0x8c] sm:$0xff]  ;;  %641 = vst [vmem:[%s2110_s13 + $0x74] sm:$0xff] %v640_v47  ;;  %v646_v50 = vld [vmem:[%s2114_s15 + $0x94] sm:$0xff] }
  0x9d   : >> { %643 = vst [vmem:[%s2110_s13 + $0x7c] sm:$0xff] %v642_v48  ;;  %645 = vst [vmem:[%s2110_s13 + $0x84] sm:$0xff] %v644_v49  ;;  %v648_v51 = vld [vmem:[%s2114_s15 + $0x9c] sm:$0xff]  ;;  %v650_v52 = vld [vmem:[%s2114_s15 + $0xa4] sm:$0xff] }
  0x9e   : >> { %647 = vst [vmem:[%s2110_s13 + $0x8c] sm:$0xff] %v646_v50  ;;  %649 = vst [vmem:[%s2110_s13 + $0x94] sm:$0xff] %v648_v51  ;;  %v652_v53 = vld [vmem:[%s2114_s15 + $0xac] sm:$0xff]  ;;  %v654_v54 = vld [vmem:[%s2114_s15 + $0xb4] sm:$0xff] }
  0x9f   : >> { %651 = vst [vmem:[%s2110_s13 + $0x9c] sm:$0xff] %v650_v52  ;;  %v656_v55 = vld [vmem:[%s2114_s15 + $0xbc] sm:$0xff]  ;;  %653 = vst [vmem:[%s2110_s13 + $0xa4] sm:$0xff] %v652_v53  ;;  %v658_v56 = vld [vmem:[%s2114_s15 + $0xc4] sm:$0xff]  ;;  %546 = sbr.rel (!%p543_p12) target bundleno = 133 (0x85), region = 206 }
  0xa0   : >> { %655 = vst [vmem:[%s2110_s13 + $0xac] sm:$0xff] %v654_v54  ;;  %657 = vst [vmem:[%s2110_s13 + $0xb4] sm:$0xff] %v656_v55  ;;  %v660_v57 = vld [vmem:[%s2114_s15 + $0xcc] sm:$0xff]  ;;  %v662_v58 = vld [vmem:[%s2114_s15 + $0xd4] sm:$0xff] }
  0xa1   : >> { %659 = vst [vmem:[%s2110_s13 + $0xbc] sm:$0xff] %v658_v56  ;;  %661 = vst [vmem:[%s2110_s13 + $0xc4] sm:$0xff] %v660_v57  ;;  %v664_v59 = vld [vmem:[%s2114_s15 + $0xdc] sm:$0xff]  ;;  %v666_v60 = vld [vmem:[%s2114_s15 + $0xe4] sm:$0xff] }
  0xa2   : >> { %663 = vst [vmem:[%s2110_s13 + $0xcc] sm:$0xff] %v662_v58  ;;  %v668_v61 = vld [vmem:[%s2114_s15 + $0xec] sm:$0xff]  ;;  %665 = vst [vmem:[%s2110_s13 + $0xd4] sm:$0xff] %v664_v59  ;;  %v670_v62 = vld [vmem:[%s2114_s15 + $0xf4] sm:$0xff] }
  0xa3   : >> { %667 = vst [vmem:[%s2110_s13 + $0xdc] sm:$0xff] %v666_v60  ;;  %669 = vst [vmem:[%s2110_s13 + $0xe4] sm:$0xff] %v668_v61  ;;  %v672_v63 = vld [vmem:[%s2114_s15 + $0xfc] sm:$0xff]  ;;  %v674_v0 = vld [vmem:[%s2114_s15 + $0x104] sm:$0xff] }
  0xa4   : >> { %671 = vst [vmem:[%s2110_s13 + $0xec] sm:$0xff] %v670_v62  ;;  %673 = vst [vmem:[%s2110_s13 + $0xf4] sm:$0xff] %v672_v63  ;;  %v676_v1 = vld [vmem:[%s2114_s15 + $0x10c] sm:$0xff]  ;;  %s2996_s15 = smov %s2558_s19 }
  0xa5   : >> { %675 = vst [vmem:[%s2110_s13 + $0xfc] sm:$0xff] %v674_v0  ;;  %677 = vst [vmem:[%s2110_s13 + $0x104] sm:$0xff] %v676_v1  ;;  %s2995_s13 = smov %s2561_s22 }
  0xa6 PF: > { %s2655_s24 = sand.u32 31, %s537_s28   ;;  %s1687_s27 = sshll.u32 %s2476_s26, 12 }
  0xa7   : > { %s689_s10 = sshra.s32 %s1687_s27, 4  ;;  %p1623_p13 = scmp.le.s32.totalorder %s2655_s24, 0 }
  0xa8   : > { %s2659_s17 = scalar_lea.vmem %s2257_s12, %s689_s10   ;;  %s693_s22 = scalar_lea.vmem %s2261_s21, %s689_s10 [#allocation2]  }
  0xa9   : > { %1569 = sbr.rel (%p1623_p13) target bundleno = 186 (0xba), region = 211  ;;  %s2124_s18 = smov (!%p1623_p13), %s693_s22  }
  0xaa   : > { %s2128_s11 = smov (!%p1623_p13), %s2659_s17   ;;  %s2132_s19 = smov (!%p1623_p13), 0  }
  0xab   : > { %s2136_s13 = smov (!%p1623_p13), 0  }
  0xb0 LB: >> { %v705_v2 = vld [vmem:[%s2130_s11] sm:$0xff]  ;;  %v707_v3 = vld [vmem:[%s2130_s11 + $0x14] sm:$0xff]  ;;  %s709_s28 = sadd.s32 1, %s2134_s19  ;;  %s699_s13 = sadd.s32 1, %s2138_s13   ;;  %s2138_s13 = sphi %s2136_s13, %s699_s13   ;;  %s2134_s19 = sphi %s2132_s19, %s2133_s19   ;;  %s2130_s11 = sphi %s2128_s11, %s714_s11   ;;  %s2126_s18 = sphi %s2124_s18, %s715_s18  }
  0xb1   : >> { %706 = vst [vmem:[%s2126_s18] sm:$0xff] %v705_v2  ;;  %708 = vst [vmem:[%s2126_s18 + $0xc] sm:$0xff] %v707_v3  ;;  %p710_p0 = scmp.ge.s32.totalorder %s709_s28, %s2655_s24  ;;  %p698_p1 = scmp.ge.s32.totalorder %s699_s13, %s2655_s24 }
  0xb3   : >> { %s3018_s28 = smov (%p710_p0, %s709_s28), 0  ;;  %701 = sbr.rel (!%p698_p1) target bundleno = 176 (0xb0), region = 217 }
  0xb4   : >> { %s1624_s10 = sshll.u32 %s3018_s28, 3  ;;  %s2133_s19 = smov %s3018_s28  }
  0xb5   : >> { %s714_s11 = scalar_lea.vmem %s2659_s17, %s1624_s10   ;;  %s715_s18 = scalar_lea.vmem %s693_s22, %s1624_s10 [#allocation2]  }
  0xba PF: > { %s2140_s26 = smov 0  }
  0xbb   : > { %s716_s15 = sshllo.u32 %s2140_s26, %s2265_s25 }
  0xbc   : > { %v725_v4 = vld [vmem:[%s2469_s29] sm:%s716_s15]  ;;  %v727_v5 = vld [vmem:[%s2469_s29 + $0x14] sm:%s716_s15] }
  0xbd   : > { %726 = vst [vmem:[%s2472_s30] sm:%s716_s15] %v725_v4  ;;  %728 = vst [vmem:[%s2472_s30 + $0xc] sm:%s716_s15] %v727_v5 }
  0xbe PF: > { %p1626_p2 = scmp.ge.u32.totalorder %s2259_s20, 8 }
  0xbf   : > { %s2141_s0 = smov (!%p1626_p2), 0  }
  0xc0   : > { %331 = sbr.rel (%p1626_p2) target bundleno = 199 (0xc7), region = 68  ;;  %s332_s17 = sshllo.u32 (!%p1626_p2), %s2141_s0, %s2259_s20 }
  0xc1   : > { %v341_v6 = vld [vmem:[%s2257_s12] sm:%s332_s17] (!%p1626_p2)  ;;  %v343_v7 = vld [vmem:[%s2257_s12 + $0x14] sm:%s332_s17] (!%p1626_p2) }
  0xc2   : > { %342 = vst [vmem:[%s2261_s21] sm:%s332_s17] (!%p1626_p2), %v341_v6  ;;  %344 = vst [vmem:[%s2261_s21 + $0xc] sm:%s332_s17] (!%p1626_p2), %v343_v7 }
  0xc7 PF: > { %p1627_p3 = scmp.ge.s32.totalorder %s2074_s16, 1  ;;  %p731_p4 = scmp.lt.s32.totalorder %s2074_s16, 3 }
  0xc9   : > { %p732_p5 = pnand %p1627_p3, %p731_p4 }
  0xca   : > { %s2681_s25 = sand.u32 (!%p732_p5), 1, %s2066_s14   ;;  %v2142_v8 = vmov (!%p732_p5), 0   ;;  %v1908_v9 = vld [vmem:[%s2957_s1] sm:$0xff] (!%p732_p5)   ;;  %vm844_vm0 = vcmask (!%p732_p5), 130048   ;;  %v954_v12 = vld [vmem:[%s2959_s3 + $0x8] sm:$0xff] (!%p732_p5)  ;;  %v796_v20 = vld [vmem:[%s2958_s2 + $0x10] sm:$0xff] (!%p732_p5) }
  0xcb   : > { %735 = sbr.rel (%p732_p5) target bundleno = 966 (0x3c6), region = 122  ;;  %883 = vmatprep.mubr.bf16.mxu0 (!%p732_p5), %v2142_v8  ;;  %1902 = vset.pattern.permute.xlu0 (!%p732_p5), %v2142_v8  ;;  %v794_v10 = vld [vmem:[%s2958_s2] sm:$0xff] (!%p732_p5)  ;;  %v795_v17 = vld [vmem:[%s2958_s2 + $0x8] sm:$0xff] (!%p732_p5)  ;;  %vm970_vm2 = vcmp.eq.f32.partialorder (!%p732_p5), %v954_v12, 1.0  ;;  %v955_v21 = vld [vmem:[%s2959_s3 + $0x10] sm:$0xff] (!%p732_p5)  ;;  %vm1006_vm4 = vcmp.eq.f32.partialorder (!%p732_p5), %v954_v12, -1.0 }
  0xcc   : > { %s1729_s29 = smul.u32 (!%p732_p5), 24, %s2681_s25  ;;  %1903 = vset.pattern.permute.xlu1 (!%p732_p5), %v2142_v8  ;;  %1708 = vmatprep.mubr.msk.bf16.mxu1 (!%p732_p5), %vm844_vm0, %v1908_v9  ;;  %v953_v11 = vld [vmem:[%s2959_s3] sm:$0xff] (!%p732_p5)  ;;  %v1909_v18 = vld [vmem:[%s2957_s1 + $0x8] sm:$0xff] (!%p732_p5)   ;;  %v974_v19 = vsel (!%p732_p5), %vm970_vm2, 1, %v2142_v8  ;;  %v797_v22 = vld [vmem:[%s2958_s2 + $0x18] sm:$0xff] (!%p732_p5)  ;;  %vm971_vm5 = vcmp.eq.f32.partialorder (!%p732_p5), %v955_v21, 1.0 }
  0xcd   : > { %800 = vperm.xlu0 (!%p732_p5), %1902, %v794_v10   ;;  %vm969_vm1 = vcmp.eq.f32.partialorder (!%p732_p5), %v953_v11, 1.0  ;;  %vm1005_vm3 = vcmp.eq.f32.partialorder (!%p732_p5), %v953_v11, -1.0  ;;  %v956_v24 = vld [vmem:[%s2959_s3 + $0x18] sm:$0xff] (!%p732_p5)  ;;  %v1010_v25 = vsel (!%p732_p5), %vm1006_vm4, 1, %v2142_v8  ;;  %v975_v26 = vsel (!%p732_p5), %vm971_vm5, 1, %v2142_v8  ;;  %v1051_v30 = vld [vmem:[%s2961_s5] sm:$0xff] (!%p732_p5) }
  0xce   : > { %s740_s11 = scalar_lea.vmem (!%p732_p5), [#allocation2], %s1729_s29  ;;  %v973_v16 = vsel (!%p732_p5), %vm969_vm1, 1, %v2142_v8  ;;  %v1009_v23 = vsel (!%p732_p5), %vm1005_vm3, 1, %v2142_v8  ;;  %vm972_vm6 = vcmp.eq.f32.partialorder (!%p732_p5), %v956_v24, 1.0  ;;  %vm1007_vm7 = vcmp.eq.f32.partialorder (!%p732_p5), %v955_v21, -1.0  ;;  %v1206_v31 = vld [vmem:[%s2962_s6] sm:$0xff] (!%p732_p5) }
  0xcf   : > { %v1904_v13 = vld [vmem:[%s740_s11 + $0x4] ss:$12 sps:$4 sm:$0xff] (!%p732_p5)   ;;  %v1906_v14 = vld [vmem:[%s740_s11 + $0x8] ss:$12 sps:$4 sm:$0xff] (!%p732_p5)   ;;  %v1907_v15 = vld [vmem:[%s740_s11] ss:$12 sps:$4 sm:$0xff] (!%p732_p5)   ;;  %978 = vperm.xlu1 (!%p732_p5), %1903, %v973_v16  }
  0xd0   : > { %851 = vmatprep.subr.bf16.mxu0 (!%p732_p5), %v1904_v13  ;;  %1706 = vmatprep.subr.bf16.mxu1 (!%p732_p5), %v1906_v14  ;;  %v976_v27 = vsel (!%p732_p5), %vm972_vm6, 1, %v2142_v8  ;;  %v1011_v28 = vsel (!%p732_p5), %vm1007_vm7, 1, %v2142_v8  ;;  %vm1008_vm8 = vcmp.eq.f32.partialorder (!%p732_p5), %v956_v24, -1.0  ;;  %v1052_v32 = vld [vmem:[%s2961_s5 + $0x8] sm:$0xff] (!%p732_p5)  ;;  %v1053_v33 = vld [vmem:[%s2961_s5 + $0x10] sm:$0xff] (!%p732_p5)  ;;  %vm1210_vm9 = vcmp.eq.f32.partialorder (!%p732_p5), %v1206_v31, 1.0 }
  0xd1   : > { %852 = vmatpush1.bf16.msra.mxu0 (!%p732_p5), %v1907_v15  ;;  %1707 = vmatpush3.bf16.msra.mxu1 (!%p732_p5), %v1906_v14  ;;  %v1012_v29 = vsel (!%p732_p5), %vm1008_vm8, 1, %v2142_v8  ;;  %v1207_v34 = vld [vmem:[%s2962_s6 + $0x8] sm:$0xff] (!%p732_p5)  ;;  %v1054_v35 = vld [vmem:[%s2961_s5 + $0x18] sm:$0xff] (!%p732_p5)  ;;  %v1214_v36 = vsel (!%p732_p5), %vm1210_vm9, 1, %v2142_v8  ;;  %vm1246_vm11 = vcmp.eq.f32.partialorder (!%p732_p5), %v1206_v31, -1.0  ;;  %v1208_v37 = vld [vmem:[%s2962_s6 + $0x10] sm:$0xff] (!%p732_p5) }
  0xd2   : > { %805 = vperm.xlu0 %1902, %v795_v17   ;;  %vm1211_vm10 = vcmp.eq.f32.partialorder %v1207_v34, 1.0  ;;  %v1250_v39 = vsel %vm1246_vm11, 1, %v2142_v8  ;;  %vm1247_vm12 = vcmp.eq.f32.partialorder %v1207_v34, -1.0  ;;  %vm1212_vm13 = vcmp.eq.f32.partialorder %v1208_v37, 1.0  ;;  %v1209_v40 = vld [vmem:[%s2962_s6 + $0x18] sm:$0xff]  ;;  %v1379_v45 = vld [vmem:[%s2965_s9] sm:$0xff] }
  0xd3   : > { %981 = vperm.xlu1 %1903, %v974_v19   ;;  %v1215_v38 = vsel %vm1211_vm10, 1, %v2142_v8  ;;  %v1251_v41 = vsel %vm1247_vm12, 1, %v2142_v8  ;;  %v1216_v42 = vsel %vm1212_vm13, 1, %v2142_v8  ;;  %vm1213_vm14 = vcmp.eq.f32.partialorder %v1209_v40, 1.0  ;;  %v1289_v47 = vld [vmem:[%s2964_s8] sm:$0xff]  ;;  %s1730_s28 = smul.u32 12, %s2681_s25 }
  0xd4   : > { %1633 = vmatmul.mubr.msk.bf16.vlgmr.msra.gmra.mrb[0].mxu0 %vm844_vm0, %v1908_v9  ;;  %1709 = vmatmul.mubr.msk.bf16.vlgmr.msra.gmra.mrb[0].mxu1 %vm844_vm0, %v1909_v18  ;;  %vm1248_vm15 = vcmp.eq.f32.partialorder %v1208_v37, -1.0  ;;  %v1217_v43 = vsel %vm1213_vm14, 1, %v2142_v8  ;;  %vm1398_vm1 = vcmp.eq.f32.partialorder %v1379_v45, 1.0  ;;  %vm1407_vm2 = vcmp.eq.f32.partialorder %v1379_v45, -1.0  ;;  %v2774_v50 = vld [vmem:[%s2960_s4] sm:$0xff]   ;;  %s1432_s26 = scalar_lea.sflag [#allocation4], %s2681_s25 }
  0xd5   : > { %893 = vmatprep.mubr.bf16.mxu0 %v2142_v8  ;;  %1124 = vmatprep.mubr.bf16.mxu1 %v2142_v8  ;;  %v1252_v44 = vsel %vm1248_vm15, 1, %v2142_v8  ;;  %v1399_v48 = vsel %vm1398_vm1, 1, %v2142_v8  ;;  %v1408_v49 = vsel %vm1407_vm2, 1, %v2142_v8  ;;  %vm1085_vm3 = vcmask 261120   ;;  %s774_s10 = scalar_lea.vmem [#allocation3], %s1730_s28  ;;  %s3000_s15 = sld [smem:[#allocation8_spill]] (%p2240_p6) }
  0xd6   : > { %810 = vperm.xlu0 %1902, %v796_v20   ;;  %vm2144_vm14 = vmmov 0  }
  0xd7   : > { %815 = vperm.xlu1 %1903, %v797_v22  }
  0xda   : > { %1014 = vperm.xlu0 %1902, %v1009_v23  }
  0xdb   : > { %1017 = vperm.xlu1 %1903, %v1010_v25   ;;  %s1439_s0 = smul.u32 (%p2240_p6), 3, %s3000_s15 }
  0xdc   : > { %1634 = vmatmul.mubr.msk.bf16.gmra.mrb[4].mxu0 %vm844_vm0, %v1909_v18  ;;  %vm1249_vm0 = vcmp.eq.f32.partialorder %v1209_v40, -1.0 }
  0xdd   : > { %v1253_v46 = vsel %vm1249_vm0, 1, %v2142_v8  ;;  %1716 = vmatprep.mubr.msk.bf16.mxu0 %vm1085_vm3, %v2774_v50  ;;  %s1440_s17 = ssub.s32 (%p2240_p6), 5, %s1439_s0 }
  0xde   : > { %984 = vperm.xlu0 %1902, %v975_v26   ;;  %p1441_p7 = scmp.lt.s32.totalorder (%p2240_p6), %s1440_s17, 3 }
  0xdf   : > { %987 = vperm.xlu1 %1903, %v976_v27  }
  0xe2   : > { %1020 = vperm.xlu0 %1902, %v1011_v28  }
  0xe3   : > { %1023 = vperm.xlu1 %1903, %v1012_v29  }
  0xe6   : > { %1057 = vperm.xlu0 %1902, %v1051_v30  }
  0xe7   : > { %1062 = vperm.xlu1 %1903, %v1052_v32  }
  0xea   : > { %1067 = vperm.xlu0 %1902, %v1053_v33  }
  0xeb   : > { %1072 = vperm.xlu1 %1903, %v1054_v35  }
  0xee   : > { %1219 = vperm.xlu0 %1902, %v1214_v36  }
  0xef   : > { %1222 = vperm.xlu1 %1903, %v1215_v38  }
  0xf2   : > { %1255 = vperm.xlu0 %1902, %v1250_v39  }
  0xf3   : > { %1258 = vperm.xlu1 %1903, %v1251_v41  }
  0xf6   : > { %1225 = vperm.xlu0 %1902, %v1216_v42  }
  0xf7   : > { %1228 = vperm.xlu1 %1903, %v1217_v43  }
  0xfa   : > { %1261 = vperm.xlu0 %1902, %v1252_v44  }
  0xfb   : > { %1264 = vperm.xlu1 %1903, %v1253_v46  }
  0xfe   : > { %1292 = vperm.xlu0 %1902, %v1289_v47  }
  0xff   : > { %1401 = vperm.xlu1 %1903, %v1399_v48  }
 0x102   : > { %1410 = vperm.xlu0 %1902, %v1408_v49  }
 0x14c   : > { %v801_v51 = vpop.permute.xlu0 %800 }
 0x14e   : > { %v979_v52 = vpop.permute.xlu1 %978 }
 0x14f   : > { %vm989_vm4 = vcmp.eq.s32.totalorder %v979_v52, 1  ;;  %v1911_v52 = vld [vmem:[%s2960_s4 + $0x8] sm:$0xff]  }
 0x151   : > { %v806_v53 = vpop.permute.xlu0 %805 }
 0x152   : > { %v982_v54 = vpop.permute.xlu1 %981 }
 0x153   : > { %vm990_vm5 = vcmp.eq.s32.totalorder %v982_v54, 1 }
 0x155   : > { %v811_v55 = vpop.permute.xlu0 %810 }
 0x156   : > { %v2778_v56 = vpop.permute.xlu1 %815 }
 0x159   : > { %v1015_v57 = vpop.permute.xlu0 %1014 }
 0x15a   : > { %v1018_v58 = vpop.permute.xlu1 %1017  ;;  %vm1693_vm6 = vcmp.ne.s32.totalorder %v1015_v57, 1  ;;  %v2143_v57 = vmov 0.0  }
 0x15b   : > { %vm1692_vm7 = vcmp.ne.s32.totalorder %v1018_v58, 1 }
 0x15c   : > { %vm1641_vm12 = vmpackc.low %vm1692_vm7, %vm1693_vm6 }
 0x15d   : > { %v2780_v59 = vpop.permute.xlu0 %984 }
 0x15e   : > { %v2782_v60 = vpop.permute.xlu1 %987  ;;  %vm991_vm8 = vcmp.eq.s32.totalorder %v2780_v59, 1 }
 0x15f   : > { %vm992_vm9 = vcmp.eq.s32.totalorder %v2782_v60, 1 }
 0x161   : > { %v1021_v14 = vpop.permute.xlu0 %1020 }
 0x162   : > { %vm1695_vm10 = vcmp.ne.s32.totalorder %v1021_v14, 1  ;;  %v1024_v29 = vpop.permute.xlu1 %1023 }
 0x163   : > { %vm1694_vm11 = vcmp.ne.s32.totalorder %v1024_v29, 1 }
 0x164   : > { %vm2801_vm13 = vmpackc.low %vm1694_vm11, %vm1695_vm10 }
 0x165   : > { %v1058_v58 = vpop.permute.xlu0 %1057 }
 0x166   : > { %v1063_v59 = vpop.permute.xlu1 %1062 }
 0x169   : > { %v1068_v60 = vpop.permute.xlu0 %1067 }
 0x1a7   : > { %v885_v61 = vpop.f32.mrb[0].mxu0  ;;  %v1710_v62 = vpop.f32.mrb[0].mxu1 }
 0x1a8   : > { %v886_v63 = vadd.f32 %v885_v61, %v801_v51  ;;  %v947_v0 = vadd.f32 %v1710_v62, %v811_v55  ;;  %v887_v1 = vpop.f32.mrb[1].mxu0  ;;  %v938_v2 = vpop.f32.mrb[1].mxu1 }
 0x1a9   : > { %v888_v3 = vadd.f32 %v887_v1, %v801_v51  ;;  %v939_v4 = vadd.f32 %v938_v2, %v801_v51  ;;  %v889_v5 = vpop.f32.mrb[2].mxu0  ;;  %v1711_v6 = vpop.f32.mrb[2].mxu1 }
 0x1aa   : > { %v957_v7 = vmax.f32 %v886_v63, 0.0  ;;  %v965_v9 = vmax.f32 %v947_v0, 0.0  ;;  %v890_v10 = vadd.f32 %v889_v5, %v806_v53  ;;  %v950_v11 = vadd.f32 %v1711_v6, %v2778_v56  ;;  %v891_v12 = vpop.f32.mrb[3].mxu0  ;;  %v941_v13 = vpop.f32.mrb[3].mxu1 }
 0x1ab   : > { %v958_v15 = vmax.f32 %v888_v3, 0.0  ;;  %v959_v16 = vmax.f32 %v939_v4, 0.0  ;;  %v892_v17 = vadd.f32 %v891_v12, %v806_v53  ;;  %v942_v18 = vadd.f32 %v941_v13, %v806_v53  ;;  %v1073_v61 = vpop.permute.xlu1 %1072  ;;  %v2833_v62 = vpop.permute.xlu0 %1219 }
 0x1ac   : > { %v960_v19 = vmax.f32 %v890_v10, 0.0  ;;  %v968_v20 = vmax.f32 %v950_v11, 0.0  ;;  %v993_v21 = vsel %vm989_vm4, %v886_v63, %v957_v7  ;;  %v1001_v22 = vsel %vm991_vm8, %v947_v0, %v965_v9 }
 0x1ad   : > { %v961_v23 = vmax.f32 %v892_v17, 0.0  ;;  %v962_v24 = vmax.f32 %v942_v18, 0.0  ;;  %v994_v25 = vsel %vm989_vm4, %v888_v3, %v958_v15  ;;  %v995_v26 = vsel %vm989_vm4, %v939_v4, %v959_v16 }
 0x1ae   : > { %v996_v27 = vsel %vm990_vm5, %v890_v10, %v960_v19  ;;  %v1004_v28 = vsel %vm992_vm9, %v950_v11, %v968_v20  ;;  %vm1230_vm15 = vcmp.eq.s32.totalorder %v2833_v62, 1 }
 0x1af   : > { %v1647_v30 = vpack.c.bf16 %v996_v27, %v993_v21  ;;  %v1669_v31 = vpack.c.bf16 %v1004_v28, %v1001_v22  ;;  %v997_v32 = vsel %vm990_vm5, %v892_v17, %v961_v23  ;;  %v998_v33 = vsel %vm990_vm5, %v942_v18, %v962_v24  ;;  %v895_v34 = vpop.f32.mrb[4].mxu0  ;;  %v2835_v63 = vpop.permute.xlu1 %1222 }
 0x1b0   : > { %v1642_v35 = vpack.c.bf16 %v997_v32, %v994_v25  ;;  %v1664_v36 = vpack.c.bf16 %v998_v33, %v995_v26  ;;  %v896_v37 = vadd.f32 %v895_v34, %v811_v55  ;;  %v897_v38 = vpop.f32.mrb[5].mxu0  ;;  %vm1231_vm0 = vcmp.eq.s32.totalorder %v2835_v63, 1 }
 0x1b1   : > { %v898_v39 = vadd.f32 %v897_v38, %v811_v55  ;;  %v899_v40 = vpop.f32.mrb[6].mxu0 }
 0x1b2   : > { %v963_v41 = vmax.f32 %v896_v37, 0.0  ;;  %v900_v42 = vadd.f32 %v899_v40, %v2778_v56  ;;  %v901_v43 = vpop.f32.mrb[7].mxu0  ;;  %1643 = vmatprep.subr.msk.bf16.mxu1 %vm1641_vm12, %v1642_v35  ;;  %1712 = vmatprep.subr.msk.bf16.mxu0 %vm1641_vm12, %v1664_v36 }
 0x1b3   : > { %v964_v45 = vmax.f32 %v898_v39, 0.0  ;;  %v902_v46 = vadd.f32 %v901_v43, %v2778_v56  ;;  %1648 = vmatpush1.bf16.msk.msra.mxu1 %vm1641_vm12, %v1647_v30  ;;  %1713 = vmatpush3.bf16.msk.msra.mxu0 %vm1641_vm12, %v1664_v36  ;;  %v2839_v2 = vpop.permute.xlu1 %1258 }
 0x1b4   : > { %v966_v47 = vmax.f32 %v900_v42, 0.0  ;;  %1714 = vmatprep.subr.msk.bf16.mxu0 %vm2801_vm13, %v1669_v31  ;;  %v999_v49 = vsel %vm991_vm8, %v896_v37, %v963_v41  ;;  %vm1267_vm2 = vcmp.eq.s32.totalorder %v2839_v2, 1 }
 0x1b5   : > { %v967_v48 = vmax.f32 %v902_v46, 0.0  ;;  %v1000_v53 = vsel %vm991_vm8, %v898_v39, %v964_v45 }
 0x1b6   : > { %v1002_v51 = vsel %vm992_vm9, %v900_v42, %v966_v47 }
 0x1b7   : > { %v1657_v54 = vpack.c.bf16 %v1002_v51, %v999_v49  ;;  %v1003_v55 = vsel %vm992_vm9, %v902_v46, %v967_v48  ;;  %1715 = vmatpush3.bf16.msk.msra.mxu0 %vm2801_vm13, %v1669_v31  ;;  %v2843_v17 = vpop.permute.xlu1 %1228 }
 0x1b8   : > { %v1652_v56 = vpack.c.bf16 %v1003_v55, %v1000_v53  ;;  %vm1233_vm5 = vcmp.eq.s32.totalorder %v2843_v17, 1 }
 0x1ba   : > { %1653 = vmatprep.subr.msk.bf16.mxu1 %vm2801_vm13, %v1652_v56  ;;  %1717 = vmatmul.mubr.msk.bf16.vlgmr.msra.gmra.mrb[8].mxu0 %vm1085_vm3, %v1911_v52 }
 0x1bb   : > { %1658 = vmatpush1.bf16.msk.msra.mxu1 %vm2801_vm13, %v1657_v54  ;;  %1330 = vmatprep.mubr.bf16.mxu0 %v2142_v8  ;;  %v1265_v25 = vpop.permute.xlu1 %1264 }
 0x1bc   : > { %1720 = vmatprep.subr.bf16.mxu1 %v2143_v57  ;;  %vm1269_vm7 = vcmp.eq.s32.totalorder %v1265_v25, 1 }
 0x1be   : > { %1659 = vmatmul.mubr.msk.bf16.vlgmr.msra.gmra.mrb[4].mxu1 %vm1085_vm3, %v2774_v50  ;;  %v2837_v50 = vpop.permute.xlu0 %1255 }
 0x1bf   : > { %1134 = vmatprep.mubr.bf16.mxu1 %v2142_v8  ;;  %vm1266_vm1 = vcmp.eq.s32.totalorder %v2837_v50, 1 }
 0x1c2   : > { %v2841_v14 = vpop.permute.xlu0 %1225 }
 0x1c3   : > { %vm1232_vm4 = vcmp.eq.s32.totalorder %v2841_v14, 1 }
 0x1c6   : > { %1660 = vmatmul.mubr.msk.bf16.gmra.mrb[8].mxu1 %vm1085_vm3, %v1911_v52  ;;  %v1262_v21 = vpop.permute.xlu0 %1261 }
 0x1c7   : > { %1724 = vmatprep.mubr.msk.bf16.mxu1 %vm2144_vm14, %v2143_v57  ;;  %vm1268_vm6 = vcmp.eq.s32.totalorder %v1262_v21, 1 }
 0x28d   : > { %v1718_v0 = vpop.f32.mrb[8].mxu0 }
 0x28e   : > { %v1188_v8 = vadd.f32 %v1718_v0, %v1068_v60  ;;  %v1179_v1 = vpop.f32.mrb[9].mxu0 }
 0x28f   : > { %v1180_v3 = vadd.f32 %v1179_v1, %v1058_v58  ;;  %v1719_v4 = vpop.f32.mrb[10].mxu0 }
 0x290   : > { %1912 = vtanh.f32 %v1188_v8  ;;  %v1191_v5 = vadd.f32 %v1719_v4, %v1073_v61  ;;  %v1182_v6 = vpop.f32.mrb[11].mxu0 }
 0x291   : > { %1914 = vtanh.f32 %v1180_v3  ;;  %v1183_v7 = vadd.f32 %v1182_v6, %v1063_v59  ;;  %v1126_v9 = vpop.f32.mrb[4].mxu1 }
 0x292   : > { %1916 = vtanh.f32 %v1191_v5  ;;  %v1127_v10 = vadd.f32 %v1126_v9, %v1058_v58  ;;  %v1128_v11 = vpop.f32.mrb[5].mxu1 }
 0x293   : > { %1918 = vtanh.f32 %v1183_v7  ;;  %v1129_v12 = vadd.f32 %v1128_v11, %v1058_v58  ;;  %v1130_v13 = vpop.f32.mrb[6].mxu1  ;;  %v1293_v7 = vpop.permute.xlu0 %1292 }
 0x294   : > { %1920 = vtanh.f32 %v1127_v10  ;;  %v1131_v15 = vadd.f32 %v1130_v13, %v1063_v59  ;;  %v1132_v16 = vpop.f32.mrb[7].mxu1 }
 0x295   : > { %1922 = vtanh.f32 %v1129_v12  ;;  %v1133_v18 = vadd.f32 %v1132_v16, %v1063_v59 }
 0x296   : > { %1924 = vtanh.f32 %v1131_v15 }
 0x297   : > { %1926 = vtanh.f32 %v1133_v18 }
 0x299   : > { %v1136_v19 = vpop.f32.mrb[8].mxu1 }
 0x29a   : > { %v1913_v20 = vpop.eup %1912  ;;  %v1137_v22 = vadd.f32 %v1136_v19, %v1068_v60  ;;  %v1138_v23 = vpop.f32.mrb[9].mxu1 }
 0x29b   : > { %v1915_v24 = vpop.eup %1914  ;;  %v1139_v26 = vadd.f32 %v1138_v23, %v1068_v60  ;;  %v1140_v27 = vpop.f32.mrb[10].mxu1  ;;  %v1242_v28 = vsel %vm1232_vm4, 1.0, %v1913_v20  ;;  %v1282_v60 = vld [vmem:[%s2963_s7] sm:$0xf] }
 0x29c   : > { %v1917_v29 = vpop.eup %1916  ;;  %1928 = vtanh.f32 %v1137_v22  ;;  %v1141_v30 = vadd.f32 %v1140_v27, %v1073_v61  ;;  %v1142_v31 = vpop.f32.mrb[11].mxu1  ;;  %v1236_v32 = vsel %vm1230_vm15, 1.0, %v1915_v24  ;;  %v1278_v36 = vsel %vm1268_vm6, -1.0, %v1242_v28 }
 0x29d   : > { %v1919_v33 = vpop.eup %1918  ;;  %1930 = vtanh.f32 %v1139_v26  ;;  %v1143_v34 = vadd.f32 %v1142_v31, %v1073_v61  ;;  %v1245_v35 = vsel %vm1233_vm5, 1.0, %v1917_v29  ;;  %v1272_v39 = vsel %vm1266_vm1, -1.0, %v1236_v32  ;;  %v1411_v32 = vpop.permute.xlu0 %1410 }
 0x29e   : > { %v1921_v37 = vpop.eup %1920  ;;  %1932 = vtanh.f32 %v1141_v30  ;;  %v1239_v38 = vsel %vm1231_vm0, 1.0, %v1919_v33  ;;  %v1281_v40 = vsel %vm1269_vm7, -1.0, %v1245_v35  ;;  %v1402_v30 = vpop.permute.xlu1 %1401  ;;  %vm1412_vm8 = vcmp.eq.s32.totalorder %v1411_v32, 1 }
 0x29f   : > { %v1923_v41 = vpop.eup %1922  ;;  %1934 = vtanh.f32 %v1143_v34  ;;  %v1275_v42 = vsel %vm1267_vm2, -1.0, %v1239_v38  ;;  %v1288_v43 = vpack.c.bf16 %v1281_v40, %v1278_v36  ;;  %v1234_v44 = vsel %vm1230_vm15, 1.0, %v1921_v37 }
 0x2a0   : > { %v1925_v45 = vpop.eup %1924  ;;  %v1285_v46 = vpack.c.bf16 %v1275_v42, %v1272_v39  ;;  %v1235_v47 = vsel %vm1230_vm15, 1.0, %v1923_v41  ;;  %v1270_v52 = vsel %vm1266_vm1, -1.0, %v1234_v44 }
 0x2a1   : > { %v1927_v48 = vpop.eup %1926  ;;  %v1237_v49 = vsel %vm1231_vm0, 1.0, %v1925_v45  ;;  %v1271_v54 = vsel %vm1266_vm1, -1.0, %v1235_v47 }
 0x2a2   : > { %1721 = vmatpush3.bf16.msra.mxu1 %v1285_v46  ;;  %v1238_v51 = vsel %vm1231_vm0, 1.0, %v1927_v48  ;;  %v1273_v53 = vsel %vm1267_vm2, -1.0, %v1237_v49 }
 0x2a3   : > { %1722 = vmatprep.subr.bf16.mxu1 %v2143_v57  ;;  %v1274_v55 = vsel %vm1267_vm2, -1.0, %v1238_v51  ;;  %v1283_v56 = vpack.c.bf16 %v1273_v53, %v1270_v52 }
 0x2a4   : > { %v1284_v58 = vpack.c.bf16 %v1274_v55, %v1271_v54 }
 0x2a6   : > { %v1929_v59 = vpop.eup %1928  ;;  %1298 = vmatprep.subr.bf16.mxu0 %v1284_v58  ;;  %1723 = vmatpush3.bf16.msra.mxu1 %v1288_v43 }
 0x2a7   : > { %v1931_v61 = vpop.eup %1930  ;;  %1299 = vmatpush1.bf16.msra.mxu0 %v1283_v56  ;;  %v1240_v57 = vsel %vm1232_vm4, 1.0, %v1929_v59 }
 0x2a8   : > { %v1933_v62 = vpop.eup %1932  ;;  %v1241_v63 = vsel %vm1232_vm4, 1.0, %v1931_v61  ;;  %v1276_v1 = vsel %vm1268_vm6, -1.0, %v1240_v57 }
 0x2a9   : > { %v1935_v0 = vpop.eup %1934  ;;  %1725 = vmatmul.mubr.msk.bf16.vlgmr.msra.gmra.mrb[12].mxu1 %vm1085_vm3, %v1282_v60  ;;  %v1243_v50 = vsel %vm1233_vm5, 1.0, %v1933_v62  ;;  %v1277_v3 = vsel %vm1268_vm6, -1.0, %v1241_v63 }
 0x2aa   : > { %v1244_v8 = vsel %vm1233_vm5, 1.0, %v1935_v0  ;;  %v1279_v2 = vsel %vm1269_vm7, -1.0, %v1243_v50 }
 0x2ab   : > { %v1280_v4 = vsel %vm1269_vm7, -1.0, %v1244_v8  ;;  %v1286_v5 = vpack.c.bf16 %v1279_v2, %v1276_v1 }
 0x2ac   : > { %v1287_v6 = vpack.c.bf16 %v1280_v4, %v1277_v3 }
 0x2ae   : > { %1300 = vmatprep.subr.bf16.mxu0 %v1287_v6 }
 0x2af   : > { %1301 = vmatpush1.bf16.msra.mxu0 %v1286_v5 }
 0x2b2   : > { %1673 = vmatmul.mubr.msk.bf16.vlgmr.msra.gmra.mrb[12].mxu0 %vm1085_vm3, %v1282_v60  ;;  %vm1403_vm3 = vcmp.eq.s32.totalorder %v1402_v30, 1 }
 0x37c   : > { %v1373_v9 = vpop.f32.mrb[12].mxu1 }
 0x37d   : > { %v1374_v10 = vadd.f32 %v1373_v9, %v1293_v7  ;;  %v1726_v11 = vpop.f32.mrb[13].mxu1 }
 0x37e   : > { %v1376_v12 = vpop.f32.mrb[14].mxu1 }
 0x37f   : > { %v1382_v13 = vsub.f32 0.0, %v1374_v10  ;;  %v1727_v14 = vpop.f32.mrb[15].mxu1 }
 0x381   : > { %v1387_v15 = vmul.f32 1.442695, %v1382_v13 }
 0x383   : > { %1936 = vpow2.f32 %v1387_v15 }
 0x385   : > { %v1332_v16 = vpop.f32.mrb[12].mxu0 }
 0x386   : > { %v1333_v17 = vadd.f32 %v1332_v16, %v1293_v7  ;;  %v1334_v18 = vpop.f32.mrb[13].mxu0 }
 0x387   : > { %v1335_v19 = vadd.f32 %v1334_v18, %v1293_v7  ;;  %v1336_v20 = vpop.f32.mrb[14].mxu0 }
 0x388   : > { %v1380_v21 = vsub.f32 0.0, %v1333_v17  ;;  %v1337_v22 = vpop.f32.mrb[15].mxu0 }
 0x389   : > { %v1381_v23 = vsub.f32 0.0, %v1335_v19 }
 0x38a   : > { %v1383_v24 = vmul.f32 1.442695, %v1380_v21 }
 0x38b   : > { %v1385_v25 = vmul.f32 1.442695, %v1381_v23 }
 0x38c   : > { %1938 = vpow2.f32 %v1383_v24 }
 0x38d   : > { %v1937_v26 = vpop.eup %1936  ;;  %1940 = vpow2.f32 %v1385_v25 }
 0x38e   : > { %v1391_v27 = vadd.f32 1.0, %v1937_v26 }
 0x390   : > { %1942 = vrcp.f32 %v1391_v27 }
 0x396   : > { %v1939_v28 = vpop.eup %1938 }
 0x397   : > { %v1941_v29 = vpop.eup %1940  ;;  %v1389_v31 = vadd.f32 1.0, %v1939_v28 }
 0x398   : > { %v1390_v33 = vadd.f32 1.0, %v1941_v29 }
 0x399   : > { %1944 = vrcp.f32 %v1389_v31 }
 0x39a   : > { %v1943_v34 = vpop.eup %1942  ;;  %1946 = vrcp.f32 %v1390_v33 }
 0x39b   : > { %v1406_v35 = vsel %vm1403_vm3, 1.0, %v1943_v34 }
 0x39c   : > { %v1415_v36 = vsel %vm1412_vm8, 0.0, %v1406_v35 }
 0x39d   : > { %v1690_v37 = vpack.c.bf16 %v1415_v36, %v1415_v36 }
 0x39f   : > { %1430 = vst [vmem:[%s774_s10 + $0x8] sm:$0xf] %v1690_v37 }
 0x3a3   : > { %v1945_v38 = vpop.eup %1944  ;;  %1438 = sbr.rel (!%p2240_p6) target bundleno = 966 (0x3c6), region = 130 }
 0x3a4   : > { %v1947_v39 = vpop.eup %1946  ;;  %v1404_v40 = vsel %vm1403_vm3, 1.0, %v1945_v38 }
 0x3a5   : > { %v1413_v41 = vsel %vm1412_vm8, 0.0, %v1404_v40  ;;  %v1405_v42 = vsel %vm1403_vm3, 1.0, %v1947_v39 }
 0x3a6   : > { %v1414_v43 = vsel %vm1412_vm8, 0.0, %v1405_v42 }
 0x3a7   : > { %v1689_v44 = vpack.c.bf16 %v1414_v43, %v1413_v41 }
 0x3a9   : > { %1429 = vst [vmem:[%s774_s10] sm:$0xff] %v1689_v44 }
 0x3aa   : > { %s3020_s17 = smov (!%p1441_p7, %s1440_s17), 3 }
 0x3ab   : > { %s2904_s29 = sshll.u32 %s3020_s17, 6 }
 0x3ac   : > { %s1445_s12 = ssub.s32 192, %s2904_s29 }
 0x3ad   : > { %1446 = vsyncadd %s1432_s26, %s1445_s12  ;;  %p1678_p10 = scmp.ne.s32.totalorder %s2904_s29, 0  ;;  %s1691_s20 = smul.u32 192, %s3000_s15 }
 0x3ae   : > { %s1452_s23 = sshll.u32 %s774_s10, 4  ;;  %s3001_s24 = sld [smem:[#allocation13_spill]]  ;;  %s1453_s23 = int_to_ptr.vmem [resolvable:$true] %s1452_s23 }
 0x3af   : > { %s1948_s22 = scalar_lea.vmem %s1453_s23, %s2904_s29  ;;  %s2145_s18 = smov [#allocation3]  }
 0x3b0   : > { %p1949_p6 = scmp.ne.s32.totalorder %s1453_s23, %s1948_s22  ;;  %s1952_s11 = sshll.u32 %s2145_s18, 4  ;;  %s1953_s11 = int_to_ptr.vmem [resolvable:$false] %s1952_s11 }
 0x3b1   : > { %s1954_s19 = scalar_lea.vmem %s1953_s11, 384  ;;  %p1955_p13 = scmp.lt.s32.totalorder %s1453_s23, %s1953_s11 }
 0x3b2   : > { %p1950_p11 = pnand %p1949_p6, %p1678_p10  ;;  %p1956_p0 = scmp.lt.s32.totalorder %s1954_s19, %s1948_s22 }
 0x3b4   : > { %s2914_s27 = scalar_lea.hbm %s3001_s24, %s1691_s20  ;;  %p1951_p12 = pneg %p1950_p11 }
 0x3b5   : > { %p1957_p1 = por %p1956_p0, %p1955_p13 }
 0x3b7   : > { %p1958_p2 = pnand %p1957_p1, %p1951_p12 }
 0x3b9   : > { %1961 = shalt.err (!%p1958_p2)
}
 0x3ba   : > { %s1962_s13 = scalar_lea.hbm %s2914_s27, %s2904_s29  ;;  %s1966_s15 = scalar_lea.hbm %s3001_s24, 320 }
 0x3bb   : > { %p1963_p3 = scmp.ne.s32.totalorder %s2914_s27, %s1962_s13  ;;  %p1967_p7 = scmp.lt.u32.totalorder %s2914_s27, %s3001_s24 }
 0x3bc   : > { %p1968_p6 = scmp.lt.u32.totalorder %s1966_s15, %s1962_s13  ;;  %p1970_p12 = scmp.lt.u32.totalorder %s1962_s13, %s2914_s27 }
 0x3bd   : > { %p1964_p4 = pnand %p1963_p3, %p1678_p10 }
 0x3be   : > { %p1969_p11 = por %p1968_p6, %p1967_p7 }
 0x3bf   : > { %p1965_p5 = pneg %p1964_p4 }
 0x3c0   : > { %p1971_p13 = por %p1970_p12, %p1969_p11 }
 0x3c2   : > { %p1972_p0 = pnand %p1971_p13, %p1965_p5 }
 0x3c4   : > { %1975 = shalt.err (!%p1972_p0)
}
 0x3c5   : > { %1455 = dma.vmem_to_hbm [thread:$0]  (%p1678_p10), %s1453_s23, %s2904_s29, %s2914_s27, %s1432_s26  }
 0x3c6 PF: > { %s3002_s12 = sld [smem:[#allocation6_spill]]  ;;  %p1733_p1 = pnand %p1601_p9, %p2244_p8 }
 0x3cc   : > { %s1464_s21 = sand.u32 1, %s3002_s12  }
 0x3cd   : > { %s1465_s30 = scalar_lea.sflag [#allocation4], %s1464_s21 }
 0x3ce   : > { %2057 = dma.done.wait (!%p1733_p1), %s1465_s30, 192  }
 0x3cf   : > { %2059 = vsyncadd (!%p1733_p1), %s1465_s30, 4294967104  ;;  %s3004_s16 = sld [smem:[#allocation9_spill]]  ;;  %s3005_s22 = sld [smem:[#allocation7_spill]] }
 0x3d0   : > { %s3006_s15 = sld [smem:[#allocation10_spill]]  ;;  %s3007_s13 = smov %s2066_s14 }
 0x3d5   : > { %p20_p2 = scmp.ge.s32.totalorder %s3004_s16, 4   ;;  %s3008_s14 = smov %s3005_s22 }
 0x3d7   :  { %22 = sbr.rel (!%p20_p2) target bundleno = 6 (0x6), region = 228 }
 0x3de   :  { %1470 = vsyncpa [#allocation4], 1 }
 0x3df   :  { %1472 = vsyncpa [#allocation4 + $0x1], 1 }

</bundles_post_ra>
